<compile_context>
chip_gen: v6e
topology: v6e:2x2x1
jax: 0.10.0
libtpu: 0.0.40
codegen_flags: <defaults>
</compile_context>

<pallas_src>
import jax
import jax.numpy as jnp
from jax.experimental import pallas as pl
from jax.experimental.pallas import tpu as pltpu

LANE = 128                      # TPU lane width: channel axes padded to this
_VMEM_LIMIT = 32 * 1024 * 1024  # explicit scoped-VMEM cap (safe on v5e/v6e/v7x)


def _round_up(x, m):
    return (x + m - 1) // m * m


# ----------------------------- Pallas kernels ------------------------------

def _pw_relu_kernel(x_ref, w_ref, b_ref, o_ref):
    """1x1 conv (matmul) + folded-BN bias + ReLU; bf16 MXU, f32 accumulate."""
    y = jnp.dot(x_ref[...].astype(jnp.bfloat16), w_ref[...],
                preferred_element_type=jnp.float32)
    o_ref[...] = jnp.maximum(y + b_ref[...], 0.0).astype(o_ref.dtype)


def pw_conv_relu(x2d, w, b, *, out_dtype=jnp.bfloat16, tile_m=1024):
    """relu(x2d @ w + b); x2d is (N*H*W, Cin_p), Cin_p a multiple of 128."""
    M, cin = x2d.shape
    cout = w.shape[1]
    tm = min(tile_m, _round_up(M, 16))
    if pl.cdiv(M, tm) < 2 and M >= 32:      # >= 2 parallel blocks (v7x: 2 TCs)
        tm = _round_up(pl.cdiv(M, 2), 16)
    mp = pl.cdiv(M, tm) * tm                # pad M up instead of tm=M fallback
    xp = x2d if mp == M else jnp.pad(x2d, ((0, mp - M), (0, 0)))
    out = pl.pallas_call(
        _pw_relu_kernel,
        out_shape=jax.ShapeDtypeStruct((mp, cout), out_dtype),
        grid=(mp // tm,),
        in_specs=[pl.BlockSpec((tm, cin), lambda i: (i, 0)),
                  pl.BlockSpec((cin, cout), lambda i: (0, 0)),
                  pl.BlockSpec((1, cout), lambda i: (0, 0))],
        out_specs=pl.BlockSpec((tm, cout), lambda i: (i, 0)),
        compiler_params=pltpu.CompilerParams(
            dimension_semantics=("parallel",),
            vmem_limit_bytes=_VMEM_LIMIT),
    )(xp, w, b)
    return out if mp == M else out[:M]


def _block_tail_kernel(H, W, s, has_ds):
    """Fused: pad -> dw3x3(stride s)+BN+ReLU -> SE -> conv3+BN -> +shortcut -> ReLU."""
    Ho = (H - 1) // s + 1
    Wo = (W - 1) // s + 1

    def kernel(y_ref, w2_ref, b2_ref, sw1_ref, sb1_ref, sw2_ref, sb2_ref,
               w3_ref, b3_ref, sc_ref, *rest):
        if has_ds:
            dsw_ref, dsb_ref, o_ref, pad_ref = rest
        else:
            o_ref, pad_ref = rest
        B = w2_ref.shape[-1]
        cout = b3_ref.shape[-1]

        # -- (1,1) spatial halo padding done in-kernel in a VMEM scratch -----
        pad_ref[...] = jnp.zeros_like(pad_ref)
        pad_ref[1:H + 1, 1:W + 1, :] = y_ref[0].astype(jnp.float32)

        # -- depthwise 3x3 with the stride folded in: only strided outputs ---
        w2 = w2_ref[...]                                   # (9, B) f32
        acc = jnp.zeros((Ho, Wo, B), jnp.float32)
        for ky in range(3):
            for kx in range(3):
                if s == 1:
                    win = pad_ref[ky:ky + Ho, kx:kx + Wo, :]
                else:
                    win = pad_ref[pl.ds(ky, Ho, s), pl.ds(kx, Wo, s), :]
                acc = acc + win * w2[ky * 3 + kx][None, None, :]
        z = jnp.maximum(acc + b2_ref[...], 0.0)            # (Ho, Wo, B)

        # -- SE: global pool -> fc -> ReLU -> fc -> sigmoid -> gate (f32) ----
        zf = z.reshape(Ho * Wo, B)
        pooled = jnp.mean(zf, axis=0, keepdims=True)       # (1, B)
        h = jnp.dot(pooled, sw1_ref[...], preferred_element_type=jnp.float32)
        h = jnp.maximum(h + sb1_ref[...], 0.0)
        g = jnp.dot(h, sw2_ref[...], preferred_element_type=jnp.float32)
        g = jax.nn.sigmoid(g + sb2_ref[...])               # (1, B)
        gated = zf * g                                     # broadcast over pixels

        # -- conv3 (1x1 + BN) fused with shortcut add + final ReLU -----------
        y3 = jnp.dot(gated.astype(jnp.bfloat16), w3_ref[...],
                     preferred_element_type=jnp.float32) + b3_ref[...]
        if has_ds:
            sc = sc_ref[0].reshape(Ho * Wo, sc_ref.shape[-1])
            res = jnp.dot(sc.astype(jnp.bfloat16), dsw_ref[...],
                          preferred_element_type=jnp.float32) + dsb_ref[...]
        else:
            res = sc_ref[0].reshape(Ho * Wo, cout)
        out = jnp.maximum(y3 + res, 0.0)
        o_ref[0] = out.reshape(Ho, Wo, cout).astype(o_ref.dtype)

    return kernel


def block_tail(y, p, shortcut, *, stride):
    N, H, W, B = y.shape
    s = stride
    Ho = (H - 1) // s + 1
    Wo = (W - 1) // s + 1
    has_ds = p['ds_w'] is not None
    cin_p = shortcut.shape[-1]
    cout = p['b3'].shape[-1]
    rp = p['se_w1'].shape[1]

    in_specs = [
        pl.BlockSpec((1, H, W, B), lambda n: (n, 0, 0, 0)),        # conv1 out
        pl.BlockSpec((9, B), lambda n: (0, 0)),                    # dw weight
        pl.BlockSpec((1, B), lambda n: (0, 0)),                    # dw bias
        pl.BlockSpec((B, rp), lambda n: (0, 0)),                   # SE fc1 w
        pl.BlockSpec((1, rp), lambda n: (0, 0)),                   # SE fc1 b
        pl.BlockSpec((rp, B), lambda n: (0, 0)),                   # SE fc2 w
        pl.BlockSpec((1, B), lambda n: (0, 0)),                    # SE fc2 b
        pl.BlockSpec((B, cout), lambda n: (0, 0)),                 # conv3 w
        pl.BlockSpec((1, cout), lambda n: (0, 0)),                 # conv3 b
        pl.BlockSpec((1, Ho, Wo, cin_p), lambda n: (n, 0, 0, 0)),  # shortcut
    ]
    args = [y, p['w2'], p['b2'], p['se_w1'], p['se_b1'], p['se_w2'],
            p['se_b2'], p['w3'], p['b3'], shortcut]
    if has_ds:
        in_specs += [pl.BlockSpec((cin_p, cout), lambda n: (0, 0)),
                     pl.BlockSpec((1, cout), lambda n: (0, 0))]
        args += [p['ds_w'], p['ds_b']]

    return pl.pallas_call(
        _block_tail_kernel(H, W, s, has_ds),
        out_shape=jax.ShapeDtypeStruct((N, Ho, Wo, cout), jnp.float32),
        grid=(N,),
        in_specs=in_specs,
        out_specs=pl.BlockSpec((1, Ho, Wo, cout), lambda n: (n, 0, 0, 0)),
        scratch_shapes=[pltpu.VMEM((H + 2, W + 2, B), jnp.float32)],
        compiler_params=pltpu.CompilerParams(
            dimension_semantics=("parallel",),
            vmem_limit_bytes=_VMEM_LIMIT),
    )(*args)


# ---------------------------- parameter setup ------------------------------

def _fold_bn(gamma, beta, mean, var, eps=1e-5):
    scale = gamma / jnp.sqrt(var + eps)
    bias = beta - mean * scale
    return scale, bias


def _bn_params(key, c):
    k1, k2, k3, k4 = jax.random.split(key, 4)
    gamma = 1.0 + 0.1 * jax.random.normal(k1, (c,), jnp.float32)
    beta = 0.1 * jax.random.normal(k2, (c,), jnp.float32)
    mean = 0.1 * jax.random.normal(k3, (c,), jnp.float32)
    var = 1.0 + 0.1 * jnp.abs(jax.random.normal(k4, (c,), jnp.float32))
    return gamma, beta, mean, var


def _pad2(w, rows, cols):
    return jnp.pad(w, ((0, rows - w.shape[0]), (0, cols - w.shape[1])))


def make_bottleneck_params(key, in_chs, out_chs, stride,
                           bottle_ratio=1.0, group_size=1, se_ratio=0.25):
    # TODO(synk): general grouped conv (group_size > 1) not implemented; the
    # module default group_size=1 makes conv2 depthwise, which is what we support.
    assert group_size == 1
    bott = int(round(out_chs * bottle_ratio))
    se_chs = int(round(in_chs * se_ratio))
    cin_p = _round_up(in_chs, LANE)
    bott_p = _round_up(bott, LANE)
    cout_p = _round_up(out_chs, LANE)
    se_p = _round_up(se_chs, LANE)
    keys = jax.random.split(key, 16)
    p = {'stride': stride, 'out_chs': out_chs}

    # conv1: 1x1 in->bott, BN, ReLU   (bf16 weights for the MXU)
    w1 = 0.1 * jax.random.normal(keys[0], (in_chs, bott), jnp.float32)
    s1, b1 = _fold_bn(*_bn_params(keys[1], bott))
    p['w1'] = _pad2(w1 * s1[None, :], cin_p, bott_p).astype(jnp.bfloat16)
    p['b1'] = _pad2(b1[None, :], 1, bott_p)

    # conv2: depthwise 3x3 (stride), BN, ReLU  (stored as (9, bott_p), f32)
    w2 = 0.1 * jax.random.normal(keys[2], (3, 3, bott), jnp.float32)
    s2, b2 = _fold_bn(*_bn_params(keys[3], bott))
    p['w2'] = _pad2((w2 * s2[None, None, :]).reshape(9, bott), 9, bott_p)
    p['b2'] = _pad2(b2[None, :], 1, bott_p)

    # SE: reduce channels derived from the block *input* channels (f32)
    p['se_w1'] = _pad2(0.1 * jax.random.normal(keys[4], (bott, se_chs), jnp.float32), bott_p, se_p)
    p['se_b1'] = _pad2(0.1 * jax.random.normal(keys[5], (1, se_chs), jnp.float32), 1, se_p)
    p['se_w2'] = _pad2(0.1 * jax.random.normal(keys[6], (se_chs, bott), jnp.float32), se_p, bott_p)
    p['se_b2'] = _pad2(0.1 * jax.random.normal(keys[7], (1, bott), jnp.float32), 1, bott_p)

    # conv3: 1x1 bott->out, BN, no act
    w3 = 0.1 * jax.random.normal(keys[8], (bott, out_chs), jnp.float32)
    s3, b3 = _fold_bn(*_bn_params(keys[9], out_chs))
    p['w3'] = _pad2(w3 * s3[None, :], bott_p, cout_p).astype(jnp.bfloat16)
    p['b3'] = _pad2(b3[None, :], 1, cout_p)

    # downsample shortcut (1x1 conv + BN) when shape changes, else identity
    if in_chs != out_chs or stride != 1:
        wd = 0.1 * jax.random.normal(keys[10], (in_chs, out_chs), jnp.float32)
        sd, bd = _fold_bn(*_bn_params(keys[11], out_chs))
        p['ds_w'] = _pad2(wd * sd[None, :], cin_p, cout_p).astype(jnp.bfloat16)
        p['ds_b'] = _pad2(bd[None, :], 1, cout_p)
    else:
        p['ds_w'], p['ds_b'] = None, None
    return p


def make_regstage_params(key, depth, in_chs, out_chs, stride, **kw):
    keys = jax.random.split(key, depth)
    params = []
    for i in range(depth):
        b_stride = stride if i == 0 else 1
        b_in = in_chs if i == 0 else out_chs
        params.append(make_bottleneck_params(keys[i], b_in, out_chs, b_stride, **kw))
    return params


# ------------------------------ forward pass -------------------------------

def bottleneck_forward(x, p):
    # x: NHWC, channel-padded, f32
    N, H, W, cin_p = x.shape
    s = p['stride']
    bott_p = p['w1'].shape[1]

    # conv1: one big lane-dense matmul over flattened pixels (bf16 output)
    y = pw_conv_relu(x.reshape(N * H * W, cin_p), p['w1'], p['b1'])
    y = y.reshape(N, H, W, bott_p)

    # shortcut pixels (strided outside only when a 1x1/stride-s downsample exists)
    if p['ds_w'] is not None and s > 1:
        sc = x[:, ::s, ::s, :]
    else:
        sc = x

    # fused: pad -> dw3x3(stride) -> SE -> conv3 -> (+shortcut/downsample) -> ReLU
    return block_tail(y, p, sc, stride=s)


def reg_stage_forward(x_nchw, params, out_chs):
    x = jnp.transpose(x_nchw, (0, 2, 3, 1))                 # NCHW -> NHWC
    cin = x.shape[-1]
    cin_p = params[0]['w1'].shape[0]
    x = jnp.pad(x, ((0, 0), (0, 0), (0, 0), (0, cin_p - cin)))
    for p in params:
        x = bottleneck_forward(x, p)
    x = x[..., :out_chs]
    return jnp.transpose(x, (0, 3, 1, 2))                   # NHWC -> NCHW


# ------------------------- pure-JAX reference check -------------------------

def reg_stage_reference(x_nchw, params, out_chs):
    x = jnp.transpose(x_nchw, (0, 2, 3, 1))
    cin_p = params[0]['w1'].shape[0]
    x = jnp.pad(x, ((0, 0), (0, 0), (0, 0), (0, cin_p - x.shape[-1])))
    for p in params:
        s = p['stride']
        shortcut = x
        w1 = p['w1'].astype(jnp.float32)
        y = jax.nn.relu(jnp.einsum('nhwc,cd->nhwd', x, w1) + p['b1'].reshape(1, 1, 1, -1))
        C = y.shape[-1]
        y = jax.lax.conv_general_dilated(
            y, p['w2'].reshape(3, 3, 1, C), window_strides=(s, s),
            padding=((1, 1), (1, 1)),
            dimension_numbers=('NHWC', 'HWIO', 'NHWC'),
            feature_group_count=C)
        y = jax.nn.relu(y + p['b2'].reshape(1, 1, 1, -1))
        pooled = jnp.mean(y, axis=(1, 2))
        h = jax.nn.relu(pooled @ p['se_w1'] + p['se_b1'])
        g = jax.nn.sigmoid(h @ p['se_w2'] + p['se_b2'])
        y = y * g[:, None, None, :]
        if p['ds_w'] is None:
            res = shortcut
        else:
            sc = shortcut[:, ::s, ::s, :] if s > 1 else shortcut
            res = (jnp.einsum('nhwc,cd->nhwd', sc, p['ds_w'].astype(jnp.float32))
                   + p['ds_b'].reshape(1, 1, 1, -1))
        x = jax.nn.relu(jnp.einsum('nhwc,cd->nhwd', y, p['w3'].astype(jnp.float32))
                        + p['b3'].reshape(1, 1, 1, -1) + res)
    return jnp.transpose(x[..., :out_chs], (0, 3, 1, 2))


# ---------------------------------- main ------------------------------------

if __name__ == "__main__":
    key = jax.random.PRNGKey(0)
    k_x, k_p = jax.random.split(key)

    depth, in_chs, out_chs, stride = 2, 32, 64, 2
    N, H, W = 2, 16, 16

    x = jax.random.normal(k_x, (N, in_chs, H, W), jnp.float32)      # NCHW
    params = make_regstage_params(k_p, depth, in_chs, out_chs, stride)

    fwd = jax.jit(lambda v: reg_stage_forward(v, params, out_chs))
    out = jax.block_until_ready(fwd(x))
    ref = jax.block_until_ready(reg_stage_reference(x, params, out_chs))

    assert out.shape == (N, out_chs, H // stride, W // stride), out.shape
    # bf16 MXU inputs with f32 accumulation -> small numerical drift vs f32 ref
    if not jnp.allclose(out, ref, atol=5e-2, rtol=5e-2):
        raise AssertionError(
            f"mismatch vs reference, max abs err = {jnp.max(jnp.abs(out - ref))}")
    print("KERNEL_OK")
</pallas_src>

<mosaic_0001>
module attributes {stable_mosaic.version = 11 : i64} {
  func.func @kernel(%arg0: i32, %arg1: memref<1x16x16x128xbf16, #tpu.memory_space<vmem>>, %arg2: memref<9x128xf32, #tpu.memory_space<vmem>>, %arg3: memref<1x128xf32, #tpu.memory_space<vmem>>, %arg4: memref<128x128xf32, #tpu.memory_space<vmem>>, %arg5: memref<1x128xf32, #tpu.memory_space<vmem>>, %arg6: memref<128x128xf32, #tpu.memory_space<vmem>>, %arg7: memref<1x128xf32, #tpu.memory_space<vmem>>, %arg8: memref<128x128xbf16, #tpu.memory_space<vmem>>, %arg9: memref<1x128xf32, #tpu.memory_space<vmem>>, %arg10: memref<1x8x8x128xf32, #tpu.memory_space<vmem>>, %arg11: memref<128x128xbf16, #tpu.memory_space<vmem>>, %arg12: memref<1x128xf32, #tpu.memory_space<vmem>>, %arg13: memref<1x8x8x128xf32, #tpu.memory_space<vmem>>, %arg14: memref<18x18x128xf32, #tpu.memory_space<vmem>>) attributes {dimension_semantics = [#tpu.dimension_semantics<parallel>], iteration_bounds = array<i64: 2>, scalar_prefetch = 0 : i64, scratch_operands = 1 : i64, tpu.core_type = #tpu.core_type<tc>, window_params = [{transform_indices = @transform_0, window_bounds = array<i64: 1, 16, 16, 128>}, {pipeline_mode = #tpu.pipeline_mode<synchronous>, transform_indices = @transform_1, window_bounds = array<i64: 9, 128>}, {pipeline_mode = #tpu.pipeline_mode<synchronous>, transform_indices = @transform_2, window_bounds = array<i64: 1, 128>}, {pipeline_mode = #tpu.pipeline_mode<synchronous>, transform_indices = @transform_3, window_bounds = array<i64: 128, 128>}, {pipeline_mode = #tpu.pipeline_mode<synchronous>, transform_indices = @transform_4, window_bounds = array<i64: 1, 128>}, {pipeline_mode = #tpu.pipeline_mode<synchronous>, transform_indices = @transform_5, window_bounds = array<i64: 128, 128>}, {pipeline_mode = #tpu.pipeline_mode<synchronous>, transform_indices = @transform_6, window_bounds = array<i64: 1, 128>}, {pipeline_mode = #tpu.pipeline_mode<synchronous>, transform_indices = @transform_7, window_bounds = array<i64: 128, 128>}, {pipeline_mode = #tpu.pipeline_mode<synchronous>, transform_indices = @transform_8, window_bounds = array<i64: 1, 128>}, {transform_indices = @transform_9, window_bounds = array<i64: 1, 8, 8, 128>}, {pipeline_mode = #tpu.pipeline_mode<synchronous>, transform_indices = @transform_10, window_bounds = array<i64: 128, 128>}, {pipeline_mode = #tpu.pipeline_mode<synchronous>, transform_indices = @transform_11, window_bounds = array<i64: 1, 128>}, {transform_indices = @transform_12, window_bounds = array<i64: 1, 8, 8, 128>}]} {
    %cst = arith.constant 0.000000e+00 : f32
    %0 = vector.broadcast %cst : f32 to vector<18x18x128xf32>
    %c0 = arith.constant 0 : index
    %c0_0 = arith.constant 0 : index
    %c0_1 = arith.constant 0 : index
    %1 = vector.load %arg14[%c0, %c0_0, %c0_1] : memref<18x18x128xf32, #tpu.memory_space<vmem>>, vector<18x18x128xf32>
    tpu.vector_store %arg14[%c0, %c0_0, %c0_1], %0 {strides = array<i32>} : memref<18x18x128xf32, #tpu.memory_space<vmem>>, vector<18x18x128xf32>,
    %c0_2 = arith.constant 0 : index
    %c0_3 = arith.constant 0 : index
    %c0_4 = arith.constant 0 : index
    %c0_5 = arith.constant 0 : index
    %2 = vector.load %arg1[%c0_2, %c0_3, %c0_4, %c0_5] : memref<1x16x16x128xbf16, #tpu.memory_space<vmem>>, vector<1x16x16x128xbf16>
    %3 = vector.shape_cast %2 : vector<1x16x16x128xbf16> to vector<16x16x128xbf16>
    %4 = arith.extf %3 : vector<16x16x128xbf16> to vector<16x16x128xf32>
    %c1 = arith.constant 1 : index
    %c1_6 = arith.constant 1 : index
    %c0_7 = arith.constant 0 : index
    %5 = vector.load %arg14[%c1, %c1_6, %c0_7] : memref<18x18x128xf32, #tpu.memory_space<vmem>>, vector<16x16x128xf32>
    tpu.vector_store %arg14[%c1, %c1_6, %c0_7], %4 {strides = array<i32>} : memref<18x18x128xf32, #tpu.memory_space<vmem>>, vector<16x16x128xf32>,
    %c0_8 = arith.constant 0 : index
    %c0_9 = arith.constant 0 : index
    %6 = vector.load %arg2[%c0_8, %c0_9] : memref<9x128xf32, #tpu.memory_space<vmem>>, vector<9x128xf32>
    %cst_10 = arith.constant 0.000000e+00 : f32
    %7 = vector.broadcast %cst_10 : f32 to vector<8x8x128xf32>
    %c0_11 = arith.constant 0 : index
    %c0_12 = arith.constant 0 : index
    %c0_13 = arith.constant 0 : index
    %8 = tpu.strided_load %arg14[%c0_11, %c0_12, %c0_13] {strides = array<i32: 2, 2, 1>} : memref<18x18x128xf32, #tpu.memory_space<vmem>>, vector<8x8x128xf32>
    %9 = vector.extract_strided_slice %6 {offsets = [0, 0], sizes = [1, 128], strides = [1, 1]} : vector<9x128xf32> to vector<1x128xf32>
    %10 = vector.shape_cast %9 : vector<1x128xf32> to vector<128xf32>
    %11 = vector.shape_cast %10 : vector<128xf32> to vector<1x1x128xf32>
    %12 = vector.broadcast %11 : vector<1x1x128xf32> to vector<8x8x128xf32>
    %13 = arith.mulf %8, %12 : vector<8x8x128xf32>
    %14 = arith.addf %7, %13 : vector<8x8x128xf32>
    %c0_14 = arith.constant 0 : index
    %c1_15 = arith.constant 1 : index
    %c0_16 = arith.constant 0 : index
    %15 = tpu.strided_load %arg14[%c0_14, %c1_15, %c0_16] {strides = array<i32: 2, 2, 1>} : memref<18x18x128xf32, #tpu.memory_space<vmem>>, vector<8x8x128xf32>
    %16 = vector.extract_strided_slice %6 {offsets = [1, 0], sizes = [1, 128], strides = [1, 1]} : vector<9x128xf32> to vector<1x128xf32>
    %17 = vector.shape_cast %16 : vector<1x128xf32> to vector<128xf32>
    %18 = vector.shape_cast %17 : vector<128xf32> to vector<1x1x128xf32>
    %19 = vector.broadcast %18 : vector<1x1x128xf32> to vector<8x8x128xf32>
    %20 = arith.mulf %15, %19 : vector<8x8x128xf32>
    %21 = arith.addf %14, %20 : vector<8x8x128xf32>
    %c0_17 = arith.constant 0 : index
    %c2 = arith.constant 2 : index
    %c0_18 = arith.constant 0 : index
    %22 = tpu.strided_load %arg14[%c0_17, %c2, %c0_18] {strides = array<i32: 2, 2, 1>} : memref<18x18x128xf32, #tpu.memory_space<vmem>>, vector<8x8x128xf32>
    %23 = vector.extract_strided_slice %6 {offsets = [2, 0], sizes = [1, 128], strides = [1, 1]} : vector<9x128xf32> to vector<1x128xf32>
    %24 = vector.shape_cast %23 : vector<1x128xf32> to vector<128xf32>
    %25 = vector.shape_cast %24 : vector<128xf32> to vector<1x1x128xf32>
    %26 = vector.broadcast %25 : vector<1x1x128xf32> to vector<8x8x128xf32>
    %27 = arith.mulf %22, %26 : vector<8x8x128xf32>
    %28 = arith.addf %21, %27 : vector<8x8x128xf32>
    %c1_19 = arith.constant 1 : index
    %c0_20 = arith.constant 0 : index
    %c0_21 = arith.constant 0 : index
    %29 = tpu.strided_load %arg14[%c1_19, %c0_20, %c0_21] {strides = array<i32: 2, 2, 1>} : memref<18x18x128xf32, #tpu.memory_space<vmem>>, vector<8x8x128xf32>
    %30 = vector.extract_strided_slice %6 {offsets = [3, 0], sizes = [1, 128], strides = [1, 1]} : vector<9x128xf32> to vector<1x128xf32>
    %31 = vector.shape_cast %30 : vector<1x128xf32> to vector<128xf32>
    %32 = vector.shape_cast %31 : vector<128xf32> to vector<1x1x128xf32>
    %33 = vector.broadcast %32 : vector<1x1x128xf32> to vector<8x8x128xf32>
    %34 = arith.mulf %29, %33 : vector<8x8x128xf32>
    %35 = arith.addf %28, %34 : vector<8x8x128xf32>
    %c1_22 = arith.constant 1 : index
    %c1_23 = arith.constant 1 : index
    %c0_24 = arith.constant 0 : index
    %36 = tpu.strided_load %arg14[%c1_22, %c1_23, %c0_24] {strides = array<i32: 2, 2, 1>} : memref<18x18x128xf32, #tpu.memory_space<vmem>>, vector<8x8x128xf32>
    %37 = vector.extract_strided_slice %6 {offsets = [4, 0], sizes = [1, 128], strides = [1, 1]} : vector<9x128xf32> to vector<1x128xf32>
    %38 = vector.shape_cast %37 : vector<1x128xf32> to vector<128xf32>
    %39 = vector.shape_cast %38 : vector<128xf32> to vector<1x1x128xf32>
    %40 = vector.broadcast %39 : vector<1x1x128xf32> to vector<8x8x128xf32>
    %41 = arith.mulf %36, %40 : vector<8x8x128xf32>
    %42 = arith.addf %35, %41 : vector<8x8x128xf32>
    %c1_25 = arith.constant 1 : index
    %c2_26 = arith.constant 2 : index
    %c0_27 = arith.constant 0 : index
    %43 = tpu.strided_load %arg14[%c1_25, %c2_26, %c0_27] {strides = array<i32: 2, 2, 1>} : memref<18x18x128xf32, #tpu.memory_space<vmem>>, vector<8x8x128xf32>
    %44 = vector.extract_strided_slice %6 {offsets = [5, 0], sizes = [1, 128], strides = [1, 1]} : vector<9x128xf32> to vector<1x128xf32>
    %45 = vector.shape_cast %44 : vector<1x128xf32> to vector<128xf32>
    %46 = vector.shape_cast %45 : vector<128xf32> to vector<1x1x128xf32>
    %47 = vector.broadcast %46 : vector<1x1x128xf32> to vector<8x8x128xf32>
    %48 = arith.mulf %43, %47 : vector<8x8x128xf32>
    %49 = arith.addf %42, %48 : vector<8x8x128xf32>
    %c2_28 = arith.constant 2 : index
    %c0_29 = arith.constant 0 : index
    %c0_30 = arith.constant 0 : index
    %50 = tpu.strided_load %arg14[%c2_28, %c0_29, %c0_30] {strides = array<i32: 2, 2, 1>} : memref<18x18x128xf32, #tpu.memory_space<vmem>>, vector<8x8x128xf32>
    %51 = vector.extract_strided_slice %6 {offsets = [6, 0], sizes = [1, 128], strides = [1, 1]} : vector<9x128xf32> to vector<1x128xf32>
    %52 = vector.shape_cast %51 : vector<1x128xf32> to vector<128xf32>
    %53 = vector.shape_cast %52 : vector<128xf32> to vector<1x1x128xf32>
    %54 = vector.broadcast %53 : vector<1x1x128xf32> to vector<8x8x128xf32>
    %55 = arith.mulf %50, %54 : vector<8x8x128xf32>
    %56 = arith.addf %49, %55 : vector<8x8x128xf32>
    %c2_31 = arith.constant 2 : index
    %c1_32 = arith.constant 1 : index
    %c0_33 = arith.constant 0 : index
    %57 = tpu.strided_load %arg14[%c2_31, %c1_32, %c0_33] {strides = array<i32: 2, 2, 1>} : memref<18x18x128xf32, #tpu.memory_space<vmem>>, vector<8x8x128xf32>
    %58 = vector.extract_strided_slice %6 {offsets = [7, 0], sizes = [1, 128], strides = [1, 1]} : vector<9x128xf32> to vector<1x128xf32>
    %59 = vector.shape_cast %58 : vector<1x128xf32> to vector<128xf32>
    %60 = vector.shape_cast %59 : vector<128xf32> to vector<1x1x128xf32>
    %61 = vector.broadcast %60 : vector<1x1x128xf32> to vector<8x8x128xf32>
    %62 = arith.mulf %57, %61 : vector<8x8x128xf32>
    %63 = arith.addf %56, %62 : vector<8x8x128xf32>
    %c2_34 = arith.constant 2 : index
    %c2_35 = arith.constant 2 : index
    %c0_36 = arith.constant 0 : index
    %64 = tpu.strided_load %arg14[%c2_34, %c2_35, %c0_36] {strides = array<i32: 2, 2, 1>} : memref<18x18x128xf32, #tpu.memory_space<vmem>>, vector<8x8x128xf32>
    %65 = vector.extract_strided_slice %6 {offsets = [8, 0], sizes = [1, 128], strides = [1, 1]} : vector<9x128xf32> to vector<1x128xf32>
    %66 = vector.shape_cast %65 : vector<1x128xf32> to vector<128xf32>
    %67 = vector.shape_cast %66 : vector<128xf32> to vector<1x1x128xf32>
    %68 = vector.broadcast %67 : vector<1x1x128xf32> to vector<8x8x128xf32>
    %69 = arith.mulf %64, %68 : vector<8x8x128xf32>
    %70 = arith.addf %63, %69 : vector<8x8x128xf32>
    %c0_37 = arith.constant 0 : index
    %c0_38 = arith.constant 0 : index
    %71 = vector.load %arg3[%c0_37, %c0_38] : memref<1x128xf32, #tpu.memory_space<vmem>>, vector<1x128xf32>
    %72 = vector.shape_cast %71 : vector<1x128xf32> to vector<1x1x128xf32>
    %73 = vector.broadcast %72 : vector<1x1x128xf32> to vector<8x8x128xf32>
    %74 = arith.addf %70, %73 : vector<8x8x128xf32>
    %cst_39 = arith.constant 0.000000e+00 : f32
    %75 = vector.broadcast %cst_39 : f32 to vector<8x8x128xf32>
    %76 = arith.maximumf %74, %75 : vector<8x8x128xf32>
    %77 = vector.shape_cast %76 : vector<8x8x128xf32> to vector<64x128xf32>
    %cst_40 = arith.constant dense<0.000000e+00> : vector<128xf32>
    %78 = vector.multi_reduction <add>, %77, %cst_40 [0] : vector<64x128xf32> to vector<128xf32>
    %79 = vector.shape_cast %78 : vector<128xf32> to vector<1x128xf32>
    %cst_41 = arith.constant 6.400000e+01 : f32
    %80 = vector.broadcast %cst_41 : f32 to vector<1x128xf32>
    %81 = arith.divf %79, %80 : vector<1x128xf32>
    %c0_42 = arith.constant 0 : index
    %c0_43 = arith.constant 0 : index
    %82 = vector.load %arg4[%c0_42, %c0_43] : memref<128x128xf32, #tpu.memory_space<vmem>>, vector<128x128xf32>
    %cst_44 = arith.constant dense<0.000000e+00> : vector<1x128xf32>
    %83 = tpu.matmul %81, %82, %cst_44 {dimension_numbers = #tpu.dot_dimension_numbers<[1], [0], [0], [1], [0, 0, 1, 1], [], []>} : vector<1x128xf32>, vector<128x128xf32>, vector<1x128xf32> -> vector<1x128xf32>
    %c0_45 = arith.constant 0 : index
    %c0_46 = arith.constant 0 : index
    %84 = vector.load %arg5[%c0_45, %c0_46] : memref<1x128xf32, #tpu.memory_space<vmem>>, vector<1x128xf32>
    %85 = arith.addf %83, %84 : vector<1x128xf32>
    %cst_47 = arith.constant 0.000000e+00 : f32
    %86 = vector.broadcast %cst_47 : f32 to vector<1x128xf32>
    %87 = arith.maximumf %85, %86 : vector<1x128xf32>
    %c0_48 = arith.constant 0 : index
    %c0_49 = arith.constant 0 : index
    %88 = vector.load %arg6[%c0_48, %c0_49] : memref<128x128xf32, #tpu.memory_space<vmem>>, vector<128x128xf32>
    %cst_50 = arith.constant dense<0.000000e+00> : vector<1x128xf32>
    %89 = tpu.matmul %87, %88, %cst_50 {dimension_numbers = #tpu.dot_dimension_numbers<[1], [0], [0], [1], [0, 0, 1, 1], [], []>} : vector<1x128xf32>, vector<128x128xf32>, vector<1x128xf32> -> vector<1x128xf32>
    %c0_51 = arith.constant 0 : index
    %c0_52 = arith.constant 0 : index
    %90 = vector.load %arg7[%c0_51, %c0_52] : memref<1x128xf32, #tpu.memory_space<vmem>>, vector<1x128xf32>
    %91 = arith.addf %89, %90 : vector<1x128xf32>
    %92 = arith.negf %91 : vector<1x128xf32>
    %93 = math.exp %92 : vector<1x128xf32>
    %cst_53 = arith.constant 1.000000e+00 : f32
    %94 = vector.broadcast %cst_53 : f32 to vector<1x128xf32>
    %95 = arith.addf %94, %93 : vector<1x128xf32>
    %96 = arith.divf %94, %95 : vector<1x128xf32>
    %97 = vector.broadcast %96 : vector<1x128xf32> to vector<64x128xf32>
    %98 = arith.mulf %77, %97 : vector<64x128xf32>
    %99 = arith.truncf %98 : vector<64x128xf32> to vector<64x128xbf16>
    %c0_54 = arith.constant 0 : index
    %c0_55 = arith.constant 0 : index
    %100 = vector.load %arg8[%c0_54, %c0_55] : memref<128x128xbf16, #tpu.memory_space<vmem>>, vector<128x128xbf16>
    %cst_56 = arith.constant dense<0.000000e+00> : vector<64x128xf32>
    %101 = tpu.matmul %99, %100, %cst_56 {dimension_numbers = #tpu.dot_dimension_numbers<[1], [0], [0], [1], [0, 0, 1, 1], [], []>} : vector<64x128xbf16>, vector<128x128xbf16>, vector<64x128xf32> -> vector<64x128xf32>
    %c0_57 = arith.constant 0 : index
    %c0_58 = arith.constant 0 : index
    %102 = vector.load %arg9[%c0_57, %c0_58] : memref<1x128xf32, #tpu.memory_space<vmem>>, vector<1x128xf32>
    %103 = vector.broadcast %102 : vector<1x128xf32> to vector<64x128xf32>
    %104 = arith.addf %101, %103 : vector<64x128xf32>
    %c0_59 = arith.constant 0 : index
    %c0_60 = arith.constant 0 : index
    %c0_61 = arith.constant 0 : index
    %c0_62 = arith.constant 0 : index
    %105 = vector.load %arg10[%c0_59, %c0_60, %c0_61, %c0_62] : memref<1x8x8x128xf32, #tpu.memory_space<vmem>>, vector<1x8x8x128xf32>
    %106 = vector.shape_cast %105 : vector<1x8x8x128xf32> to vector<8x8x128xf32>
    %107 = vector.shape_cast %106 : vector<8x8x128xf32> to vector<64x128xf32>
    %108 = arith.truncf %107 : vector<64x128xf32> to vector<64x128xbf16>
    %c0_63 = arith.constant 0 : index
    %c0_64 = arith.constant 0 : index
    %109 = vector.load %arg11[%c0_63, %c0_64] : memref<128x128xbf16, #tpu.memory_space<vmem>>, vector<128x128xbf16>
    %cst_65 = arith.constant dense<0.000000e+00> : vector<64x128xf32>
    %110 = tpu.matmul %108, %109, %cst_65 {dimension_numbers = #tpu.dot_dimension_numbers<[1], [0], [0], [1], [0, 0, 1, 1], [], []>} : vector<64x128xbf16>, vector<128x128xbf16>, vector<64x128xf32> -> vector<64x128xf32>
    %c0_66 = arith.constant 0 : index
    %c0_67 = arith.constant 0 : index
    %111 = vector.load %arg12[%c0_66, %c0_67] : memref<1x128xf32, #tpu.memory_space<vmem>>, vector<1x128xf32>
    %112 = vector.broadcast %111 : vector<1x128xf32> to vector<64x128xf32>
    %113 = arith.addf %110, %112 : vector<64x128xf32>
    %114 = arith.addf %104, %113 : vector<64x128xf32>
    %cst_68 = arith.constant 0.000000e+00 : f32
    %115 = vector.broadcast %cst_68 : f32 to vector<64x128xf32>
    %116 = arith.maximumf %114, %115 : vector<64x128xf32>
    %117 = vector.shape_cast %116 : vector<64x128xf32> to vector<8x8x128xf32>
    %c0_69 = arith.constant 0 : index
    %c0_70 = arith.constant 0 : index
    %c0_71 = arith.constant 0 : index
    %c0_72 = arith.constant 0 : index
    %118 = vector.load %arg13[%c0_69, %c0_70, %c0_71, %c0_72] : memref<1x8x8x128xf32, #tpu.memory_space<vmem>>, vector<1x8x8x128xf32>
    %119 = vector.shape_cast %118 : vector<1x8x8x128xf32> to vector<8x8x128xf32>
    %120 = vector.shape_cast %117 : vector<8x8x128xf32> to vector<1x8x8x128xf32>
    tpu.vector_store %arg13[%c0_69, %c0_70, %c0_71, %c0_72], %120 {strides = array<i32>} : memref<1x8x8x128xf32, #tpu.memory_space<vmem>>, vector<1x8x8x128xf32>,
    return
  }
  func.func @transform_0(%arg0: i32) -> (i32, i32, i32, i32) {
    %c0_i32 = arith.constant 0 : i32
    %c0_i32_0 = arith.constant 0 : i32
    %c0_i32_1 = arith.constant 0 : i32
    %c0_i32_2 = arith.constant 0 : i32
    return %arg0, %c0_i32, %c0_i32_0, %c0_i32_1 : i32, i32, i32, i32
  }
  func.func @transform_1(%arg0: i32) -> (i32, i32) {
    %c0_i32 = arith.constant 0 : i32
    %c0_i32_0 = arith.constant 0 : i32
    %c0_i32_1 = arith.constant 0 : i32
    return %c0_i32, %c0_i32_0 : i32, i32
  }
  func.func @transform_2(%arg0: i32) -> (i32, i32) {
    %c0_i32 = arith.constant 0 : i32
    %c0_i32_0 = arith.constant 0 : i32
    %c0_i32_1 = arith.constant 0 : i32
    return %c0_i32, %c0_i32_0 : i32, i32
  }
  func.func @transform_3(%arg0: i32) -> (i32, i32) {
    %c0_i32 = arith.constant 0 : i32
    %c0_i32_0 = arith.constant 0 : i32
    %c0_i32_1 = arith.constant 0 : i32
    return %c0_i32, %c0_i32_0 : i32, i32
  }
  func.func @transform_4(%arg0: i32) -> (i32, i32) {
    %c0_i32 = arith.constant 0 : i32
    %c0_i32_0 = arith.constant 0 : i32
    %c0_i32_1 = arith.constant 0 : i32
    return %c0_i32, %c0_i32_0 : i32, i32
  }
  func.func @transform_5(%arg0: i32) -> (i32, i32) {
    %c0_i32 = arith.constant 0 : i32
    %c0_i32_0 = arith.constant 0 : i32
    %c0_i32_1 = arith.constant 0 : i32
    return %c0_i32, %c0_i32_0 : i32, i32
  }
  func.func @transform_6(%arg0: i32) -> (i32, i32) {
    %c0_i32 = arith.constant 0 : i32
    %c0_i32_0 = arith.constant 0 : i32
    %c0_i32_1 = arith.constant 0 : i32
    return %c0_i32, %c0_i32_0 : i32, i32
  }
  func.func @transform_7(%arg0: i32) -> (i32, i32) {
    %c0_i32 = arith.constant 0 : i32
    %c0_i32_0 = arith.constant 0 : i32
    %c0_i32_1 = arith.constant 0 : i32
    return %c0_i32, %c0_i32_0 : i32, i32
  }
  func.func @transform_8(%arg0: i32) -> (i32, i32) {
    %c0_i32 = arith.constant 0 : i32
    %c0_i32_0 = arith.constant 0 : i32
    %c0_i32_1 = arith.constant 0 : i32
    return %c0_i32, %c0_i32_0 : i32, i32
  }
  func.func @transform_9(%arg0: i32) -> (i32, i32, i32, i32) {
    %c0_i32 = arith.constant 0 : i32
    %c0_i32_0 = arith.constant 0 : i32
    %c0_i32_1 = arith.constant 0 : i32
    %c0_i32_2 = arith.constant 0 : i32
    return %arg0, %c0_i32, %c0_i32_0, %c0_i32_1 : i32, i32, i32, i32
  }
  func.func @transform_10(%arg0: i32) -> (i32, i32) {
    %c0_i32 = arith.constant 0 : i32
    %c0_i32_0 = arith.constant 0 : i32
    %c0_i32_1 = arith.constant 0 : i32
    return %c0_i32, %c0_i32_0 : i32, i32
  }
  func.func @transform_11(%arg0: i32) -> (i32, i32) {
    %c0_i32 = arith.constant 0 : i32
    %c0_i32_0 = arith.constant 0 : i32
    %c0_i32_1 = arith.constant 0 : i32
    return %c0_i32, %c0_i32_0 : i32, i32
  }
  func.func @transform_12(%arg0: i32) -> (i32, i32, i32, i32) {
    %c0_i32 = arith.constant 0 : i32
    %c0_i32_0 = arith.constant 0 : i32
    %c0_i32_1 = arith.constant 0 : i32
    %c0_i32_2 = arith.constant 0 : i32
    return %arg0, %c0_i32, %c0_i32_0, %c0_i32_1 : i32, i32, i32, i32
  }
}

module attributes {stable_mosaic.version = 11 : i64} {
  func.func @_pw_relu_kernel(%arg0: i32, %arg1: memref<256x128xf32, #tpu.memory_space<vmem>>, %arg2: memref<128x128xbf16, #tpu.memory_space<vmem>>, %arg3: memref<1x128xf32, #tpu.memory_space<vmem>>, %arg4: memref<256x128xbf16, #tpu.memory_space<vmem>>) attributes {dimension_semantics = [#tpu.dimension_semantics<parallel>], iteration_bounds = array<i64: 2>, scalar_prefetch = 0 : i64, scratch_operands = 0 : i64, tpu.core_type = #tpu.core_type<tc>, window_params = [{transform_indices = @transform_0, window_bounds = array<i64: 256, 128>}, {pipeline_mode = #tpu.pipeline_mode<synchronous>, transform_indices = @transform_1, window_bounds = array<i64: 128, 128>}, {pipeline_mode = #tpu.pipeline_mode<synchronous>, transform_indices = @transform_2, window_bounds = array<i64: 1, 128>}, {transform_indices = @transform_3, window_bounds = array<i64: 256, 128>}]} {
    %c0 = arith.constant 0 : index
    %c0_0 = arith.constant 0 : index
    %0 = vector.load %arg1[%c0, %c0_0] : memref<256x128xf32, #tpu.memory_space<vmem>>, vector<256x128xf32>
    %1 = arith.truncf %0 : vector<256x128xf32> to vector<256x128xbf16>
    %c0_1 = arith.constant 0 : index
    %c0_2 = arith.constant 0 : index
    %2 = vector.load %arg2[%c0_1, %c0_2] : memref<128x128xbf16, #tpu.memory_space<vmem>>, vector<128x128xbf16>
    %cst = arith.constant dense<0.000000e+00> : vector<256x128xf32>
    %3 = tpu.matmul %1, %2, %cst {dimension_numbers = #tpu.dot_dimension_numbers<[1], [0], [0], [1], [0, 0, 1, 1], [], []>} : vector<256x128xbf16>, vector<128x128xbf16>, vector<256x128xf32> -> vector<256x128xf32>
    %c0_3 = arith.constant 0 : index
    %c0_4 = arith.constant 0 : index
    %4 = vector.load %arg3[%c0_3, %c0_4] : memref<1x128xf32, #tpu.memory_space<vmem>>, vector<1x128xf32>
    %5 = vector.broadcast %4 : vector<1x128xf32> to vector<256x128xf32>
    %6 = arith.addf %3, %5 : vector<256x128xf32>
    %cst_5 = arith.constant 0.000000e+00 : f32
    %7 = vector.broadcast %cst_5 : f32 to vector<256x128xf32>
    %8 = arith.maximumf %6, %7 : vector<256x128xf32>
    %9 = arith.truncf %8 : vector<256x128xf32> to vector<256x128xbf16>
    %c0_6 = arith.constant 0 : index
    %c0_7 = arith.constant 0 : index
    %10 = vector.load %arg4[%c0_6, %c0_7] : memref<256x128xbf16, #tpu.memory_space<vmem>>, vector<256x128xbf16>
    tpu.vector_store %arg4[%c0_6, %c0_7], %9 {strides = array<i32>} : memref<256x128xbf16, #tpu.memory_space<vmem>>, vector<256x128xbf16>,
    return
  }
  func.func @transform_0(%arg0: i32) -> (i32, i32) {
    %c0_i32 = arith.constant 0 : i32
    %c0_i32_0 = arith.constant 0 : i32
    return %arg0, %c0_i32 : i32, i32
  }
  func.func @transform_1(%arg0: i32) -> (i32, i32) {
    %c0_i32 = arith.constant 0 : i32
    %c0_i32_0 = arith.constant 0 : i32
    %c0_i32_1 = arith.constant 0 : i32
    return %c0_i32, %c0_i32_0 : i32, i32
  }
  func.func @transform_2(%arg0: i32) -> (i32, i32) {
    %c0_i32 = arith.constant 0 : i32
    %c0_i32_0 = arith.constant 0 : i32
    %c0_i32_1 = arith.constant 0 : i32
    return %c0_i32, %c0_i32_0 : i32, i32
  }
  func.func @transform_3(%arg0: i32) -> (i32, i32) {
    %c0_i32 = arith.constant 0 : i32
    %c0_i32_0 = arith.constant 0 : i32
    return %arg0, %c0_i32 : i32, i32
  }
}

module attributes {stable_mosaic.version = 11 : i64} {
  func.func @_pw_relu_kernel(%arg0: i32, %arg1: memref<64x128xf32, #tpu.memory_space<vmem>>, %arg2: memref<128x128xbf16, #tpu.memory_space<vmem>>, %arg3: memref<1x128xf32, #tpu.memory_space<vmem>>, %arg4: memref<64x128xbf16, #tpu.memory_space<vmem>>) attributes {dimension_semantics = [#tpu.dimension_semantics<parallel>], iteration_bounds = array<i64: 2>, scalar_prefetch = 0 : i64, scratch_operands = 0 : i64, tpu.core_type = #tpu.core_type<tc>, window_params = [{transform_indices = @transform_0, window_bounds = array<i64: 64, 128>}, {pipeline_mode = #tpu.pipeline_mode<synchronous>, transform_indices = @transform_1, window_bounds = array<i64: 128, 128>}, {pipeline_mode = #tpu.pipeline_mode<synchronous>, transform_indices = @transform_2, window_bounds = array<i64: 1, 128>}, {transform_indices = @transform_3, window_bounds = array<i64: 64, 128>}]} {
    %c0 = arith.constant 0 : index
    %c0_0 = arith.constant 0 : index
    %0 = vector.load %arg1[%c0, %c0_0] : memref<64x128xf32, #tpu.memory_space<vmem>>, vector<64x128xf32>
    %1 = arith.truncf %0 : vector<64x128xf32> to vector<64x128xbf16>
    %c0_1 = arith.constant 0 : index
    %c0_2 = arith.constant 0 : index
    %2 = vector.load %arg2[%c0_1, %c0_2] : memref<128x128xbf16, #tpu.memory_space<vmem>>, vector<128x128xbf16>
    %cst = arith.constant dense<0.000000e+00> : vector<64x128xf32>
    %3 = tpu.matmul %1, %2, %cst {dimension_numbers = #tpu.dot_dimension_numbers<[1], [0], [0], [1], [0, 0, 1, 1], [], []>} : vector<64x128xbf16>, vector<128x128xbf16>, vector<64x128xf32> -> vector<64x128xf32>
    %c0_3 = arith.constant 0 : index
    %c0_4 = arith.constant 0 : index
    %4 = vector.load %arg3[%c0_3, %c0_4] : memref<1x128xf32, #tpu.memory_space<vmem>>, vector<1x128xf32>
    %5 = vector.broadcast %4 : vector<1x128xf32> to vector<64x128xf32>
    %6 = arith.addf %3, %5 : vector<64x128xf32>
    %cst_5 = arith.constant 0.000000e+00 : f32
    %7 = vector.broadcast %cst_5 : f32 to vector<64x128xf32>
    %8 = arith.maximumf %6, %7 : vector<64x128xf32>
    %9 = arith.truncf %8 : vector<64x128xf32> to vector<64x128xbf16>
    %c0_6 = arith.constant 0 : index
    %c0_7 = arith.constant 0 : index
    %10 = vector.load %arg4[%c0_6, %c0_7] : memref<64x128xbf16, #tpu.memory_space<vmem>>, vector<64x128xbf16>
    tpu.vector_store %arg4[%c0_6, %c0_7], %9 {strides = array<i32>} : memref<64x128xbf16, #tpu.memory_space<vmem>>, vector<64x128xbf16>,
    return
  }
  func.func @transform_0(%arg0: i32) -> (i32, i32) {
    %c0_i32 = arith.constant 0 : i32
    %c0_i32_0 = arith.constant 0 : i32
    return %arg0, %c0_i32 : i32, i32
  }
  func.func @transform_1(%arg0: i32) -> (i32, i32) {
    %c0_i32 = arith.constant 0 : i32
    %c0_i32_0 = arith.constant 0 : i32
    %c0_i32_1 = arith.constant 0 : i32
    return %c0_i32, %c0_i32_0 : i32, i32
  }
  func.func @transform_2(%arg0: i32) -> (i32, i32) {
    %c0_i32 = arith.constant 0 : i32
    %c0_i32_0 = arith.constant 0 : i32
    %c0_i32_1 = arith.constant 0 : i32
    return %c0_i32, %c0_i32_0 : i32, i32
  }
  func.func @transform_3(%arg0: i32) -> (i32, i32) {
    %c0_i32 = arith.constant 0 : i32
    %c0_i32_0 = arith.constant 0 : i32
    return %arg0, %c0_i32 : i32, i32
  }
}

module attributes {stable_mosaic.version = 11 : i64} {
  func.func @kernel(%arg0: i32, %arg1: memref<1x8x8x128xbf16, #tpu.memory_space<vmem>>, %arg2: memref<9x128xf32, #tpu.memory_space<vmem>>, %arg3: memref<1x128xf32, #tpu.memory_space<vmem>>, %arg4: memref<128x128xf32, #tpu.memory_space<vmem>>, %arg5: memref<1x128xf32, #tpu.memory_space<vmem>>, %arg6: memref<128x128xf32, #tpu.memory_space<vmem>>, %arg7: memref<1x128xf32, #tpu.memory_space<vmem>>, %arg8: memref<128x128xbf16, #tpu.memory_space<vmem>>, %arg9: memref<1x128xf32, #tpu.memory_space<vmem>>, %arg10: memref<1x8x8x128xf32, #tpu.memory_space<vmem>>, %arg11: memref<1x8x8x128xf32, #tpu.memory_space<vmem>>, %arg12: memref<10x10x128xf32, #tpu.memory_space<vmem>>) attributes {dimension_semantics = [#tpu.dimension_semantics<parallel>], iteration_bounds = array<i64: 2>, scalar_prefetch = 0 : i64, scratch_operands = 1 : i64, tpu.core_type = #tpu.core_type<tc>, window_params = [{transform_indices = @transform_0, window_bounds = array<i64: 1, 8, 8, 128>}, {pipeline_mode = #tpu.pipeline_mode<synchronous>, transform_indices = @transform_1, window_bounds = array<i64: 9, 128>}, {pipeline_mode = #tpu.pipeline_mode<synchronous>, transform_indices = @transform_2, window_bounds = array<i64: 1, 128>}, {pipeline_mode = #tpu.pipeline_mode<synchronous>, transform_indices = @transform_3, window_bounds = array<i64: 128, 128>}, {pipeline_mode = #tpu.pipeline_mode<synchronous>, transform_indices = @transform_4, window_bounds = array<i64: 1, 128>}, {pipeline_mode = #tpu.pipeline_mode<synchronous>, transform_indices = @transform_5, window_bounds = array<i64: 128, 128>}, {pipeline_mode = #tpu.pipeline_mode<synchronous>, transform_indices = @transform_6, window_bounds = array<i64: 1, 128>}, {pipeline_mode = #tpu.pipeline_mode<synchronous>, transform_indices = @transform_7, window_bounds = array<i64: 128, 128>}, {pipeline_mode = #tpu.pipeline_mode<synchronous>, transform_indices = @transform_8, window_bounds = array<i64: 1, 128>}, {transform_indices = @transform_9, window_bounds = array<i64: 1, 8, 8, 128>}, {transform_indices = @transform_10, window_bounds = array<i64: 1, 8, 8, 128>}]} {
    %cst = arith.constant 0.000000e+00 : f32
    %0 = vector.broadcast %cst : f32 to vector<10x10x128xf32>
    %c0 = arith.constant 0 : index
    %c0_0 = arith.constant 0 : index
    %c0_1 = arith.constant 0 : index
    %1 = vector.load %arg12[%c0, %c0_0, %c0_1] : memref<10x10x128xf32, #tpu.memory_space<vmem>>, vector<10x10x128xf32>
    tpu.vector_store %arg12[%c0, %c0_0, %c0_1], %0 {strides = array<i32>} : memref<10x10x128xf32, #tpu.memory_space<vmem>>, vector<10x10x128xf32>,
    %c0_2 = arith.constant 0 : index
    %c0_3 = arith.constant 0 : index
    %c0_4 = arith.constant 0 : index
    %c0_5 = arith.constant 0 : index
    %2 = vector.load %arg1[%c0_2, %c0_3, %c0_4, %c0_5] : memref<1x8x8x128xbf16, #tpu.memory_space<vmem>>, vector<1x8x8x128xbf16>
    %3 = vector.shape_cast %2 : vector<1x8x8x128xbf16> to vector<8x8x128xbf16>
    %4 = arith.extf %3 : vector<8x8x128xbf16> to vector<8x8x128xf32>
    %c1 = arith.constant 1 : index
    %c1_6 = arith.constant 1 : index
    %c0_7 = arith.constant 0 : index
    %5 = vector.load %arg12[%c1, %c1_6, %c0_7] : memref<10x10x128xf32, #tpu.memory_space<vmem>>, vector<8x8x128xf32>
    tpu.vector_store %arg12[%c1, %c1_6, %c0_7], %4 {strides = array<i32>} : memref<10x10x128xf32, #tpu.memory_space<vmem>>, vector<8x8x128xf32>,
    %c0_8 = arith.constant 0 : index
    %c0_9 = arith.constant 0 : index
    %6 = vector.load %arg2[%c0_8, %c0_9] : memref<9x128xf32, #tpu.memory_space<vmem>>, vector<9x128xf32>
    %cst_10 = arith.constant 0.000000e+00 : f32
    %7 = vector.broadcast %cst_10 : f32 to vector<8x8x128xf32>
    %c0_11 = arith.constant 0 : index
    %c0_12 = arith.constant 0 : index
    %c0_13 = arith.constant 0 : index
    %8 = vector.load %arg12[%c0_11, %c0_12, %c0_13] : memref<10x10x128xf32, #tpu.memory_space<vmem>>, vector<8x8x128xf32>
    %9 = vector.extract_strided_slice %6 {offsets = [0, 0], sizes = [1, 128], strides = [1, 1]} : vector<9x128xf32> to vector<1x128xf32>
    %10 = vector.shape_cast %9 : vector<1x128xf32> to vector<128xf32>
    %11 = vector.shape_cast %10 : vector<128xf32> to vector<1x1x128xf32>
    %12 = vector.broadcast %11 : vector<1x1x128xf32> to vector<8x8x128xf32>
    %13 = arith.mulf %8, %12 : vector<8x8x128xf32>
    %14 = arith.addf %7, %13 : vector<8x8x128xf32>
    %c0_14 = arith.constant 0 : index
    %c1_15 = arith.constant 1 : index
    %c0_16 = arith.constant 0 : index
    %15 = vector.load %arg12[%c0_14, %c1_15, %c0_16] : memref<10x10x128xf32, #tpu.memory_space<vmem>>, vector<8x8x128xf32>
    %16 = vector.extract_strided_slice %6 {offsets = [1, 0], sizes = [1, 128], strides = [1, 1]} : vector<9x128xf32> to vector<1x128xf32>
    %17 = vector.shape_cast %16 : vector<1x128xf32> to vector<128xf32>
    %18 = vector.shape_cast %17 : vector<128xf32> to vector<1x1x128xf32>
    %19 = vector.broadcast %18 : vector<1x1x128xf32> to vector<8x8x128xf32>
    %20 = arith.mulf %15, %19 : vector<8x8x128xf32>
    %21 = arith.addf %14, %20 : vector<8x8x128xf32>
    %c0_17 = arith.constant 0 : index
    %c2 = arith.constant 2 : index
    %c0_18 = arith.constant 0 : index
    %22 = vector.load %arg12[%c0_17, %c2, %c0_18] : memref<10x10x128xf32, #tpu.memory_space<vmem>>, vector<8x8x128xf32>
    %23 = vector.extract_strided_slice %6 {offsets = [2, 0], sizes = [1, 128], strides = [1, 1]} : vector<9x128xf32> to vector<1x128xf32>
    %24 = vector.shape_cast %23 : vector<1x128xf32> to vector<128xf32>
    %25 = vector.shape_cast %24 : vector<128xf32> to vector<1x1x128xf32>
    %26 = vector.broadcast %25 : vector<1x1x128xf32> to vector<8x8x128xf32>
    %27 = arith.mulf %22, %26 : vector<8x8x128xf32>
    %28 = arith.addf %21, %27 : vector<8x8x128xf32>
    %c1_19 = arith.constant 1 : index
    %c0_20 = arith.constant 0 : index
    %c0_21 = arith.constant 0 : index
    %29 = vector.load %arg12[%c1_19, %c0_20, %c0_21] : memref<10x10x128xf32, #tpu.memory_space<vmem>>, vector<8x8x128xf32>
    %30 = vector.extract_strided_slice %6 {offsets = [3, 0], sizes = [1, 128], strides = [1, 1]} : vector<9x128xf32> to vector<1x128xf32>
    %31 = vector.shape_cast %30 : vector<1x128xf32> to vector<128xf32>
    %32 = vector.shape_cast %31 : vector<128xf32> to vector<1x1x128xf32>
    %33 = vector.broadcast %32 : vector<1x1x128xf32> to vector<8x8x128xf32>
    %34 = arith.mulf %29, %33 : vector<8x8x128xf32>
    %35 = arith.addf %28, %34 : vector<8x8x128xf32>
    %c1_22 = arith.constant 1 : index
    %c1_23 = arith.constant 1 : index
    %c0_24 = arith.constant 0 : index
    %36 = vector.load %arg12[%c1_22, %c1_23, %c0_24] : memref<10x10x128xf32, #tpu.memory_space<vmem>>, vector<8x8x128xf32>
    %37 = vector.extract_strided_slice %6 {offsets = [4, 0], sizes = [1, 128], strides = [1, 1]} : vector<9x128xf32> to vector<1x128xf32>
    %38 = vector.shape_cast %37 : vector<1x128xf32> to vector<128xf32>
    %39 = vector.shape_cast %38 : vector<128xf32> to vector<1x1x128xf32>
    %40 = vector.broadcast %39 : vector<1x1x128xf32> to vector<8x8x128xf32>
    %41 = arith.mulf %36, %40 : vector<8x8x128xf32>
    %42 = arith.addf %35, %41 : vector<8x8x128xf32>
    %c1_25 = arith.constant 1 : index
    %c2_26 = arith.constant 2 : index
    %c0_27 = arith.constant 0 : index
    %43 = vector.load %arg12[%c1_25, %c2_26, %c0_27] : memref<10x10x128xf32, #tpu.memory_space<vmem>>, vector<8x8x128xf32>
    %44 = vector.extract_strided_slice %6 {offsets = [5, 0], sizes = [1, 128], strides = [1, 1]} : vector<9x128xf32> to vector<1x128xf32>
    %45 = vector.shape_cast %44 : vector<1x128xf32> to vector<128xf32>
    %46 = vector.shape_cast %45 : vector<128xf32> to vector<1x1x128xf32>
    %47 = vector.broadcast %46 : vector<1x1x128xf32> to vector<8x8x128xf32>
    %48 = arith.mulf %43, %47 : vector<8x8x128xf32>
    %49 = arith.addf %42, %48 : vector<8x8x128xf32>
    %c2_28 = arith.constant 2 : index
    %c0_29 = arith.constant 0 : index
    %c0_30 = arith.constant 0 : index
    %50 = vector.load %arg12[%c2_28, %c0_29, %c0_30] : memref<10x10x128xf32, #tpu.memory_space<vmem>>, vector<8x8x128xf32>
    %51 = vector.extract_strided_slice %6 {offsets = [6, 0], sizes = [1, 128], strides = [1, 1]} : vector<9x128xf32> to vector<1x128xf32>
    %52 = vector.shape_cast %51 : vector<1x128xf32> to vector<128xf32>
    %53 = vector.shape_cast %52 : vector<128xf32> to vector<1x1x128xf32>
    %54 = vector.broadcast %53 : vector<1x1x128xf32> to vector<8x8x128xf32>
    %55 = arith.mulf %50, %54 : vector<8x8x128xf32>
    %56 = arith.addf %49, %55 : vector<8x8x128xf32>
    %c2_31 = arith.constant 2 : index
    %c1_32 = arith.constant 1 : index
    %c0_33 = arith.constant 0 : index
    %57 = vector.load %arg12[%c2_31, %c1_32, %c0_33] : memref<10x10x128xf32, #tpu.memory_space<vmem>>, vector<8x8x128xf32>
    %58 = vector.extract_strided_slice %6 {offsets = [7, 0], sizes = [1, 128], strides = [1, 1]} : vector<9x128xf32> to vector<1x128xf32>
    %59 = vector.shape_cast %58 : vector<1x128xf32> to vector<128xf32>
    %60 = vector.shape_cast %59 : vector<128xf32> to vector<1x1x128xf32>
    %61 = vector.broadcast %60 : vector<1x1x128xf32> to vector<8x8x128xf32>
    %62 = arith.mulf %57, %61 : vector<8x8x128xf32>
    %63 = arith.addf %56, %62 : vector<8x8x128xf32>
    %c2_34 = arith.constant 2 : index
    %c2_35 = arith.constant 2 : index
    %c0_36 = arith.constant 0 : index
    %64 = vector.load %arg12[%c2_34, %c2_35, %c0_36] : memref<10x10x128xf32, #tpu.memory_space<vmem>>, vector<8x8x128xf32>
    %65 = vector.extract_strided_slice %6 {offsets = [8, 0], sizes = [1, 128], strides = [1, 1]} : vector<9x128xf32> to vector<1x128xf32>
    %66 = vector.shape_cast %65 : vector<1x128xf32> to vector<128xf32>
    %67 = vector.shape_cast %66 : vector<128xf32> to vector<1x1x128xf32>
    %68 = vector.broadcast %67 : vector<1x1x128xf32> to vector<8x8x128xf32>
    %69 = arith.mulf %64, %68 : vector<8x8x128xf32>
    %70 = arith.addf %63, %69 : vector<8x8x128xf32>
    %c0_37 = arith.constant 0 : index
    %c0_38 = arith.constant 0 : index
    %71 = vector.load %arg3[%c0_37, %c0_38] : memref<1x128xf32, #tpu.memory_space<vmem>>, vector<1x128xf32>
    %72 = vector.shape_cast %71 : vector<1x128xf32> to vector<1x1x128xf32>
    %73 = vector.broadcast %72 : vector<1x1x128xf32> to vector<8x8x128xf32>
    %74 = arith.addf %70, %73 : vector<8x8x128xf32>
    %cst_39 = arith.constant 0.000000e+00 : f32
    %75 = vector.broadcast %cst_39 : f32 to vector<8x8x128xf32>
    %76 = arith.maximumf %74, %75 : vector<8x8x128xf32>
    %77 = vector.shape_cast %76 : vector<8x8x128xf32> to vector<64x128xf32>
    %cst_40 = arith.constant dense<0.000000e+00> : vector<128xf32>
    %78 = vector.multi_reduction <add>, %77, %cst_40 [0] : vector<64x128xf32> to vector<128xf32>
    %79 = vector.shape_cast %78 : vector<128xf32> to vector<1x128xf32>
    %cst_41 = arith.constant 6.400000e+01 : f32
    %80 = vector.broadcast %cst_41 : f32 to vector<1x128xf32>
    %81 = arith.divf %79, %80 : vector<1x128xf32>
    %c0_42 = arith.constant 0 : index
    %c0_43 = arith.constant 0 : index
    %82 = vector.load %arg4[%c0_42, %c0_43] : memref<128x128xf32, #tpu.memory_space<vmem>>, vector<128x128xf32>
    %cst_44 = arith.constant dense<0.000000e+00> : vector<1x128xf32>
    %83 = tpu.matmul %81, %82, %cst_44 {dimension_numbers = #tpu.dot_dimension_numbers<[1], [0], [0], [1], [0, 0, 1, 1], [], []>} : vector<1x128xf32>, vector<128x128xf32>, vector<1x128xf32> -> vector<1x128xf32>
    %c0_45 = arith.constant 0 : index
    %c0_46 = arith.constant 0 : index
    %84 = vector.load %arg5[%c0_45, %c0_46] : memref<1x128xf32, #tpu.memory_space<vmem>>, vector<1x128xf32>
    %85 = arith.addf %83, %84 : vector<1x128xf32>
    %cst_47 = arith.constant 0.000000e+00 : f32
    %86 = vector.broadcast %cst_47 : f32 to vector<1x128xf32>
    %87 = arith.maximumf %85, %86 : vector<1x128xf32>
    %c0_48 = arith.constant 0 : index
    %c0_49 = arith.constant 0 : index
    %88 = vector.load %arg6[%c0_48, %c0_49] : memref<128x128xf32, #tpu.memory_space<vmem>>, vector<128x128xf32>
    %cst_50 = arith.constant dense<0.000000e+00> : vector<1x128xf32>
    %89 = tpu.matmul %87, %88, %cst_50 {dimension_numbers = #tpu.dot_dimension_numbers<[1], [0], [0], [1], [0, 0, 1, 1], [], []>} : vector<1x128xf32>, vector<128x128xf32>, vector<1x128xf32> -> vector<1x128xf32>
    %c0_51 = arith.constant 0 : index
    %c0_52 = arith.constant 0 : index
    %90 = vector.load %arg7[%c0_51, %c0_52] : memref<1x128xf32, #tpu.memory_space<vmem>>, vector<1x128xf32>
    %91 = arith.addf %89, %90 : vector<1x128xf32>
    %92 = arith.negf %91 : vector<1x128xf32>
    %93 = math.exp %92 : vector<1x128xf32>
    %cst_53 = arith.constant 1.000000e+00 : f32
    %94 = vector.broadcast %cst_53 : f32 to vector<1x128xf32>
    %95 = arith.addf %94, %93 : vector<1x128xf32>
    %96 = arith.divf %94, %95 : vector<1x128xf32>
    %97 = vector.broadcast %96 : vector<1x128xf32> to vector<64x128xf32>
    %98 = arith.mulf %77, %97 : vector<64x128xf32>
    %99 = arith.truncf %98 : vector<64x128xf32> to vector<64x128xbf16>
    %c0_54 = arith.constant 0 : index
    %c0_55 = arith.constant 0 : index
    %100 = vector.load %arg8[%c0_54, %c0_55] : memref<128x128xbf16, #tpu.memory_space<vmem>>, vector<128x128xbf16>
    %cst_56 = arith.constant dense<0.000000e+00> : vector<64x128xf32>
    %101 = tpu.matmul %99, %100, %cst_56 {dimension_numbers = #tpu.dot_dimension_numbers<[1], [0], [0], [1], [0, 0, 1, 1], [], []>} : vector<64x128xbf16>, vector<128x128xbf16>, vector<64x128xf32> -> vector<64x128xf32>
    %c0_57 = arith.constant 0 : index
    %c0_58 = arith.constant 0 : index
    %102 = vector.load %arg9[%c0_57, %c0_58] : memref<1x128xf32, #tpu.memory_space<vmem>>, vector<1x128xf32>
    %103 = vector.broadcast %102 : vector<1x128xf32> to vector<64x128xf32>
    %104 = arith.addf %101, %103 : vector<64x128xf32>
    %c0_59 = arith.constant 0 : index
    %c0_60 = arith.constant 0 : index
    %c0_61 = arith.constant 0 : index
    %c0_62 = arith.constant 0 : index
    %105 = vector.load %arg10[%c0_59, %c0_60, %c0_61, %c0_62] : memref<1x8x8x128xf32, #tpu.memory_space<vmem>>, vector<1x8x8x128xf32>
    %106 = vector.shape_cast %105 : vector<1x8x8x128xf32> to vector<8x8x128xf32>
    %107 = vector.shape_cast %106 : vector<8x8x128xf32> to vector<64x128xf32>
    %108 = arith.addf %104, %107 : vector<64x128xf32>
    %cst_63 = arith.constant 0.000000e+00 : f32
    %109 = vector.broadcast %cst_63 : f32 to vector<64x128xf32>
    %110 = arith.maximumf %108, %109 : vector<64x128xf32>
    %111 = vector.shape_cast %110 : vector<64x128xf32> to vector<8x8x128xf32>
    %c0_64 = arith.constant 0 : index
    %c0_65 = arith.constant 0 : index
    %c0_66 = arith.constant 0 : index
    %c0_67 = arith.constant 0 : index
    %112 = vector.load %arg11[%c0_64, %c0_65, %c0_66, %c0_67] : memref<1x8x8x128xf32, #tpu.memory_space<vmem>>, vector<1x8x8x128xf32>
    %113 = vector.shape_cast %112 : vector<1x8x8x128xf32> to vector<8x8x128xf32>
    %114 = vector.shape_cast %111 : vector<8x8x128xf32> to vector<1x8x8x128xf32>
    tpu.vector_store %arg11[%c0_64, %c0_65, %c0_66, %c0_67], %114 {strides = array<i32>} : memref<1x8x8x128xf32, #tpu.memory_space<vmem>>, vector<1x8x8x128xf32>,
    return
  }
  func.func @transform_0(%arg0: i32) -> (i32, i32, i32, i32) {
    %c0_i32 = arith.constant 0 : i32
    %c0_i32_0 = arith.constant 0 : i32
    %c0_i32_1 = arith.constant 0 : i32
    %c0_i32_2 = arith.constant 0 : i32
    return %arg0, %c0_i32, %c0_i32_0, %c0_i32_1 : i32, i32, i32, i32
  }
  func.func @transform_1(%arg0: i32) -> (i32, i32) {
    %c0_i32 = arith.constant 0 : i32
    %c0_i32_0 = arith.constant 0 : i32
    %c0_i32_1 = arith.constant 0 : i32
    return %c0_i32, %c0_i32_0 : i32, i32
  }
  func.func @transform_2(%arg0: i32) -> (i32, i32) {
    %c0_i32 = arith.constant 0 : i32
    %c0_i32_0 = arith.constant 0 : i32
    %c0_i32_1 = arith.constant 0 : i32
    return %c0_i32, %c0_i32_0 : i32, i32
  }
  func.func @transform_3(%arg0: i32) -> (i32, i32) {
    %c0_i32 = arith.constant 0 : i32
    %c0_i32_0 = arith.constant 0 : i32
    %c0_i32_1 = arith.constant 0 : i32
    return %c0_i32, %c0_i32_0 : i32, i32
  }
  func.func @transform_4(%arg0: i32) -> (i32, i32) {
    %c0_i32 = arith.constant 0 : i32
    %c0_i32_0 = arith.constant 0 : i32
    %c0_i32_1 = arith.constant 0 : i32
    return %c0_i32, %c0_i32_0 : i32, i32
  }
  func.func @transform_5(%arg0: i32) -> (i32, i32) {
    %c0_i32 = arith.constant 0 : i32
    %c0_i32_0 = arith.constant 0 : i32
    %c0_i32_1 = arith.constant 0 : i32
    return %c0_i32, %c0_i32_0 : i32, i32
  }
  func.func @transform_6(%arg0: i32) -> (i32, i32) {
    %c0_i32 = arith.constant 0 : i32
    %c0_i32_0 = arith.constant 0 : i32
    %c0_i32_1 = arith.constant 0 : i32
    return %c0_i32, %c0_i32_0 : i32, i32
  }
  func.func @transform_7(%arg0: i32) -> (i32, i32) {
    %c0_i32 = arith.constant 0 : i32
    %c0_i32_0 = arith.constant 0 : i32
    %c0_i32_1 = arith.constant 0 : i32
    return %c0_i32, %c0_i32_0 : i32, i32
  }
  func.func @transform_8(%arg0: i32) -> (i32, i32) {
    %c0_i32 = arith.constant 0 : i32
    %c0_i32_0 = arith.constant 0 : i32
    %c0_i32_1 = arith.constant 0 : i32
    return %c0_i32, %c0_i32_0 : i32, i32
  }
  func.func @transform_9(%arg0: i32) -> (i32, i32, i32, i32) {
    %c0_i32 = arith.constant 0 : i32
    %c0_i32_0 = arith.constant 0 : i32
    %c0_i32_1 = arith.constant 0 : i32
    %c0_i32_2 = arith.constant 0 : i32
    return %arg0, %c0_i32, %c0_i32_0, %c0_i32_1 : i32, i32, i32, i32
  }
  func.func @transform_10(%arg0: i32) -> (i32, i32, i32, i32) {
    %c0_i32 = arith.constant 0 : i32
    %c0_i32_0 = arith.constant 0 : i32
    %c0_i32_1 = arith.constant 0 : i32
    %c0_i32_2 = arith.constant 0 : i32
    return %arg0, %c0_i32, %c0_i32_0, %c0_i32_1 : i32, i32, i32, i32
  }
}

</mosaic_0001>

<bundles_post_ra>
// kernel: _lambda_.4
= control target key start
LH: loop header
LB: loop body
LE: loop exit
PB: predicated region body
PF: predicated region fallthrough
CT: control target
= control target key end

     0   :  { %s1014_s12 = smov 0   ;;  %s1148_s0 = inlined_call_operand.vmem [shape: f32[512,128], index: 0, kind: input, shape index: {}]   ;;  %s1149_s1 = inlined_call_operand.vmem [shape: bf16[128,128], index: 1, kind: input, shape index: {}]   ;;  %s1150_s2 = inlined_call_operand.vmem [shape: f32[1,128], index: 2, kind: input, shape index: {}]   ;;  %s1151_s3 = inlined_call_operand.vmem [shape: bf16[512,128], index: 3, kind: output, shape index: {}]  }
   0x1 LB: > { %s703_s13 = sadd.s32 4294967295, %s992_s12   ;;  %p707_p0 = scmp.ge.s32.totalorder %s992_s12, 1  ;;  %s992_s12 = sphi %s1014_s12, %s13_s12  }
   0x2   : > { %p138_p1 = scmp.lt.s32.totalorder %s992_s12, 3 }
   0x4   : > { %p139_p2 = pnand %p707_p0, %p138_p1 }
   0x5   : > { %s708_s16 = sshll.u32 (!%p139_p2), %s703_s13, 5 }
   0x6   : > { %142 = sbr.rel (%p139_p2) target bundleno = 274 (0x112), region = 32  ;;  %p163_p3 = scmp.lt.s32.totalorder (!%p139_p2), %s708_s16, 63 }
   0xb   : > { %v978_v0 = vld [vmem:[%s1149_s1 + $0x38] sm:$0xff]   ;;  %v979_v1 = vld [vmem:[%s1149_s1 + $0x30] sm:$0xff]   ;;  %s1153_s16 = smov (!%p163_p3, %s708_s16), 63  ;;  %v980_v2 = vld [vmem:[%s1149_s1 + $0x28] sm:$0xff]  }
   0xc   : > { %906 = vmatprep.subr.bf16.mxu0 %v978_v0  ;;  %954 = vmatprep.subr.bf16.mxu1 %v978_v0  ;;  %s709_s21 = sshll.u32 %s1153_s16, 3  ;;  %v981_v3 = vld [vmem:[%s1149_s1 + $0x20] sm:$0xff]   ;;  %v982_v10 = vld [vmem:[%s1149_s1 + $0x18] sm:$0xff]   ;;  %v983_v11 = vld [vmem:[%s1149_s1 + $0x10] sm:$0xff]   ;;  %s711_s10 = sshll.u32 %s1153_s16, 2 }
   0xd   : > { %907 = vmatpush3.bf16.msra.mxu0 %v978_v0  ;;  %962 = vmatpush3.bf16.msra.mxu1 %v978_v0  ;;  %s1037_s24 = scalar_lea.vmem %s1148_s0, %s709_s21  ;;  %v984_v12 = vld [vmem:[%s1149_s1 + $0x8] sm:$0xff]   ;;  %v985_v13 = vld [vmem:[%s1149_s1] sm:$0xff]   ;;  %s1103_s14 = scalar_lea.vmem %s1151_s3, %s711_s10 }
   0xe   : > { %908 = vmatprep.subr.bf16.mxu0 %v979_v1  ;;  %955 = vmatprep.subr.bf16.mxu1 %v979_v1  ;;  %v175_v4 = vld [vmem:[%s1037_s24] sm:$0xff]  ;;  %v176_v5 = vld [vmem:[%s1037_s24 + $0x8] sm:$0xff]  ;;  %v177_v14 = vld [vmem:[%s1037_s24 + $0x10] sm:$0xff] }
   0xf   : > { %v191_v6 = vld [vmem:[%s1037_s24 + $0x80] sm:$0xff]  ;;  %v207_v7 = vpack.c.bf16 %v176_v5, %v175_v4  ;;  %v192_v8 = vld [vmem:[%s1037_s24 + $0x88] sm:$0xff]  ;;  %v178_v15 = vld [vmem:[%s1037_s24 + $0x18] sm:$0xff] }
  0x10   : > { %v215_v9 = vpack.c.bf16 %v192_v8, %v191_v6  ;;  %v193_v16 = vld [vmem:[%s1037_s24 + $0x90] sm:$0xff]  ;;  %v194_v17 = vld [vmem:[%s1037_s24 + $0x98] sm:$0xff]  ;;  %v179_v18 = vld [vmem:[%s1037_s24 + $0x20] sm:$0xff]  ;;  %v208_v22 = vpack.c.bf16 %v178_v15, %v177_v14 }
  0x11   : > { %909 = vmatpush3.bf16.msra.mxu0 %v979_v1  ;;  %963 = vmatpush3.bf16.msra.mxu1 %v979_v1  ;;  %v180_v19 = vld [vmem:[%s1037_s24 + $0x28] sm:$0xff]  ;;  %v195_v20 = vld [vmem:[%s1037_s24 + $0xa0] sm:$0xff]  ;;  %v216_v23 = vpack.c.bf16 %v194_v17, %v193_v16  ;;  %v181_v26 = vld [vmem:[%s1037_s24 + $0x30] sm:$0xff] }
  0x12   : > { %910 = vmatprep.subr.bf16.mxu0 %v980_v2  ;;  %956 = vmatprep.subr.bf16.mxu1 %v980_v2  ;;  %v196_v21 = vld [vmem:[%s1037_s24 + $0xa8] sm:$0xff]  ;;  %v209_v24 = vpack.c.bf16 %v180_v19, %v179_v18  ;;  %v182_v27 = vld [vmem:[%s1037_s24 + $0x38] sm:$0xff]  ;;  %v197_v28 = vld [vmem:[%s1037_s24 + $0xb0] sm:$0xff] }
  0x13   : > { %922 = vmatprep.mubr.bf16.mxu0 %v207_v7  ;;  %938 = vmatprep.mubr.bf16.mxu1 %v215_v9  ;;  %v217_v25 = vpack.c.bf16 %v196_v21, %v195_v20  ;;  %v198_v29 = vld [vmem:[%s1037_s24 + $0xb8] sm:$0xff]  ;;  %v183_v30 = vld [vmem:[%s1037_s24 + $0x40] sm:$0xff]  ;;  %v184_v31 = vld [vmem:[%s1037_s24 + $0x48] sm:$0xff]  ;;  %v210_v34 = vpack.c.bf16 %v182_v27, %v181_v26 }
  0x14   : > { %v199_v32 = vld [vmem:[%s1037_s24 + $0xc0] sm:$0xff]  ;;  %v200_v33 = vld [vmem:[%s1037_s24 + $0xc8] sm:$0xff]  ;;  %v218_v35 = vpack.c.bf16 %v198_v29, %v197_v28  ;;  %v211_v36 = vpack.c.bf16 %v184_v31, %v183_v30  ;;  %v185_v38 = vld [vmem:[%s1037_s24 + $0x50] sm:$0xff] }
  0x15   : > { %911 = vmatpush3.bf16.msra.mxu0 %v980_v2  ;;  %964 = vmatpush3.bf16.msra.mxu1 %v980_v2  ;;  %v219_v37 = vpack.c.bf16 %v200_v33, %v199_v32  ;;  %v186_v39 = vld [vmem:[%s1037_s24 + $0x58] sm:$0xff]  ;;  %v201_v40 = vld [vmem:[%s1037_s24 + $0xd0] sm:$0xff]  ;;  %v187_v42 = vld [vmem:[%s1037_s24 + $0x60] sm:$0xff] }
  0x16   : > { %912 = vmatprep.subr.bf16.mxu0 %v981_v3  ;;  %957 = vmatprep.subr.bf16.mxu1 %v981_v3  ;;  %v202_v41 = vld [vmem:[%s1037_s24 + $0xd8] sm:$0xff]  ;;  %v188_v43 = vld [vmem:[%s1037_s24 + $0x68] sm:$0xff]  ;;  %v203_v44 = vld [vmem:[%s1037_s24 + $0xe0] sm:$0xff]  ;;  %v212_v46 = vpack.c.bf16 %v186_v39, %v185_v38 }
  0x17   : > { %v204_v45 = vld [vmem:[%s1037_s24 + $0xe8] sm:$0xff]  ;;  %v220_v47 = vpack.c.bf16 %v202_v41, %v201_v40  ;;  %v213_v48 = vpack.c.bf16 %v188_v43, %v187_v42  ;;  %v189_v50 = vld [vmem:[%s1037_s24 + $0x70] sm:$0xff]  ;;  %v190_v51 = vld [vmem:[%s1037_s24 + $0x78] sm:$0xff] }
  0x18   : > { %v221_v49 = vpack.c.bf16 %v204_v45, %v203_v44  ;;  %v205_v52 = vld [vmem:[%s1037_s24 + $0xf0] sm:$0xff]  ;;  %v206_v53 = vld [vmem:[%s1037_s24 + $0xf8] sm:$0xff]  ;;  %v214_v54 = vpack.c.bf16 %v190_v51, %v189_v50  ;;  %v1089_v56 = vld [vmem:[%s1150_s2] ss:$0 sm:$0xff] }
  0x19   : > { %913 = vmatpush3.bf16.msra.mxu0 %v981_v3  ;;  %965 = vmatpush3.bf16.msra.mxu1 %v981_v3  ;;  %v222_v55 = vpack.c.bf16 %v206_v53, %v205_v52 }
  0x1a   : > { %914 = vmatprep.subr.bf16.mxu0 %v982_v10  ;;  %958 = vmatprep.subr.bf16.mxu1 %v982_v10 }
  0x1d   : > { %915 = vmatpush3.bf16.msra.mxu0 %v982_v10  ;;  %966 = vmatpush3.bf16.msra.mxu1 %v982_v10 }
  0x1e   : > { %916 = vmatprep.subr.bf16.mxu0 %v983_v11  ;;  %959 = vmatprep.subr.bf16.mxu1 %v983_v11 }
  0x21   : > { %917 = vmatpush3.bf16.msra.mxu0 %v983_v11  ;;  %967 = vmatpush3.bf16.msra.mxu1 %v983_v11 }
  0x22   : > { %918 = vmatprep.subr.bf16.mxu0 %v984_v12  ;;  %960 = vmatprep.subr.bf16.mxu1 %v984_v12 }
  0x25   : > { %919 = vmatpush3.bf16.msra.mxu0 %v984_v12  ;;  %968 = vmatpush3.bf16.msra.mxu1 %v984_v12 }
  0x26   : > { %920 = vmatprep.subr.bf16.mxu0 %v985_v13  ;;  %961 = vmatprep.subr.bf16.mxu1 %v985_v13 }
  0x29   : > { %921 = vmatpush3.bf16.msra.mxu0 %v985_v13  ;;  %969 = vmatpush3.bf16.msra.mxu1 %v985_v13 }
  0x2c   : > { %923 = vmatmul.mubr.bf16.vlgmr.msra.gmra.mxu0 %v208_v22  ;;  %939 = vmatmul.mubr.bf16.vlgmr.msra.gmra.mxu1 %v216_v23 }
  0x2d   : > { %926 = vmatprep.mubr.bf16.mxu0 %v209_v24  ;;  %942 = vmatprep.mubr.bf16.mxu1 %v217_v25 }
  0x34   : > { %927 = vmatmul.mubr.bf16.gmra.mxu0 %v210_v34  ;;  %943 = vmatmul.mubr.bf16.gmra.mxu1 %v218_v35 }
  0x35   : > { %930 = vmatprep.mubr.bf16.mxu0 %v211_v36  ;;  %946 = vmatprep.mubr.bf16.mxu1 %v219_v37 }
  0x3c   : > { %931 = vmatmul.mubr.bf16.gmra.mxu0 %v212_v46  ;;  %947 = vmatmul.mubr.bf16.gmra.mxu1 %v220_v47 }
  0x3d   : > { %934 = vmatprep.mubr.bf16.mxu0 %v213_v48  ;;  %950 = vmatprep.mubr.bf16.mxu1 %v221_v49 }
  0x44   : > { %935 = vmatmul.mubr.bf16.gmra.mxu0 %v214_v54  ;;  %951 = vmatmul.mubr.bf16.gmra.mxu1 %v222_v55 }
  0xec   : > { %v924_v57 = vpop.f32.mrf.mxu0  ;;  %v940_v58 = vpop.f32.mrf.mxu1 }
  0xed   : > { %v337_v59 = vadd.f32 %v924_v57, %v1089_v56  ;;  %v401_v60 = vadd.f32 %v940_v58, %v1089_v56 }
  0xee   : > { %v328_v61 = vpop.f32.mrf.mxu0  ;;  %v392_v62 = vpop.f32.mrf.mxu1 }
  0xef   : > { %v329_v63 = vadd.f32 %v1089_v56, %v328_v61  ;;  %v393_v0 = vadd.f32 %v1089_v56, %v392_v62  ;;  %v457_v5 = vmax.f32 %v337_v59, 0.0  ;;  %v473_v6 = vmax.f32 %v401_v60, 0.0 }
  0xf0   : > { %v925_v1 = vpop.f32.mrf.mxu0  ;;  %v941_v2 = vpop.f32.mrf.mxu1 }
  0xf1   : > { %v340_v3 = vadd.f32 %v925_v1, %v1089_v56  ;;  %v404_v4 = vadd.f32 %v941_v2, %v1089_v56  ;;  %v455_v13 = vmax.f32 %v329_v63, 0.0  ;;  %v471_v14 = vmax.f32 %v393_v0, 0.0 }
  0xf2   : > { %v331_v7 = vpop.f32.mrf.mxu0  ;;  %v395_v8 = vpop.f32.mrf.mxu1 }
  0xf3   : > { %v458_v9 = vmax.f32 %v340_v3, 0.0  ;;  %v474_v10 = vmax.f32 %v404_v4, 0.0  ;;  %v332_v11 = vadd.f32 %v1089_v56, %v331_v7  ;;  %v396_v12 = vadd.f32 %v1089_v56, %v395_v8 }
  0xf4   : > { %v928_v15 = vpop.f32.mrf.mxu0  ;;  %v944_v16 = vpop.f32.mrf.mxu1 }
  0xf5   : > { %v795_v17 = vpack.c.bf16 %v458_v9, %v457_v5  ;;  %v835_v18 = vpack.c.bf16 %v474_v10, %v473_v6  ;;  %v456_v19 = vmax.f32 %v332_v11, 0.0  ;;  %v472_v20 = vmax.f32 %v396_v12, 0.0 }
  0xf6   : > { %v353_v21 = vadd.f32 %v928_v15, %v1089_v56  ;;  %v417_v22 = vadd.f32 %v944_v16, %v1089_v56  ;;  %v344_v23 = vpop.f32.mrf.mxu0  ;;  %v408_v24 = vpop.f32.mrf.mxu1 }
  0xf7   : > { %867 = vst [vmem:[%s1103_s14 + $0x8] sm:$0xff] %v795_v17   ;;  %875 = vst [vmem:[%s1103_s14 + $0x48] sm:$0xff] %v835_v18   ;;  %v790_v25 = vpack.c.bf16 %v456_v19, %v455_v13  ;;  %v830_v26 = vpack.c.bf16 %v472_v20, %v471_v14  ;;  %v345_v27 = vadd.f32 %v1089_v56, %v344_v23 }
  0xf8   : > { %v409_v28 = vadd.f32 %v1089_v56, %v408_v24  ;;  %v929_v29 = vpop.f32.mrf.mxu0  ;;  %v945_v30 = vpop.f32.mrf.mxu1  ;;  %v461_v33 = vmax.f32 %v353_v21, 0.0  ;;  %v477_v34 = vmax.f32 %v417_v22, 0.0 }
  0xf9   : > { %791 = vst [vmem:[%s1103_s14] sm:$0xff] %v790_v25   ;;  %874 = vst [vmem:[%s1103_s14 + $0x40] sm:$0xff] %v830_v26   ;;  %v356_v31 = vadd.f32 %v929_v29, %v1089_v56  ;;  %v420_v32 = vadd.f32 %v945_v30, %v1089_v56  ;;  %v459_v41 = vmax.f32 %v345_v27, 0.0 }
  0xfa   : > { %v347_v35 = vpop.f32.mrf.mxu0  ;;  %v411_v36 = vpop.f32.mrf.mxu1  ;;  %v475_v42 = vmax.f32 %v409_v28, 0.0 }
  0xfb   : > { %v462_v37 = vmax.f32 %v356_v31, 0.0  ;;  %v478_v38 = vmax.f32 %v420_v32, 0.0  ;;  %v348_v39 = vadd.f32 %v1089_v56, %v347_v35  ;;  %v412_v40 = vadd.f32 %v1089_v56, %v411_v36 }
  0xfc   : > { %v932_v43 = vpop.f32.mrf.mxu0  ;;  %v948_v44 = vpop.f32.mrf.mxu1 }
  0xfd   : > { %v805_v45 = vpack.c.bf16 %v462_v37, %v461_v33  ;;  %v845_v46 = vpack.c.bf16 %v478_v38, %v477_v34  ;;  %v460_v47 = vmax.f32 %v348_v39, 0.0  ;;  %v476_v48 = vmax.f32 %v412_v40, 0.0 }
  0xfe   : > { %v369_v49 = vadd.f32 %v932_v43, %v1089_v56  ;;  %v433_v50 = vadd.f32 %v948_v44, %v1089_v56  ;;  %v360_v51 = vpop.f32.mrf.mxu0  ;;  %v424_v52 = vpop.f32.mrf.mxu1 }
  0xff   : > { %869 = vst [vmem:[%s1103_s14 + $0x18] sm:$0xff] %v805_v45   ;;  %877 = vst [vmem:[%s1103_s14 + $0x58] sm:$0xff] %v845_v46   ;;  %v800_v53 = vpack.c.bf16 %v460_v47, %v459_v41  ;;  %v840_v54 = vpack.c.bf16 %v476_v48, %v475_v42  ;;  %v361_v55 = vadd.f32 %v1089_v56, %v360_v51 }
 0x100   : > { %v425_v57 = vadd.f32 %v1089_v56, %v424_v52  ;;  %v933_v58 = vpop.f32.mrf.mxu0  ;;  %v949_v59 = vpop.f32.mrf.mxu1  ;;  %v465_v62 = vmax.f32 %v369_v49, 0.0  ;;  %v481_v63 = vmax.f32 %v433_v50, 0.0 }
 0x101   : > { %868 = vst [vmem:[%s1103_s14 + $0x10] sm:$0xff] %v800_v53   ;;  %876 = vst [vmem:[%s1103_s14 + $0x50] sm:$0xff] %v840_v54   ;;  %v372_v60 = vadd.f32 %v933_v58, %v1089_v56  ;;  %v436_v61 = vadd.f32 %v949_v59, %v1089_v56  ;;  %v463_v6 = vmax.f32 %v361_v55, 0.0 }
 0x102   : > { %v363_v0 = vpop.f32.mrf.mxu0  ;;  %v427_v1 = vpop.f32.mrf.mxu1  ;;  %v479_v7 = vmax.f32 %v425_v57, 0.0 }
 0x103   : > { %v466_v2 = vmax.f32 %v372_v60, 0.0  ;;  %v482_v3 = vmax.f32 %v436_v61, 0.0  ;;  %v364_v4 = vadd.f32 %v1089_v56, %v363_v0  ;;  %v428_v5 = vadd.f32 %v1089_v56, %v427_v1 }
 0x104   : > { %v936_v8 = vpop.f32.mrf.mxu0  ;;  %v952_v9 = vpop.f32.mrf.mxu1 }
 0x105   : > { %v815_v10 = vpack.c.bf16 %v466_v2, %v465_v62  ;;  %v855_v11 = vpack.c.bf16 %v482_v3, %v481_v63  ;;  %v464_v12 = vmax.f32 %v364_v4, 0.0  ;;  %v480_v13 = vmax.f32 %v428_v5, 0.0 }
 0x106   : > { %v385_v14 = vadd.f32 %v936_v8, %v1089_v56  ;;  %v449_v15 = vadd.f32 %v952_v9, %v1089_v56  ;;  %v376_v16 = vpop.f32.mrf.mxu0  ;;  %v440_v17 = vpop.f32.mrf.mxu1 }
 0x107   : > { %871 = vst [vmem:[%s1103_s14 + $0x28] sm:$0xff] %v815_v10   ;;  %879 = vst [vmem:[%s1103_s14 + $0x68] sm:$0xff] %v855_v11   ;;  %v810_v18 = vpack.c.bf16 %v464_v12, %v463_v6  ;;  %v850_v19 = vpack.c.bf16 %v480_v13, %v479_v7  ;;  %v377_v20 = vadd.f32 %v1089_v56, %v376_v16 }
 0x108   : > { %v441_v21 = vadd.f32 %v1089_v56, %v440_v17  ;;  %v937_v22 = vpop.f32.mrf.mxu0  ;;  %v953_v23 = vpop.f32.mrf.mxu1  ;;  %v469_v26 = vmax.f32 %v385_v14, 0.0  ;;  %v485_v27 = vmax.f32 %v449_v15, 0.0 }
 0x109   : > { %870 = vst [vmem:[%s1103_s14 + $0x20] sm:$0xff] %v810_v18   ;;  %878 = vst [vmem:[%s1103_s14 + $0x60] sm:$0xff] %v850_v19   ;;  %v388_v24 = vadd.f32 %v937_v22, %v1089_v56  ;;  %v452_v25 = vadd.f32 %v953_v23, %v1089_v56  ;;  %v467_v34 = vmax.f32 %v377_v20, 0.0 }
 0x10a   : > { %v379_v28 = vpop.f32.mrf.mxu0  ;;  %v443_v29 = vpop.f32.mrf.mxu1  ;;  %v483_v35 = vmax.f32 %v441_v21, 0.0 }
 0x10b   : > { %v470_v30 = vmax.f32 %v388_v24, 0.0  ;;  %v486_v31 = vmax.f32 %v452_v25, 0.0  ;;  %v380_v32 = vadd.f32 %v1089_v56, %v379_v28  ;;  %v444_v33 = vadd.f32 %v1089_v56, %v443_v29 }
 0x10d   : > { %v825_v36 = vpack.c.bf16 %v470_v30, %v469_v26  ;;  %v865_v37 = vpack.c.bf16 %v486_v31, %v485_v27  ;;  %v468_v38 = vmax.f32 %v380_v32, 0.0  ;;  %v484_v39 = vmax.f32 %v444_v33, 0.0 }
 0x10f   : > { %873 = vst [vmem:[%s1103_s14 + $0x38] sm:$0xff] %v825_v36   ;;  %881 = vst [vmem:[%s1103_s14 + $0x78] sm:$0xff] %v865_v37   ;;  %v820_v40 = vpack.c.bf16 %v468_v38, %v467_v34  ;;  %v860_v41 = vpack.c.bf16 %v484_v39, %v483_v35 }
 0x111   : > { %872 = vst [vmem:[%s1103_s14 + $0x30] sm:$0xff] %v820_v40   ;;  %880 = vst [vmem:[%s1103_s14 + $0x70] sm:$0xff] %v860_v41  }
 0x112 PF: > { %s13_s12 = sadd.s32 1, %s992_s12  }
 0x113   : > { %p10_p4 = scmp.ge.s32.totalorder %s13_s12, 4  }
 0x115   :  { %12 = sbr.rel (!%p10_p4) target bundleno = 1 (0x1), region = 62 }

// kernel: _lambda_.6
= control target key start
LH: loop header
LB: loop body
LE: loop exit
PB: predicated region body
PF: predicated region fallthrough
CT: control target
= control target key end

     0   :  { %s582_s12 = smov 0   ;;  %s640_s0 = inlined_call_operand.vmem [shape: f32[128,128], index: 0, kind: input, shape index: {}]   ;;  %s641_s1 = inlined_call_operand.vmem [shape: bf16[128,128], index: 1, kind: input, shape index: {}]   ;;  %s642_s2 = inlined_call_operand.vmem [shape: f32[1,128], index: 2, kind: input, shape index: {}]   ;;  %s643_s3 = inlined_call_operand.vmem [shape: bf16[128,128], index: 3, kind: output, shape index: {}]  }
   0x1 LB: > { %s427_s13 = sadd.s32 4294967295, %s560_s12   ;;  %p431_p0 = scmp.ge.s32.totalorder %s560_s12, 1  ;;  %s560_s12 = sphi %s582_s12, %s13_s12  }
   0x2   : > { %p138_p1 = scmp.lt.s32.totalorder %s560_s12, 3 }
   0x4   : > { %p139_p2 = pnand %p431_p0, %p138_p1 }
   0x5   : > { %s432_s16 = sshll.u32 (!%p139_p2), %s427_s13, 3 }
   0x6   : > { %142 = sbr.rel (%p139_p2) target bundleno = 250 (0xfa), region = 32  ;;  %p163_p3 = scmp.lt.s32.totalorder (!%p139_p2), %s432_s16, 15 }
   0xb   : > { %v546_v0 = vld [vmem:[%s641_s1 + $0x38] sm:$0xff]   ;;  %v547_v1 = vld [vmem:[%s641_s1 + $0x30] sm:$0xff]   ;;  %s645_s16 = smov (!%p163_p3, %s432_s16), 15  ;;  %v548_v2 = vld [vmem:[%s641_s1 + $0x28] sm:$0xff]  }
   0xc   : > { %498 = vmatprep.subr.bf16.mxu0 %v546_v0  ;;  %522 = vmatprep.subr.bf16.mxu1 %v546_v0  ;;  %s433_s21 = sshll.u32 %s645_s16, 3  ;;  %v549_v3 = vld [vmem:[%s641_s1 + $0x20] sm:$0xff]   ;;  %v550_v10 = vld [vmem:[%s641_s1 + $0x18] sm:$0xff]   ;;  %v551_v11 = vld [vmem:[%s641_s1 + $0x10] sm:$0xff]   ;;  %s435_s10 = sshll.u32 %s645_s16, 2 }
   0xd   : > { %499 = vmatpush3.bf16.msra.mxu0 %v546_v0  ;;  %530 = vmatpush3.bf16.msra.mxu1 %v546_v0  ;;  %s605_s24 = scalar_lea.vmem %s640_s0, %s433_s21  ;;  %v552_v12 = vld [vmem:[%s641_s1 + $0x8] sm:$0xff]   ;;  %v553_v13 = vld [vmem:[%s641_s1] sm:$0xff]   ;;  %s172_s14 = scalar_lea.vmem %s643_s3, %s435_s10 }
   0xe   : > { %500 = vmatprep.subr.bf16.mxu0 %v547_v1  ;;  %523 = vmatprep.subr.bf16.mxu1 %v547_v1  ;;  %v175_v4 = vld [vmem:[%s605_s24] sm:$0xff]  ;;  %v176_v5 = vld [vmem:[%s605_s24 + $0x8] sm:$0xff]  ;;  %v177_v14 = vld [vmem:[%s605_s24 + $0x10] sm:$0xff] }
   0xf   : > { %v179_v6 = vld [vmem:[%s605_s24 + $0x20] sm:$0xff]  ;;  %v183_v7 = vpack.c.bf16 %v176_v5, %v175_v4  ;;  %v180_v8 = vld [vmem:[%s605_s24 + $0x28] sm:$0xff]  ;;  %v178_v15 = vld [vmem:[%s605_s24 + $0x18] sm:$0xff] }
  0x10   : > { %v185_v9 = vpack.c.bf16 %v180_v8, %v179_v6  ;;  %v181_v16 = vld [vmem:[%s605_s24 + $0x30] sm:$0xff]  ;;  %v182_v17 = vld [vmem:[%s605_s24 + $0x38] sm:$0xff]  ;;  %v184_v18 = vpack.c.bf16 %v178_v15, %v177_v14  ;;  %v436_v20 = vld [vmem:[%s642_s2] ss:$0 sm:$0xff] }
  0x11   : > { %501 = vmatpush3.bf16.msra.mxu0 %v547_v1  ;;  %531 = vmatpush3.bf16.msra.mxu1 %v547_v1  ;;  %v186_v19 = vpack.c.bf16 %v182_v17, %v181_v16 }
  0x12   : > { %502 = vmatprep.subr.bf16.mxu0 %v548_v2  ;;  %524 = vmatprep.subr.bf16.mxu1 %v548_v2 }
  0x13   : > { %514 = vmatprep.mubr.bf16.mxu0 %v183_v7  ;;  %518 = vmatprep.mubr.bf16.mxu1 %v185_v9 }
  0x15   : > { %503 = vmatpush3.bf16.msra.mxu0 %v548_v2  ;;  %532 = vmatpush3.bf16.msra.mxu1 %v548_v2 }
  0x16   : > { %504 = vmatprep.subr.bf16.mxu0 %v549_v3  ;;  %525 = vmatprep.subr.bf16.mxu1 %v549_v3 }
  0x19   : > { %505 = vmatpush3.bf16.msra.mxu0 %v549_v3  ;;  %533 = vmatpush3.bf16.msra.mxu1 %v549_v3 }
  0x1a   : > { %506 = vmatprep.subr.bf16.mxu0 %v550_v10  ;;  %526 = vmatprep.subr.bf16.mxu1 %v550_v10 }
  0x1d   : > { %507 = vmatpush3.bf16.msra.mxu0 %v550_v10  ;;  %534 = vmatpush3.bf16.msra.mxu1 %v550_v10 }
  0x1e   : > { %508 = vmatprep.subr.bf16.mxu0 %v551_v11  ;;  %527 = vmatprep.subr.bf16.mxu1 %v551_v11 }
  0x21   : > { %509 = vmatpush3.bf16.msra.mxu0 %v551_v11  ;;  %535 = vmatpush3.bf16.msra.mxu1 %v551_v11 }
  0x22   : > { %510 = vmatprep.subr.bf16.mxu0 %v552_v12  ;;  %528 = vmatprep.subr.bf16.mxu1 %v552_v12 }
  0x25   : > { %511 = vmatpush3.bf16.msra.mxu0 %v552_v12  ;;  %536 = vmatpush3.bf16.msra.mxu1 %v552_v12 }
  0x26   : > { %512 = vmatprep.subr.bf16.mxu0 %v553_v13  ;;  %529 = vmatprep.subr.bf16.mxu1 %v553_v13 }
  0x29   : > { %513 = vmatpush3.bf16.msra.mxu0 %v553_v13  ;;  %537 = vmatpush3.bf16.msra.mxu1 %v553_v13 }
  0x2c   : > { %515 = vmatmul.mubr.bf16.vlgmr.msra.gmra.mxu0 %v184_v18  ;;  %519 = vmatmul.mubr.bf16.vlgmr.msra.gmra.mxu1 %v186_v19 }
  0xec   : > { %v516_v21 = vpop.f32.mrf.mxu0  ;;  %v520_v22 = vpop.f32.mrf.mxu1 }
  0xed   : > { %v301_v23 = vadd.f32 %v516_v21, %v436_v20  ;;  %v317_v24 = vadd.f32 %v520_v22, %v436_v20 }
  0xee   : > { %v292_v25 = vpop.f32.mrf.mxu0  ;;  %v308_v26 = vpop.f32.mrf.mxu1 }
  0xef   : > { %v293_v27 = vadd.f32 %v436_v20, %v292_v25  ;;  %v309_v28 = vadd.f32 %v436_v20, %v308_v26  ;;  %v325_v33 = vmax.f32 %v301_v23, 0.0  ;;  %v329_v34 = vmax.f32 %v317_v24, 0.0 }
  0xf0   : > { %v517_v29 = vpop.f32.mrf.mxu0  ;;  %v521_v30 = vpop.f32.mrf.mxu1 }
  0xf1   : > { %v304_v31 = vadd.f32 %v517_v29, %v436_v20  ;;  %v320_v32 = vadd.f32 %v521_v30, %v436_v20  ;;  %v323_v41 = vmax.f32 %v293_v27, 0.0  ;;  %v327_v42 = vmax.f32 %v309_v28, 0.0 }
  0xf2   : > { %v295_v35 = vpop.f32.mrf.mxu0  ;;  %v311_v36 = vpop.f32.mrf.mxu1 }
  0xf3   : > { %v326_v37 = vmax.f32 %v304_v31, 0.0  ;;  %v330_v38 = vmax.f32 %v320_v32, 0.0  ;;  %v296_v39 = vadd.f32 %v436_v20, %v295_v35  ;;  %v312_v40 = vadd.f32 %v436_v20, %v311_v36 }
  0xf5   : > { %v471_v43 = vpack.c.bf16 %v326_v37, %v325_v33  ;;  %v481_v44 = vpack.c.bf16 %v330_v38, %v329_v34  ;;  %v324_v45 = vmax.f32 %v296_v39, 0.0  ;;  %v328_v46 = vmax.f32 %v312_v40, 0.0 }
  0xf7   : > { %483 = vst [vmem:[%s172_s14 + $0x8] sm:$0xff] %v471_v43   ;;  %485 = vst [vmem:[%s172_s14 + $0x18] sm:$0xff] %v481_v44   ;;  %v466_v47 = vpack.c.bf16 %v324_v45, %v323_v41  ;;  %v476_v48 = vpack.c.bf16 %v328_v46, %v327_v42 }
  0xf9   : > { %467 = vst [vmem:[%s172_s14] sm:$0xff] %v466_v47   ;;  %484 = vst [vmem:[%s172_s14 + $0x10] sm:$0xff] %v476_v48  }
  0xfa PF: > { %s13_s12 = sadd.s32 1, %s560_s12  }
  0xfb   : > { %p10_p4 = scmp.ge.s32.totalorder %s13_s12, 4  }
  0xfd   :  { %12 = sbr.rel (!%p10_p4) target bundleno = 1 (0x1), region = 62 }

// kernel: _lambda_.5
= control target key start
LH: loop header
LB: loop body
LE: loop exit
PB: predicated region body
PF: predicated region fallthrough
CT: control target
= control target key end

     0   :  { %s1964_s21 = smov 0   ;;  %s2446_s0 = inlined_call_operand.vmem [shape: bf16[2,16,16,128], index: 0, kind: input, shape index: {}]   ;;  %s2447_s1 = inlined_call_operand.vmem [shape: f32[9,128], index: 1, kind: input, shape index: {}]   ;;  %s2448_s2 = inlined_call_operand.vmem [shape: f32[1,128], index: 2, kind: input, shape index: {}]   ;;  %s2449_s3 = inlined_call_operand.vmem [shape: f32[128,128], index: 3, kind: input, shape index: {}]   ;;  %s2450_s4 = inlined_call_operand.vmem [shape: f32[1,128], index: 4, kind: input, shape index: {}]   ;;  %s2451_s5 = inlined_call_operand.vmem [shape: f32[128,128], index: 5, kind: input, shape index: {}]   ;;  %s2452_s6 = inlined_call_operand.vmem [shape: f32[1,128], index: 6, kind: input, shape index: {}]   ;;  %s2453_s7 = inlined_call_operand.vmem [shape: bf16[128,128], index: 7, kind: input, shape index: {}]   ;;  %s2454_s8 = inlined_call_operand.vmem [shape: f32[1,128], index: 8, kind: input, shape index: {}]   ;;  %s2455_s9 = inlined_call_operand.vmem [shape: f32[2,8,8,128], index: 9, kind: input, shape index: {}]   ;;  %s2456_s10 = inlined_call_operand.vmem [shape: bf16[128,128], index: 10, kind: input, shape index: {}]   ;;  %s2457_s11 = inlined_call_operand.vmem [shape: f32[1,128], index: 11, kind: input, shape index: {}]   ;;  %s2458_s12 = inlined_call_operand.vmem [shape: f32[2,8,8,128], index: 12, kind: output, shape index: {}]  }
   0x1 LB: > { %s1566_s22 = sadd.s32 4294967295, %s1895_s21   ;;  %p1570_p0 = scmp.ge.s32.totalorder %s1895_s21, 1  ;;  %s1895_s21 = sphi %s1964_s21, %s22_s21  }
   0x2   : > { %p372_p1 = scmp.lt.s32.totalorder %s1895_s21, 3 }
   0x4   : > { %p373_p2 = pnand %p1570_p0, %p372_p1 }
   0x5   : > { %p1977_p3 = scmp.lt.s32.totalorder (!%p373_p2), %s1566_s22, 1 }
   0x6   : > { %376 = sbr.rel (%p373_p2) target bundleno = 762 (0x2fa), region = 68 }
   0xb   : > { %v963_v0 = vld [vmem:[%s2449_s3 + $0x78] sm:$0xff]  ;;  %v603_v1 = vlaneseq  ;;  %v1897_v2 = vmov 0.0   ;;  %v962_v3 = vld [vmem:[%s2449_s3 + $0x70] sm:$0xff]  ;;  %vm1898_vm0 = vmmov 0   ;;  %s2461_s22 = smov (!%p1977_p3, %s1566_s22), 1  ;;  %v961_v5 = vld [vmem:[%s2449_s3 + $0x68] sm:$0xff] }
   0xc   : > { %486 = vst [vmem:[#allocation2 + $0x198] sm:$0xff] %v1897_v2  ;;  %1740 = vmatprep.subr.mxu0 %v1897_v2  ;;  %435 = vst [vmem:[#allocation2] sm:$0xff] %v1897_v2  ;;  %1772 = vmatprep.mubr.msk.f32.mxu0 %vm1898_vm0, %v1897_v2  ;;  %s1600_s30 = sshll.u32 %s2461_s22, 7  ;;  %v960_v8 = vld [vmem:[%s2449_s3 + $0x60] sm:$0xff]  ;;  %v959_v9 = vld [vmem:[%s2449_s3 + $0x58] sm:$0xff]  ;;  %s1601_s14 = sshll.u32 %s2461_s22, 6 }
   0xd   : > { %436 = vst [vmem:[#allocation2 + $0x8] sm:$0xff] %v1897_v2  ;;  %437 = vst [vmem:[#allocation2 + $0x10] sm:$0x3] %v1897_v2  ;;  %1741 = vmatpush3.msra.mxu0 %v963_v0  ;;  %v2044_v4 = vshrl.u32 %v603_v1, 7  ;;  %1775 = vmatprep.subr.mxu1 %v1897_v2  ;;  %s2065_s19 = scalar_lea.vmem %s2446_s0, %s1600_s30  ;;  %v2070_v10 = vld [vmem:[%s2447_s1] sm:$0xff]  ;;  %v958_v20 = vld [vmem:[%s2449_s3 + $0x50] sm:$0xff]  ;;  %s428_s17 = scalar_lea.vmem %s2455_s9, %s1601_s14 }
   0xe   : > { %438 = vst [vmem:[#allocation2 + $0x18] sm:$0xff] %v1897_v2  ;;  %439 = vst [vmem:[#allocation2 + $0x20] sm:$0xff] %v1897_v2  ;;  %1742 = vmatprep.subr.mxu0 %v1897_v2  ;;  %1807 = vmatprep.mubr.msk.f32.mxu1 %vm1898_vm0, %v1897_v2  ;;  %v1604_v13 = vld [vmem:[%s2065_s19] sm:$0xff]   ;;  %v1667_v14 = vld [vmem:[%s2065_s19 + $0x8] sm:$0xff]   ;;  %s2433_s15 = scalar_lea.vmem %s2458_s12, %s1601_s14 }
   0xf   : > { %440 = vst [vmem:[#allocation2 + $0x28] sm:$0x3] %v1897_v2  ;;  %441 = vst [vmem:[#allocation2 + $0x30] sm:$0xff] %v1897_v2  ;;  %1743 = vmatpush3.msra.mxu0 %v962_v3  ;;  %v605_v6 = vsub.s32 0, %v2044_v4  ;;  %v641_v7 = vsub.s32 1, %v2044_v4  ;;  %v677_v11 = vsub.s32 2, %v2044_v4  ;;  %v1605_v21 = vunpack.c.l.bf16 %v1604_v13 }
  0x10   : > { %442 = vst [vmem:[#allocation2 + $0x38] sm:$0xff] %v1897_v2  ;;  %443 = vst [vmem:[#allocation2 + $0x40] sm:$0x3] %v1897_v2  ;;  %1744 = vmatprep.subr.mxu0 %v1897_v2  ;;  %v712_v12 = vsub.s32 3, %v2044_v4  ;;  %v1668_v15 = vld [vmem:[%s2065_s19 + $0x10] sm:$0xff]   ;;  %v748_v18 = vsub.s32 4, %v2044_v4  ;;  %v1606_v22 = vunpack.c.h.bf16 %v1604_v13  ;;  %v1609_v23 = vunpack.c.l.bf16 %v1667_v14 }
  0x11   : > { %444 = vst [vmem:[#allocation2 + $0x48] sm:$0xff] %v1897_v2  ;;  %445 = vst [vmem:[#allocation2 + $0x50] sm:$0xff] %v1897_v2  ;;  %1745 = vmatpush3.msra.mxu0 %v961_v5  ;;  %v2080_v16 = vrot.slane %v2070_v10, %v605_v6  ;;  %v2083_v17 = vrot.slane %v2070_v10, %v641_v7  ;;  %v784_v19 = vsub.s32 5, %v2044_v4  ;;  %v1610_v24 = vunpack.c.h.bf16 %v1667_v14  ;;  %v1669_v25 = vld [vmem:[%s2065_s19 + $0x18] sm:$0xff]   ;;  %v1670_v26 = vld [vmem:[%s2065_s19 + $0x20] sm:$0xff]  }
  0x12   : > { %446 = vst [vmem:[#allocation2 + $0x58] sm:$0x3] %v1897_v2  ;;  %447 = vst [vmem:[#allocation2 + $0x60] sm:$0xff] %v1897_v2  ;;  %1746 = vmatprep.subr.mxu0 %v1897_v2  ;;  %v1671_v27 = vld [vmem:[%s2065_s19 + $0x28] sm:$0xff]   ;;  %v1613_v28 = vunpack.c.l.bf16 %v1668_v15  ;;  %v1614_v29 = vunpack.c.h.bf16 %v1668_v15  ;;  %v1617_v30 = vunpack.c.l.bf16 %v1669_v25  ;;  %v1618_v31 = vunpack.c.h.bf16 %v1669_v25  ;;  %v1672_v32 = vld [vmem:[%s2065_s19 + $0x30] sm:$0xff]  }
  0x13   : > { %448 = vst [vmem:[#allocation2 + $0x68] sm:$0xff] %v1897_v2  ;;  %449 = vst [vmem:[#allocation2 + $0x70] sm:$0x3] %v1897_v2  ;;  %1747 = vmatpush3.msra.mxu0 %v960_v8  ;;  %v1673_v33 = vld [vmem:[%s2065_s19 + $0x38] sm:$0xff]   ;;  %v1674_v34 = vld [vmem:[%s2065_s19 + $0x40] sm:$0xff]   ;;  %v1621_v35 = vunpack.c.l.bf16 %v1670_v26  ;;  %v1622_v36 = vunpack.c.h.bf16 %v1670_v26  ;;  %v1625_v37 = vunpack.c.l.bf16 %v1671_v27  ;;  %v1626_v38 = vunpack.c.h.bf16 %v1671_v27 }
  0x14   : > { %450 = vst [vmem:[#allocation2 + $0x78] sm:$0xff] %v1897_v2  ;;  %451 = vst [vmem:[#allocation2 + $0x80] sm:$0xff] %v1897_v2  ;;  %1748 = vmatprep.subr.mxu0 %v1897_v2  ;;  %v1675_v39 = vld [vmem:[%s2065_s19 + $0x48] sm:$0xff]   ;;  %v1676_v40 = vld [vmem:[%s2065_s19 + $0x50] sm:$0xff]   ;;  %v1629_v42 = vunpack.c.l.bf16 %v1672_v32  ;;  %v1630_v43 = vunpack.c.h.bf16 %v1672_v32  ;;  %v1633_v44 = vunpack.c.l.bf16 %v1673_v33  ;;  %v1634_v45 = vunpack.c.h.bf16 %v1673_v33 }
  0x15   : > { %452 = vst [vmem:[#allocation2 + $0x88] sm:$0x3] %v1897_v2  ;;  %453 = vst [vmem:[#allocation2 + $0x90] sm:$0xff] %v1897_v2  ;;  %v1677_v41 = vld [vmem:[%s2065_s19 + $0x58] sm:$0xff]   ;;  %1749 = vmatpush3.msra.mxu0 %v959_v9  ;;  %v1678_v46 = vld [vmem:[%s2065_s19 + $0x60] sm:$0xff]   ;;  %v1637_v49 = vunpack.c.l.bf16 %v1674_v34  ;;  %v1638_v50 = vunpack.c.h.bf16 %v1674_v34  ;;  %v1641_v51 = vunpack.c.l.bf16 %v1675_v39  ;;  %v1642_v52 = vunpack.c.h.bf16 %v1675_v39 }
  0x16   : > { %454 = vst [vmem:[#allocation2 + $0x98] sm:$0xff] %v1897_v2  ;;  %455 = vst [vmem:[#allocation2 + $0xa0] sm:$0x3] %v1897_v2  ;;  %v1679_v47 = vld [vmem:[%s2065_s19 + $0x68] sm:$0xff]   ;;  %1750 = vmatprep.subr.mxu0 %v1897_v2  ;;  %v1680_v53 = vld [vmem:[%s2065_s19 + $0x70] sm:$0xff]   ;;  %v1645_v55 = vunpack.c.l.bf16 %v1676_v40  ;;  %v1646_v56 = vunpack.c.h.bf16 %v1676_v40  ;;  %v1649_v57 = vunpack.c.l.bf16 %v1677_v41  ;;  %v1650_v58 = vunpack.c.h.bf16 %v1677_v41 }
  0x17   : > { %456 = vst [vmem:[#allocation2 + $0xa8] sm:$0xff] %v1897_v2  ;;  %457 = vst [vmem:[#allocation2 + $0xb0] sm:$0xff] %v1897_v2  ;;  %v957_v48 = vld [vmem:[%s2449_s3 + $0x48] sm:$0xff]  ;;  %v1681_v54 = vld [vmem:[%s2065_s19 + $0x78] sm:$0xff]   ;;  %1751 = vmatpush3.msra.mxu0 %v958_v20  ;;  %v1653_v63 = vunpack.c.l.bf16 %v1678_v46  ;;  %v1654_v0 = vunpack.c.h.bf16 %v1678_v46  ;;  %v1657_v1 = vunpack.c.l.bf16 %v1679_v47  ;;  %v1658_v3 = vunpack.c.h.bf16 %v1679_v47 }
  0x18   : > { %458 = vst [vmem:[#allocation2 + $0xb8] sm:$0x3] %v1897_v2  ;;  %459 = vst [vmem:[#allocation2 + $0xc0] sm:$0xff] %v1897_v2  ;;  %v588_v59 = vld [vmem:[#allocation2] ss:$2 sm:$0xff]  ;;  %v1051_v61 = vld [vmem:[%s2451_s5 + $0x78] sm:$0xff]  ;;  %1752 = vmatprep.subr.mxu0 %v1897_v2  ;;  %v1661_v7 = vunpack.c.l.bf16 %v1680_v53  ;;  %v1662_v8 = vunpack.c.h.bf16 %v1680_v53  ;;  %v1665_v9 = vunpack.c.l.bf16 %v1681_v54  ;;  %v1666_v13 = vunpack.c.h.bf16 %v1681_v54 }
  0x19   : > { %460 = vst [vmem:[#allocation2 + $0xc8] sm:$0xff] %v1897_v2  ;;  %461 = vst [vmem:[#allocation2 + $0xd0] sm:$0x3] %v1897_v2  ;;  %v624_v60 = vld [vmem:[#allocation2 + $0x1] ss:$2 sm:$0xff]  ;;  %1776 = vmatpush3.msra.mxu1 %v1051_v61  ;;  %v1050_v5 = vld [vmem:[%s2451_s5 + $0x70] sm:$0xff]  ;;  %1753 = vmatpush3.msra.mxu0 %v957_v48  ;;  %v2137_v27 = vrot.slane %v2070_v10, %v712_v12 }
  0x1a   : > { %462 = vst [vmem:[#allocation2 + $0xd8] sm:$0xff] %v1897_v2  ;;  %463 = vst [vmem:[#allocation2 + $0xe0] sm:$0xff] %v1897_v2  ;;  %v956_v62 = vld [vmem:[%s2449_s3 + $0x40] sm:$0xff]  ;;  %1777 = vmatprep.subr.mxu1 %v1897_v2  ;;  %1754 = vmatprep.subr.mxu0 %v1897_v2  ;;  %v955_v15 = vld [vmem:[%s2449_s3 + $0x38] sm:$0xff] }
  0x1b   : > { %464 = vst [vmem:[#allocation2 + $0xe8] sm:$0x3] %v1897_v2  ;;  %465 = vst [vmem:[#allocation2 + $0xf0] sm:$0xff] %v1897_v2  ;;  %v660_v14 = vld [vmem:[#allocation2 + $0x2] ss:$2 sm:$0xff]  ;;  %1755 = vmatpush3.msra.mxu0 %v956_v62  ;;  %1778 = vmatpush3.msra.mxu1 %v1050_v5 }
  0x1c   : > { %466 = vst [vmem:[#allocation2 + $0xf8] sm:$0xff] %v1897_v2  ;;  %467 = vst [vmem:[#allocation2 + $0x100] sm:$0x3] %v1897_v2  ;;  %v954_v20 = vld [vmem:[%s2449_s3 + $0x30] sm:$0xff]  ;;  %1756 = vmatprep.subr.mxu0 %v1897_v2  ;;  %v952_v41 = vld [vmem:[%s2449_s3 + $0x20] sm:$0xff]  ;;  %1779 = vmatprep.subr.mxu1 %v1897_v2 }
  0x1d   : > { %468 = vst [vmem:[#allocation2 + $0x108] sm:$0xff] %v1897_v2  ;;  %469 = vst [vmem:[#allocation2 + $0x110] sm:$0xff] %v1897_v2  ;;  %1757 = vmatpush3.msra.mxu0 %v955_v15 }
  0x1e   : > { %470 = vst [vmem:[#allocation2 + $0x118] sm:$0x3] %v1897_v2  ;;  %471 = vst [vmem:[#allocation2 + $0x120] sm:$0xff] %v1897_v2  ;;  %1758 = vmatprep.subr.mxu0 %v1897_v2 }
  0x1f   : > { %472 = vst [vmem:[#allocation2 + $0x128] sm:$0xff] %v1897_v2  ;;  %473 = vst [vmem:[#allocation2 + $0x130] sm:$0x3] %v1897_v2  ;;  %1759 = vmatpush3.msra.mxu0 %v954_v20 }
  0x20   : > { %474 = vst [vmem:[#allocation2 + $0x138] sm:$0xff] %v1897_v2  ;;  %475 = vst [vmem:[#allocation2 + $0x140] sm:$0xff] %v1897_v2  ;;  %1760 = vmatprep.subr.mxu0 %v1897_v2 }
  0x21   : > { %476 = vst [vmem:[#allocation2 + $0x148] sm:$0x3] %v1897_v2  ;;  %477 = vst [vmem:[#allocation2 + $0x150] sm:$0xff] %v1897_v2 }
  0x22   : > { %478 = vst [vmem:[#allocation2 + $0x158] sm:$0xff] %v1897_v2  ;;  %479 = vst [vmem:[#allocation2 + $0x160] sm:$0x3] %v1897_v2 }
  0x23   : > { %480 = vst [vmem:[#allocation2 + $0x168] sm:$0xff] %v1897_v2  ;;  %481 = vst [vmem:[#allocation2 + $0x170] sm:$0xff] %v1897_v2 }
  0x24   : > { %482 = vst [vmem:[#allocation2 + $0x178] sm:$0x3] %v1897_v2  ;;  %483 = vst [vmem:[#allocation2 + $0x180] sm:$0xff] %v1897_v2 }
  0x25   : > { %484 = vst [vmem:[#allocation2 + $0x188] sm:$0xff] %v1897_v2  ;;  %485 = vst [vmem:[#allocation2 + $0x190] sm:$0x3] %v1897_v2 }
  0x26   : > { %554 = vst [vmem:[#allocation2 + $0x19] sm:$0xff] %v1605_v21  ;;  %555 = vst [vmem:[#allocation2 + $0x21] sm:$0xff] %v1606_v22  ;;  %v607_v21 = vmul.f32 %v2080_v16, %v588_v59  ;;  %v643_v22 = vmul.f32 %v2083_v17, %v624_v60 }
  0x27   : > { %556 = vst [vmem:[#allocation2 + $0x31] sm:$0xff] %v1609_v23  ;;  %557 = vst [vmem:[#allocation2 + $0x39] sm:$0xff] %v1610_v24  ;;  %v2132_v23 = vrot.slane %v2070_v10, %v677_v11  ;;  %v2147_v11 = vrot.slane %v2070_v10, %v784_v19 }
  0x28   : > { %558 = vst [vmem:[#allocation2 + $0x49] sm:$0xff] %v1613_v28  ;;  %559 = vst [vmem:[#allocation2 + $0x51] sm:$0xff] %v1614_v29  ;;  %v2142_v28 = vrot.slane %v2070_v10, %v748_v18  ;;  %v953_v29 = vld [vmem:[%s2449_s3 + $0x28] sm:$0xff]  ;;  %v651_v18 = vadd.f32 %v643_v22, %v607_v21 }
  0x29   : > { %560 = vst [vmem:[#allocation2 + $0x61] sm:$0xff] %v1617_v30  ;;  %561 = vst [vmem:[#allocation2 + $0x69] sm:$0xff] %v1618_v31  ;;  %v679_v34 = vmul.f32 %v2132_v23, %v660_v14  ;;  %1761 = vmatpush3.msra.mxu0 %v953_v29 }
  0x2a   : > { %562 = vst [vmem:[#allocation2 + $0x79] sm:$0xff] %v1621_v35  ;;  %563 = vst [vmem:[#allocation2 + $0x81] sm:$0xff] %v1622_v36  ;;  %1762 = vmatprep.subr.mxu0 %v1897_v2 }
  0x2b   : > { %564 = vst [vmem:[#allocation2 + $0x91] sm:$0xff] %v1625_v37  ;;  %565 = vst [vmem:[#allocation2 + $0x99] sm:$0xff] %v1626_v38  ;;  %1763 = vmatpush3.msra.mxu0 %v952_v41 }
  0x2c   : > { %566 = vst [vmem:[#allocation2 + $0xa9] sm:$0xff] %v1629_v42  ;;  %567 = vst [vmem:[#allocation2 + $0xb1] sm:$0xff] %v1630_v43  ;;  %1764 = vmatprep.subr.mxu0 %v1897_v2 }
  0x2d   : > { %568 = vst [vmem:[#allocation2 + $0xc1] sm:$0xff] %v1633_v44  ;;  %569 = vst [vmem:[#allocation2 + $0xc9] sm:$0xff] %v1634_v45  ;;  %v695_v21 = vld [vmem:[#allocation2 + $0x18] ss:$2 sm:$0xff] }
  0x2e   : > { %570 = vst [vmem:[#allocation2 + $0xd9] sm:$0xff] %v1637_v49  ;;  %571 = vst [vmem:[#allocation2 + $0xe1] sm:$0xff] %v1638_v50  ;;  %v590_v24 = vld [vmem:[#allocation2 + $0x30] ss:$2 sm:$0xff]  ;;  %v626_v25 = vld [vmem:[#allocation2 + $0x31] ss:$2 sm:$0xff] }
  0x2f   : > { %572 = vst [vmem:[#allocation2 + $0xf1] sm:$0xff] %v1641_v51  ;;  %573 = vst [vmem:[#allocation2 + $0xf9] sm:$0xff] %v1642_v52  ;;  %v662_v26 = vld [vmem:[#allocation2 + $0x32] ss:$2 sm:$0xff]  ;;  %v608_v12 = vmul.f32 %v2080_v16, %v590_v24  ;;  %v644_v32 = vmul.f32 %v2083_v17, %v626_v25 }
  0x30   : > { %574 = vst [vmem:[#allocation2 + $0x109] sm:$0xff] %v1645_v55  ;;  %575 = vst [vmem:[#allocation2 + $0x111] sm:$0xff] %v1646_v56  ;;  %v592_v30 = vld [vmem:[#allocation2 + $0x60] ss:$2 sm:$0xff]  ;;  %v628_v31 = vld [vmem:[#allocation2 + $0x61] ss:$2 sm:$0xff]  ;;  %v680_v39 = vmul.f32 %v2132_v23, %v662_v26  ;;  %v687_v26 = vadd.f32 %v679_v34, %v651_v18 }
  0x31   : > { %576 = vst [vmem:[#allocation2 + $0x121] sm:$0xff] %v1649_v57  ;;  %577 = vst [vmem:[#allocation2 + $0x129] sm:$0xff] %v1650_v58  ;;  %v664_v33 = vld [vmem:[#allocation2 + $0x62] ss:$2 sm:$0xff]  ;;  %v609_v35 = vmul.f32 %v2080_v16, %v592_v30  ;;  %v645_v37 = vmul.f32 %v2083_v17, %v628_v31  ;;  %v652_v46 = vadd.f32 %v644_v32, %v608_v12  ;;  %v951_v56 = vld [vmem:[%s2449_s3 + $0x18] sm:$0xff] }
  0x32   : > { %578 = vst [vmem:[#allocation2 + $0x139] sm:$0xff] %v1653_v63  ;;  %579 = vst [vmem:[#allocation2 + $0x141] sm:$0xff] %v1654_v0  ;;  %v594_v19 = vld [vmem:[#allocation2 + $0x90] ss:$2 sm:$0xff]  ;;  %v630_v36 = vld [vmem:[#allocation2 + $0x91] ss:$2 sm:$0xff]  ;;  %v681_v40 = vmul.f32 %v2132_v23, %v664_v33  ;;  %1765 = vmatpush3.msra.mxu0 %v951_v56 }
  0x33   : > { %580 = vst [vmem:[#allocation2 + $0x151] sm:$0xff] %v1657_v1  ;;  %581 = vst [vmem:[#allocation2 + $0x159] sm:$0xff] %v1658_v3  ;;  %v666_v38 = vld [vmem:[#allocation2 + $0x92] ss:$2 sm:$0xff]  ;;  %v610_v43 = vmul.f32 %v2080_v16, %v594_v19  ;;  %v646_v45 = vmul.f32 %v2083_v17, %v630_v36  ;;  %v653_v53 = vadd.f32 %v645_v37, %v609_v35  ;;  %v949_v18 = vld [vmem:[%s2449_s3 + $0x8] sm:$0xff]  ;;  %1766 = vmatprep.subr.mxu0 %v1897_v2 }
  0x34   : > { %582 = vst [vmem:[#allocation2 + $0x169] sm:$0xff] %v1661_v7  ;;  %583 = vst [vmem:[#allocation2 + $0x171] sm:$0xff] %v1662_v8  ;;  %v596_v42 = vld [vmem:[#allocation2 + $0xc0] ss:$2 sm:$0xff]  ;;  %v632_v44 = vld [vmem:[#allocation2 + $0xc1] ss:$2 sm:$0xff]  ;;  %v682_v48 = vmul.f32 %v2132_v23, %v666_v38  ;;  %v688_v29 = vadd.f32 %v680_v39, %v652_v46  ;;  %v714_v37 = vmul.f32 %v2137_v27, %v695_v21 }
  0x35   : > { %584 = vst [vmem:[#allocation2 + $0x181] sm:$0xff] %v1665_v9  ;;  %585 = vst [vmem:[#allocation2 + $0x189] sm:$0xff] %v1666_v13  ;;  %v668_v47 = vld [vmem:[#allocation2 + $0xc2] ss:$2 sm:$0xff]  ;;  %v611_v50 = vmul.f32 %v2080_v16, %v596_v42  ;;  %v647_v52 = vmul.f32 %v2083_v17, %v632_v44  ;;  %v654_v61 = vadd.f32 %v646_v45, %v610_v43  ;;  %v731_v44 = vld [vmem:[#allocation2 + $0x19] ss:$2 sm:$0xff] }
  0x36   : > { %v598_v49 = vld [vmem:[#allocation2 + $0xf0] ss:$2 sm:$0xff]  ;;  %v634_v51 = vld [vmem:[#allocation2 + $0xf1] ss:$2 sm:$0xff]  ;;  %v683_v55 = vmul.f32 %v2132_v23, %v668_v47  ;;  %v689_v30 = vadd.f32 %v681_v40, %v653_v53 }
  0x37   : > { %v670_v54 = vld [vmem:[#allocation2 + $0xf2] ss:$2 sm:$0xff]  ;;  %v612_v58 = vmul.f32 %v2080_v16, %v598_v49  ;;  %v648_v60 = vmul.f32 %v2083_v17, %v634_v51  ;;  %v655_v7 = vadd.f32 %v647_v52, %v611_v50  ;;  %v690_v33 = vadd.f32 %v682_v48, %v654_v61  ;;  %v733_v45 = vld [vmem:[#allocation2 + $0x49] ss:$2 sm:$0xff]  ;;  %v735_v46 = vld [vmem:[#allocation2 + $0x79] ss:$2 sm:$0xff] }
  0x38   : > { %v600_v57 = vld [vmem:[#allocation2 + $0x120] ss:$2 sm:$0xff]  ;;  %v636_v59 = vld [vmem:[#allocation2 + $0x121] ss:$2 sm:$0xff]  ;;  %v684_v63 = vmul.f32 %v2132_v23, %v670_v54  ;;  %v722_v49 = vadd.f32 %v714_v37, %v687_v26 }
  0x39   : > { %v672_v62 = vld [vmem:[#allocation2 + $0x122] ss:$2 sm:$0xff]  ;;  %v613_v1 = vmul.f32 %v2080_v16, %v600_v57  ;;  %v649_v5 = vmul.f32 %v2083_v17, %v636_v59  ;;  %v656_v15 = vadd.f32 %v648_v60, %v612_v58  ;;  %v737_v51 = vld [vmem:[#allocation2 + $0xa9] ss:$2 sm:$0xff]  ;;  %v739_v52 = vld [vmem:[#allocation2 + $0xd9] ss:$2 sm:$0xff] }
  0x3a   : > { %v602_v0 = vld [vmem:[#allocation2 + $0x150] ss:$2 sm:$0xff]  ;;  %v638_v3 = vld [vmem:[#allocation2 + $0x151] ss:$2 sm:$0xff]  ;;  %v685_v9 = vmul.f32 %v2132_v23, %v672_v62  ;;  %v948_v54 = vld [vmem:[%s2449_s3] sm:$0xff]  ;;  %v750_v62 = vmul.f32 %v2142_v28, %v731_v44 }
  0x3b   : > { %v674_v8 = vld [vmem:[#allocation2 + $0x152] ss:$2 sm:$0xff]  ;;  %v614_v13 = vmul.f32 %v2080_v16, %v602_v0  ;;  %v650_v14 = vmul.f32 %v2083_v17, %v638_v3  ;;  %v657_v25 = vadd.f32 %v649_v5, %v613_v1  ;;  %v692_v19 = vadd.f32 %v684_v63, %v656_v15  ;;  %v741_v53 = vld [vmem:[#allocation2 + $0x109] ss:$2 sm:$0xff]  ;;  %v743_v59 = vld [vmem:[#allocation2 + $0x139] ss:$2 sm:$0xff] }
  0x3c   : > { %v686_v20 = vmul.f32 %v2132_v23, %v674_v8  ;;  %v697_v22 = vld [vmem:[#allocation2 + $0x48] ss:$2 sm:$0xff]  ;;  %v699_v24 = vld [vmem:[#allocation2 + $0x78] ss:$2 sm:$0xff]  ;;  %v691_v23 = vadd.f32 %v683_v55, %v655_v7  ;;  %v745_v60 = vld [vmem:[#allocation2 + $0x169] ss:$2 sm:$0xff]  ;;  %v751_v63 = vmul.f32 %v2142_v28, %v733_v45  ;;  %v752_v1 = vmul.f32 %v2142_v28, %v735_v46 }
  0x3d   : > { %v701_v12 = vld [vmem:[#allocation2 + $0xa8] ss:$2 sm:$0xff]  ;;  %v703_v31 = vld [vmem:[#allocation2 + $0xd8] ss:$2 sm:$0xff]  ;;  %v658_v17 = vadd.f32 %v650_v14, %v614_v13  ;;  %v693_v34 = vadd.f32 %v685_v9, %v657_v25  ;;  %v715_v38 = vmul.f32 %v2137_v27, %v697_v22  ;;  %v716_v39 = vmul.f32 %v2137_v27, %v699_v24 }
  0x3e   : > { %v705_v32 = vld [vmem:[#allocation2 + $0x108] ss:$2 sm:$0xff]  ;;  %v707_v35 = vld [vmem:[#allocation2 + $0x138] ss:$2 sm:$0xff]  ;;  %v717_v41 = vmul.f32 %v2137_v27, %v701_v12  ;;  %v718_v42 = vmul.f32 %v2137_v27, %v703_v31  ;;  %v753_v3 = vmul.f32 %v2142_v28, %v737_v51  ;;  %v754_v5 = vmul.f32 %v2142_v28, %v739_v52 }
  0x3f   : > { %v950_v16 = vld [vmem:[%s2449_s3 + $0x10] sm:$0xff]  ;;  %v694_v40 = vadd.f32 %v686_v20, %v658_v17  ;;  %v719_v43 = vmul.f32 %v2137_v27, %v705_v32  ;;  %v720_v47 = vmul.f32 %v2137_v27, %v707_v35  ;;  %v723_v50 = vadd.f32 %v715_v38, %v688_v29  ;;  %v1049_v0 = vld [vmem:[%s2451_s5 + $0x68] sm:$0xff] }
  0x40   : > { %v709_v36 = vld [vmem:[#allocation2 + $0x168] ss:$2 sm:$0xff]  ;;  %1767 = vmatpush3.msra.mxu0 %v950_v16  ;;  %v724_v55 = vadd.f32 %v716_v39, %v689_v30  ;;  %v725_v56 = vadd.f32 %v717_v41, %v690_v33  ;;  %v726_v57 = vadd.f32 %v718_v42, %v691_v23  ;;  %v755_v7 = vmul.f32 %v2142_v28, %v741_v53  ;;  %v1048_v16 = vld [vmem:[%s2451_s5 + $0x60] sm:$0xff] }
  0x41   : > { %v721_v48 = vmul.f32 %v2137_v27, %v709_v36  ;;  %1768 = vmatprep.subr.mxu0 %v1897_v2  ;;  %v727_v58 = vadd.f32 %v719_v43, %v692_v19  ;;  %v728_v61 = vadd.f32 %v720_v47, %v693_v34  ;;  %v767_v8 = vld [vmem:[#allocation2 + $0x1a] ss:$2 sm:$0xff]  ;;  %v769_v9 = vld [vmem:[#allocation2 + $0x4a] ss:$2 sm:$0xff]  ;;  %v756_v14 = vmul.f32 %v2142_v28, %v743_v59 }
  0x42   : > { %1769 = vmatpush3.msra.mxu0 %v949_v18  ;;  %v771_v13 = vld [vmem:[#allocation2 + $0x7a] ss:$2 sm:$0xff]  ;;  %v757_v15 = vmul.f32 %v2142_v28, %v745_v60  ;;  %v758_v20 = vadd.f32 %v750_v62, %v722_v49  ;;  %v759_v21 = vadd.f32 %v751_v63, %v723_v50  ;;  %v773_v22 = vld [vmem:[#allocation2 + $0xaa] ss:$2 sm:$0xff]  ;;  %v760_v26 = vadd.f32 %v752_v1, %v724_v55 }
  0x43   : > { %v729_v27 = vadd.f32 %v721_v48, %v694_v40  ;;  %1770 = vmatprep.subr.mxu0 %v1897_v2  ;;  %v775_v24 = vld [vmem:[#allocation2 + $0xda] ss:$2 sm:$0xff]  ;;  %v777_v25 = vld [vmem:[#allocation2 + $0x10a] ss:$2 sm:$0xff]  ;;  %v761_v29 = vadd.f32 %v753_v3, %v725_v56  ;;  %v762_v30 = vadd.f32 %v754_v5, %v726_v57  ;;  %v763_v12 = vadd.f32 %v755_v7, %v727_v58 }
  0x44   : > { %1771 = vmatpush3.msra.mxu0 %v948_v54  ;;  %v779_v31 = vld [vmem:[#allocation2 + $0x13a] ss:$2 sm:$0xff]  ;;  %v781_v32 = vld [vmem:[#allocation2 + $0x16a] ss:$2 sm:$0xff]  ;;  %v764_v17 = vadd.f32 %v756_v14, %v728_v61  ;;  %v786_v28 = vmul.f32 %v2147_v11, %v767_v8  ;;  %v787_v23 = vmul.f32 %v2147_v11, %v769_v9  ;;  %1780 = vmatpush3.msra.mxu1 %v1049_v0  ;;  %v820_v52 = vsub.s32 6, %v2044_v4 }
  0x45   : > { %v765_v33 = vadd.f32 %v757_v15, %v729_v27  ;;  %v788_v19 = vmul.f32 %v2147_v11, %v771_v13  ;;  %v789_v35 = vmul.f32 %v2147_v11, %v773_v22  ;;  %v790_v36 = vmul.f32 %v2147_v11, %v775_v24  ;;  %1781 = vmatprep.subr.mxu1 %v1897_v2  ;;  %v1047_v34 = vld [vmem:[%s2451_s5 + $0x58] sm:$0xff]  ;;  %v2233_v37 = vld [vmem:[%s2447_s1 + $0x8] ss:$0 sm:$0xff]  ;;  %v1046_v41 = vld [vmem:[%s2451_s5 + $0x50] sm:$0xff] }
  0x46   : > { %v791_v18 = vmul.f32 %v2147_v11, %v777_v25  ;;  %v792_v38 = vmul.f32 %v2147_v11, %v779_v31  ;;  %v793_v39 = vmul.f32 %v2147_v11, %v781_v32  ;;  %v875_v40 = vld [vmem:[#allocation2 + $0x32] ss:$2 sm:$0xff]  ;;  %1782 = vmatpush3.msra.mxu1 %v1048_v16  ;;  %v794_v42 = vadd.f32 %v786_v28, %v758_v20  ;;  %v877_v47 = vld [vmem:[#allocation2 + $0x62] ss:$2 sm:$0xff]  ;;  %v839_v8 = vld [vmem:[#allocation2 + $0x31] ss:$2 sm:$0xff] }
  0x47   : > { %v795_v43 = vadd.f32 %v787_v23, %v759_v21  ;;  %v803_v44 = vld [vmem:[#allocation2 + $0x30] ss:$2 sm:$0xff]  ;;  %v805_v45 = vld [vmem:[#allocation2 + $0x60] ss:$2 sm:$0xff]  ;;  %1783 = vmatprep.subr.mxu1 %v1897_v2  ;;  %v796_v50 = vadd.f32 %v788_v19, %v760_v26  ;;  %v797_v51 = vadd.f32 %v789_v35, %v761_v29  ;;  %v856_v53 = vsub.s32 7, %v2044_v4 }
  0x48   : > { %v807_v46 = vld [vmem:[#allocation2 + $0x90] ss:$2 sm:$0xff]  ;;  %v1045_v11 = vld [vmem:[%s2451_s5 + $0x48] sm:$0xff]  ;;  %1784 = vmatpush3.msra.mxu1 %v1047_v34  ;;  %v798_v56 = vadd.f32 %v790_v36, %v762_v30  ;;  %v799_v57 = vadd.f32 %v791_v18, %v763_v12  ;;  %v800_v58 = vadd.f32 %v792_v38, %v764_v17  ;;  %v801_v59 = vadd.f32 %v793_v39, %v765_v33  ;;  %v1044_v62 = vld [vmem:[%s2451_s5 + $0x40] sm:$0xff] }
  0x49   : > { %v879_v48 = vld [vmem:[#allocation2 + $0x92] ss:$2 sm:$0xff]  ;;  %v881_v49 = vld [vmem:[#allocation2 + $0xc2] ss:$2 sm:$0xff]  ;;  %1785 = vmatprep.subr.mxu1 %v1897_v2  ;;  %v821_v1 = vrot.slane %v2070_v10, %v820_v52  ;;  %v2252_v3 = vmul.f32 %v2233_v37, %v875_v40  ;;  %v2255_v5 = vmul.f32 %v2233_v37, %v877_v47  ;;  %v841_v9 = vld [vmem:[#allocation2 + $0x61] ss:$2 sm:$0xff]  ;;  %v857_v15 = vrot.slane %v2070_v10, %v856_v53 }
  0x4a   : > { %v883_v54 = vld [vmem:[#allocation2 + $0xf2] ss:$2 sm:$0xff]  ;;  %v885_v55 = vld [vmem:[#allocation2 + $0x122] ss:$2 sm:$0xff]  ;;  %v2258_v7 = vmul.f32 %v2233_v37, %v879_v48  ;;  %1786 = vmatpush3.msra.mxu1 %v1046_v41  ;;  %v843_v13 = vld [vmem:[#allocation2 + $0x91] ss:$2 sm:$0xff]  ;;  %v897_v20 = vmul.f32 %v2233_v37, %v881_v49 }
  0x4b   : > { %v809_v60 = vld [vmem:[#allocation2 + $0xc0] ss:$2 sm:$0xff]  ;;  %v811_v61 = vld [vmem:[#allocation2 + $0xf0] ss:$2 sm:$0xff]  ;;  %v845_v14 = vld [vmem:[#allocation2 + $0xc1] ss:$2 sm:$0xff]  ;;  %v898_v21 = vmul.f32 %v2233_v37, %v883_v54  ;;  %v899_v22 = vmul.f32 %v2233_v37, %v885_v55  ;;  %1787 = vmatprep.subr.mxu1 %v1897_v2  ;;  %v822_v25 = vmul.f32 %v821_v1, %v803_v44  ;;  %v823_v26 = vmul.f32 %v821_v1, %v805_v45 }
  0x4c   : > { %v813_v27 = vld [vmem:[#allocation2 + $0x120] ss:$2 sm:$0xff]  ;;  %v815_v63 = vld [vmem:[#allocation2 + $0x150] ss:$2 sm:$0xff]  ;;  %v824_v29 = vmul.f32 %v821_v1, %v807_v46  ;;  %v825_v30 = vmul.f32 %v821_v1, %v809_v60  ;;  %v847_v12 = vld [vmem:[#allocation2 + $0xf1] ss:$2 sm:$0xff]  ;;  %1788 = vmatpush3.msra.mxu1 %v1045_v11  ;;  %v826_v16 = vmul.f32 %v821_v1, %v811_v61  ;;  %v858_v45 = vmul.f32 %v857_v15, %v839_v8 }
  0x4d   : > { %v817_v0 = vld [vmem:[#allocation2 + $0x180] ss:$2 sm:$0xff]  ;;  %v1043_v24 = vld [vmem:[%s2451_s5 + $0x38] sm:$0xff]  ;;  %v849_v31 = vld [vmem:[#allocation2 + $0x121] ss:$2 sm:$0xff]  ;;  %v827_v17 = vmul.f32 %v821_v1, %v813_v27  ;;  %v828_v33 = vmul.f32 %v821_v1, %v815_v63  ;;  %1789 = vmatprep.subr.mxu1 %v1897_v2  ;;  %v830_v19 = vadd.f32 %v822_v25, %v794_v42  ;;  %v831_v35 = vadd.f32 %v823_v26, %v795_v43 }
  0x4e   : > { %v851_v32 = vld [vmem:[#allocation2 + $0x151] ss:$2 sm:$0xff]  ;;  %v853_v10 = vld [vmem:[#allocation2 + $0x181] ss:$2 sm:$0xff]  ;;  %v829_v28 = vmul.f32 %v821_v1, %v817_v0  ;;  %v832_v36 = vadd.f32 %v824_v29, %v796_v50  ;;  %v833_v18 = vadd.f32 %v825_v30, %v797_v51  ;;  %v887_v34 = vld [vmem:[#allocation2 + $0x152] ss:$2 sm:$0xff]  ;;  %1790 = vmatpush3.msra.mxu1 %v1044_v62  ;;  %v834_v38 = vadd.f32 %v826_v16, %v798_v56 }
  0x4f   : > { %v1042_v23 = vld [vmem:[%s2451_s5 + $0x30] sm:$0xff]  ;;  %v835_v39 = vadd.f32 %v827_v17, %v799_v57  ;;  %v836_v40 = vadd.f32 %v828_v33, %v800_v58  ;;  %1791 = vmatprep.subr.mxu1 %v1897_v2  ;;  %v1041_v44 = vld [vmem:[%s2451_s5 + $0x28] sm:$0xff]  ;;  %v859_v46 = vmul.f32 %v857_v15, %v841_v9  ;;  %v860_v47 = vmul.f32 %v857_v15, %v843_v13  ;;  %v1578_v51 = vld [vmem:[%s2448_s2] ss:$0 sm:$0xff] }
  0x50   : > { %v837_v41 = vadd.f32 %v829_v28, %v801_v59  ;;  %v861_v48 = vmul.f32 %v857_v15, %v845_v14  ;;  %v889_v42 = vld [vmem:[#allocation2 + $0x182] ss:$2 sm:$0xff]  ;;  %1792 = vmatpush3.msra.mxu1 %v1043_v24  ;;  %v862_v43 = vmul.f32 %v857_v15, %v847_v12  ;;  %v863_v49 = vmul.f32 %v857_v15, %v849_v31  ;;  %v1039_v13 = vld [vmem:[%s2451_s5 + $0x18] sm:$0xff] }
  0x51   : > { %v864_v11 = vmul.f32 %v857_v15, %v851_v32  ;;  %v865_v50 = vmul.f32 %v857_v15, %v853_v10  ;;  %1793 = vmatprep.subr.mxu1 %v1897_v2  ;;  %v1040_v52 = vld [vmem:[%s2451_s5 + $0x20] sm:$0xff]  ;;  %v866_v53 = vadd.f32 %v858_v45, %v830_v19  ;;  %v867_v54 = vadd.f32 %v859_v46, %v831_v35  ;;  %v1037_v45 = vld [vmem:[%s2451_s5 + $0x8] sm:$0xff] }
  0x52   : > { %v868_v55 = vadd.f32 %v860_v47, %v832_v36  ;;  %v869_v56 = vadd.f32 %v861_v48, %v833_v18  ;;  %1794 = vmatpush3.msra.mxu1 %v1042_v23  ;;  %v870_v57 = vadd.f32 %v862_v43, %v834_v38  ;;  %v871_v58 = vadd.f32 %v863_v49, %v835_v39  ;;  %v1036_v46 = vld [vmem:[%s2451_s5] sm:$0xff] }
  0x53   : > { %v872_v59 = vadd.f32 %v864_v11, %v836_v40  ;;  %v900_v60 = vmul.f32 %v2233_v37, %v887_v34  ;;  %1795 = vmatprep.subr.mxu1 %v1897_v2  ;;  %v902_v61 = vadd.f32 %v2252_v3, %v866_v53  ;;  %v903_v27 = vadd.f32 %v2255_v5, %v867_v54  ;;  %v964_v47 = vld [vmem:[%s2450_s4] sm:$0x1]  ;;  %v1868_v11 = vld [vmem:[%s2456_s10 + $0x38] sm:$0xff]   ;;  %v1872_v53 = vld [vmem:[%s2453_s7 + $0x30] sm:$0xff]  }
  0x54   : > { %v904_v62 = vadd.f32 %v2258_v7, %v868_v55  ;;  %v905_v63 = vadd.f32 %v897_v20, %v869_v56  ;;  %1796 = vmatpush3.msra.mxu1 %v1041_v44  ;;  %v873_v0 = vadd.f32 %v865_v50, %v837_v41  ;;  %v901_v1 = vmul.f32 %v2233_v37, %v889_v42  ;;  %v1038_v41 = vld [vmem:[%s2451_s5 + $0x10] sm:$0xff]  ;;  %v1888_v44 = vld [vmem:[#allocation2 + $0x198] sm:$0xff]  ;;  %v1873_v54 = vld [vmem:[%s2456_s10 + $0x20] sm:$0xff]  }
  0x55   : > { %v906_v8 = vadd.f32 %v898_v21, %v870_v57  ;;  %v907_v9 = vadd.f32 %v899_v22, %v871_v58  ;;  %1797 = vmatprep.subr.mxu1 %v1897_v2  ;;  %v2293_v14 = vadd.f32 %v1578_v51, %v902_v61  ;;  %v2295_v3 = vadd.f32 %v1578_v51, %v903_v27  ;;  %v1869_v50 = vld [vmem:[%s2456_s10 + $0x30] sm:$0xff]   ;;  %v1874_v55 = vld [vmem:[%s2453_s7 + $0x28] sm:$0xff]   ;;  %v1875_v56 = vld [vmem:[%s2456_s10 + $0x18] sm:$0xff]  }
  0x56   : > { %v2297_v5 = vadd.f32 %v1578_v51, %v904_v62  ;;  %v2299_v7 = vadd.f32 %v1578_v51, %v905_v63  ;;  %1798 = vmatpush3.msra.mxu1 %v1040_v52  ;;  %v908_v15 = vadd.f32 %v900_v60, %v872_v59  ;;  %v909_v24 = vadd.f32 %v901_v1, %v873_v0  ;;  %v1871_v52 = vld [vmem:[%s2456_s10 + $0x28] sm:$0xff]   ;;  %v1876_v57 = vld [vmem:[%s2453_s7 + $0x20] sm:$0xff]   ;;  %v1877_v58 = vld [vmem:[%s2456_s10 + $0x10] sm:$0xff]  }
  0x57   : > { %1799 = vmatprep.subr.mxu1 %v1897_v2  ;;  %v2302_v37 = vadd.f32 %v1578_v51, %v906_v8  ;;  %v925_v20 = vmax.f32 %v2293_v14, 0.0  ;;  %v926_v21 = vmax.f32 %v2295_v3, 0.0  ;;  %v2308_v25 = vadd.f32 %v1578_v51, %v907_v9  ;;  %v1878_v59 = vld [vmem:[%s2453_s7 + $0x18] sm:$0xff]   ;;  %v1879_v60 = vld [vmem:[%s2456_s10 + $0x8] sm:$0xff]   ;;  %v1880_v61 = vld [vmem:[%s2453_s7 + $0x10] sm:$0xff]  }
  0x58   : > { %v927_v22 = vmax.f32 %v2297_v5, 0.0  ;;  %1800 = vmatpush3.msra.mxu1 %v1039_v13  ;;  %v928_v26 = vmax.f32 %v2299_v7, 0.0  ;;  %v2315_v30 = vadd.f32 %v1578_v51, %v908_v15  ;;  %v2320_v32 = vadd.f32 %v1578_v51, %v909_v24  ;;  %v1870_v51 = vld [vmem:[%s2453_s7 + $0x38] sm:$0xff]   ;;  %v1881_v27 = vld [vmem:[%s2456_s10] sm:$0xff]   ;;  %v1882_v62 = vld [vmem:[%s2453_s7 + $0x8] sm:$0xff]  }
  0x59   : > { %1801 = vmatprep.subr.mxu1 %v1897_v2  ;;  %v933_v29 = vadd.f32 %v926_v21, %v925_v20  ;;  %v929_v12 = vmax.f32 %v2302_v37, 0.0  ;;  %v930_v2 = vmax.f32 %v2308_v25, 0.0  ;;  %1810 = vmatprep.subr.bf16.mxu0 %v1870_v51  ;;  %v1281_v63 = vld [vmem:[%s428_s17] sm:$0xff]  ;;  %v1282_v0 = vld [vmem:[%s428_s17 + $0x8] sm:$0xff]  ;;  %v1283_v8 = vld [vmem:[%s428_s17 + $0x10] sm:$0xff] }
  0x5a   : > { %v931_v16 = vmax.f32 %v2315_v30, 0.0  ;;  %v932_v33 = vmax.f32 %v2320_v32, 0.0  ;;  %1802 = vmatpush3.msra.mxu1 %v1038_v41  ;;  %v1289_v1 = vpack.c.bf16 %v1282_v0, %v1281_v63  ;;  %v1284_v9 = vld [vmem:[%s428_s17 + $0x18] sm:$0xff]  ;;  %v1883_v15 = vld [vmem:[%s2453_s7] sm:$0xff]  }
  0x5b   : > { %v934_v31 = vadd.f32 %v933_v29, %v927_v22  ;;  %1803 = vmatprep.subr.mxu1 %v1888_v44  ;;  %v1290_v13 = vpack.c.bf16 %v1284_v9, %v1283_v8  ;;  %v1285_v24 = vld [vmem:[%s428_s17 + $0x20] sm:$0xff]  ;;  %v1286_v29 = vld [vmem:[%s428_s17 + $0x28] sm:$0xff] }
  0x5c   : > { %1804 = vmatpush3.msra.mxu1 %v1037_v45 }
  0x5d   : > { %v935_v10 = vadd.f32 %v934_v31, %v928_v26  ;;  %1805 = vmatprep.subr.mxu1 %v1888_v44  ;;  %v1291_v31 = vpack.c.bf16 %v1286_v29, %v1285_v24 }
  0x5e   : > { %1806 = vmatpush3.msra.mxu1 %v1036_v46 }
  0x5f   : > { %v936_v17 = vadd.f32 %v935_v10, %v929_v12  ;;  %1834 = vmatprep.subr.bf16.mxu1 %v1868_v11  ;;  %v1287_v10 = vld [vmem:[%s428_s17 + $0x30] sm:$0xff] }
  0x61   : > { %v937_v28 = vadd.f32 %v936_v17, %v930_v2  ;;  %v1288_v17 = vld [vmem:[%s428_s17 + $0x38] sm:$0xff] }
  0x63   : > { %v938_v23 = vadd.f32 %v937_v28, %v931_v16  ;;  %v1292_v28 = vpack.c.bf16 %v1288_v17, %v1287_v10 }
  0x65   : > { %v939_v19 = vadd.f32 %v938_v23, %v932_v33  ;;  %v1052_v23 = vld [vmem:[%s2452_s6] sm:$0x1] }
  0x67   : > { %v940_v35 = vrot.slane %v939_v19, 4 }
  0x69   : > { %v941_v36 = vadd.f32 %v940_v35, %v939_v19 }
  0x6b   : > { %v942_v18 = vrot.slane %v941_v36, 2 }
  0x6d   : > { %v943_v34 = vadd.f32 %v942_v18, %v941_v36 }
  0x6f   : > { %v944_v38 = vrot.slane %v943_v34, 1 }
  0x71   : > { %v945_v39 = vadd.f32 %v944_v38, %v943_v34 }
  0x73   : > { %v947_v40 = vmul.f32 0.015625, %v945_v39 }
  0x75   : > { %1773 = vmatmul.mubr.f32.vlgmr.msra.gmra.mxu0 %v947_v40 }
  0x76   : > { %1811 = vmatpush3.bf16.msra.mxu0 %v1870_v51 }
  0x77   : > { %1812 = vmatprep.subr.bf16.mxu0 %v1872_v53 }
  0x7a   : > { %1813 = vmatpush3.bf16.msra.mxu0 %v1872_v53 }
  0x7b   : > { %1814 = vmatprep.subr.bf16.mxu0 %v1874_v55 }
  0x7e   : > { %1815 = vmatpush3.bf16.msra.mxu0 %v1874_v55 }
  0x7f   : > { %1816 = vmatprep.subr.bf16.mxu0 %v1876_v57 }
  0x82   : > { %1817 = vmatpush3.bf16.msra.mxu0 %v1876_v57 }
  0x83   : > { %1818 = vmatprep.subr.bf16.mxu0 %v1878_v59 }
  0x86   : > { %1819 = vmatpush3.bf16.msra.mxu0 %v1878_v59 }
  0x87   : > { %1820 = vmatprep.subr.bf16.mxu0 %v1880_v61 }
  0x8a   : > { %1821 = vmatpush3.bf16.msra.mxu0 %v1880_v61 }
  0x8b   : > { %1822 = vmatprep.subr.bf16.mxu0 %v1882_v62 }
  0x8e   : > { %1823 = vmatpush3.bf16.msra.mxu0 %v1882_v62 }
  0x8f   : > { %1824 = vmatprep.subr.bf16.mxu0 %v1883_v15 }
  0x92   : > { %1825 = vmatpush3.bf16.msra.mxu0 %v1883_v15 }
 0x135   : > { %v1031_v48 = vpop.f32.mrf.mxu0 }
 0x136   : > { %v1032_v42 = vadd.f32 %v1031_v48, %v964_v47 }
 0x137   : > { %v1774_v43 = vpop.f32.mrf.mxu0 }
 0x138   : > { %v1035_v49 = vmax.f32 %v1032_v42, 0.0 }
 0x13a   : > { %1808 = vmatmul.mubr.f32.vlgmr.msra.gmra.mxu1 %v1035_v49 }
 0x13b   : > { %1835 = vmatpush3.bf16.msra.mxu1 %v1868_v11  ;;  %1850 = vmatprep.mubr.bf16.mxu1 %v1289_v1 }
 0x13c   : > { %1836 = vmatprep.subr.bf16.mxu1 %v1869_v50 }
 0x13f   : > { %1837 = vmatpush3.bf16.msra.mxu1 %v1869_v50 }
 0x140   : > { %1838 = vmatprep.subr.bf16.mxu1 %v1871_v52 }
 0x143   : > { %1839 = vmatpush3.bf16.msra.mxu1 %v1871_v52 }
 0x144   : > { %1840 = vmatprep.subr.bf16.mxu1 %v1873_v54 }
 0x147   : > { %1841 = vmatpush3.bf16.msra.mxu1 %v1873_v54 }
 0x148   : > { %1842 = vmatprep.subr.bf16.mxu1 %v1875_v56 }
 0x14b   : > { %1843 = vmatpush3.bf16.msra.mxu1 %v1875_v56 }
 0x14c   : > { %1844 = vmatprep.subr.bf16.mxu1 %v1877_v58 }
 0x14f   : > { %1845 = vmatpush3.bf16.msra.mxu1 %v1877_v58 }
 0x150   : > { %1846 = vmatprep.subr.bf16.mxu1 %v1879_v60 }
 0x153   : > { %1847 = vmatpush3.bf16.msra.mxu1 %v1879_v60 }
 0x154   : > { %1848 = vmatprep.subr.bf16.mxu1 %v1881_v27 }
 0x157   : > { %1849 = vmatpush3.bf16.msra.mxu1 %v1881_v27 }
 0x15a   : > { %1851 = vmatmul.mubr.bf16.vlgmr.msra.gmra.mxu1 %v1290_v13 }
 0x15b   : > { %1854 = vmatprep.mubr.bf16.mxu1 %v1291_v31 }
 0x162   : > { %1855 = vmatmul.mubr.bf16.gmra.mxu1 %v1292_v28 }
 0x1fa   : > { %v1119_v19 = vpop.f32.mrf.mxu1 }
 0x1fb   : > { %v1120_v35 = vadd.f32 %v1119_v19, %v1052_v23 }
 0x1fc   : > { %v1809_v36 = vpop.f32.mrf.mxu1 }
 0x1fd   : > { %v1579_v18 = vmul.f32 -1.442695, %v1120_v35 }
 0x1ff   : > { %1884 = vpow2.f32 %v1579_v18 }
 0x20c   : > { %v1885_v34 = vpop.eup %1884 }
 0x20d   : > { %v1126_v38 = vadd.f32 1.0, %v1885_v34 }
 0x20f   : > { %1886 = vrcp.f32 %v1126_v38 }
 0x21a   : > { %v1852_v37 = vpop.f32.mrf.mxu1 }
 0x21c   : > { %v1887_v39 = vpop.eup %1886 }
 0x21d   : > { %v1132_v40 = vrot.slane %v1887_v39, %v605_v6 }
 0x21f   : > { %v1133_v41 = vmul.f32 %v1132_v40, %v925_v20  ;;  %v1134_v44 = vmul.f32 %v1132_v40, %v926_v21  ;;  %v1135_v45 = vmul.f32 %v1132_v40, %v927_v22  ;;  %v1136_v46 = vmul.f32 %v1132_v40, %v928_v26  ;;  %v1398_v20 = vpop.f32.mrf.mxu1  ;;  %v1589_v22 = vld [vmem:[%s2457_s11] ss:$0 sm:$0xff] }
 0x220   : > { %v1137_v47 = vmul.f32 %v1132_v40, %v929_v12  ;;  %v1138_v48 = vmul.f32 %v1132_v40, %v930_v2  ;;  %v1139_v3 = vmul.f32 %v1132_v40, %v931_v16  ;;  %v1140_v5 = vmul.f32 %v1132_v40, %v932_v33  ;;  %v1580_v26 = vld [vmem:[%s2454_s8] ss:$0 sm:$0xff] }
 0x221   : > { %v1141_v4 = vpack.c.bf16 %v1134_v44, %v1133_v41  ;;  %v1142_v6 = vpack.c.bf16 %v1136_v46, %v1135_v45  ;;  %v1853_v21 = vpop.f32.mrf.mxu1  ;;  %v1407_v30 = vadd.f32 %v1852_v37, %v1589_v22  ;;  %v1399_v33 = vadd.f32 %v1589_v22, %v1398_v20 }
 0x222   : > { %v1143_v14 = vpack.c.bf16 %v1138_v48, %v1137_v47  ;;  %v1144_v7 = vpack.c.bf16 %v1140_v5, %v1139_v3  ;;  %v1410_v50 = vadd.f32 %v1853_v21, %v1589_v22 }
 0x223   : > { %1826 = vmatprep.mubr.bf16.mxu0 %v1141_v4  ;;  %v1401_v25 = vpop.f32.mrf.mxu1 }
 0x224   : > { %1827 = vmatmul.mubr.bf16.vlgmr.msra.gmra.mxu0 %v1142_v6  ;;  %v1402_v54 = vadd.f32 %v1589_v22, %v1401_v25 }
 0x225   : > { %1830 = vmatprep.mubr.bf16.mxu0 %v1143_v14  ;;  %v1856_v2 = vpop.f32.mrf.mxu1 }
 0x226   : > { %v1423_v57 = vadd.f32 %v1856_v2, %v1589_v22 }
 0x227   : > { %v1414_v11 = vpop.f32.mrf.mxu1 }
 0x228   : > { %v1415_v1 = vadd.f32 %v1589_v22, %v1414_v11 }
 0x229   : > { %v1857_v60 = vpop.f32.mrf.mxu1 }
 0x22a   : > { %v1426_v29 = vadd.f32 %v1857_v60, %v1589_v22 }
 0x22b   : > { %v1417_v15 = vpop.f32.mrf.mxu1 }
 0x22c   : > { %1831 = vmatmul.mubr.bf16.gmra.mxu0 %v1144_v7  ;;  %v1418_v23 = vadd.f32 %v1589_v22, %v1417_v15 }
 0x2e4   : > { %v1828_v12 = vpop.f32.mrf.mxu0 }
 0x2e5   : > { %v1259_v32 = vadd.f32 %v1828_v12, %v1580_v26 }
 0x2e6   : > { %v1250_v16 = vpop.f32.mrf.mxu0 }
 0x2e7   : > { %v1431_v42 = vadd.f32 %v1407_v30, %v1259_v32  ;;  %v1251_v43 = vadd.f32 %v1580_v26, %v1250_v16 }
 0x2e8   : > { %v1829_v49 = vpop.f32.mrf.mxu0 }
 0x2e9   : > { %v1439_v51 = vmax.f32 %v1431_v42, 0.0  ;;  %v1429_v52 = vadd.f32 %v1399_v33, %v1251_v43  ;;  %v1262_v53 = vadd.f32 %v1829_v49, %v1580_v26 }
 0x2ea   : > { %v1253_v55 = vpop.f32.mrf.mxu0 }
 0x2eb   : > { %1447 = vst [vmem:[%s2433_s15 + $0x10] sm:$0xff] %v1439_v51  ;;  %v1437_v56 = vmax.f32 %v1429_v52, 0.0  ;;  %v1432_v58 = vadd.f32 %v1410_v50, %v1262_v53  ;;  %v1254_v59 = vadd.f32 %v1580_v26, %v1253_v55 }
 0x2ec   : > { %v1832_v61 = vpop.f32.mrf.mxu0 }
 0x2ed   : > { %1445 = vst [vmem:[%s2433_s15] sm:$0xff] %v1437_v56  ;;  %v1440_v27 = vmax.f32 %v1432_v58, 0.0  ;;  %v1430_v62 = vadd.f32 %v1402_v54, %v1254_v59  ;;  %v1275_v63 = vadd.f32 %v1832_v61, %v1580_v26 }
 0x2ee   : > { %v1266_v0 = vpop.f32.mrf.mxu0 }
 0x2ef   : > { %1448 = vst [vmem:[%s2433_s15 + $0x18] sm:$0xff] %v1440_v27  ;;  %v1438_v8 = vmax.f32 %v1430_v62, 0.0  ;;  %v1435_v9 = vadd.f32 %v1423_v57, %v1275_v63  ;;  %v1267_v13 = vadd.f32 %v1580_v26, %v1266_v0 }
 0x2f0   : > { %v1833_v24 = vpop.f32.mrf.mxu0 }
 0x2f1   : > { %1446 = vst [vmem:[%s2433_s15 + $0x8] sm:$0xff] %v1438_v8  ;;  %v1443_v31 = vmax.f32 %v1435_v9, 0.0  ;;  %v1433_v10 = vadd.f32 %v1415_v1, %v1267_v13  ;;  %v1278_v17 = vadd.f32 %v1833_v24, %v1580_v26 }
 0x2f2   : > { %v1269_v28 = vpop.f32.mrf.mxu0 }
 0x2f3   : > { %1451 = vst [vmem:[%s2433_s15 + $0x30] sm:$0xff] %v1443_v31  ;;  %v1441_v19 = vmax.f32 %v1433_v10, 0.0  ;;  %v1436_v35 = vadd.f32 %v1426_v29, %v1278_v17  ;;  %v1270_v36 = vadd.f32 %v1580_v26, %v1269_v28 }
 0x2f5   : > { %1449 = vst [vmem:[%s2433_s15 + $0x20] sm:$0xff] %v1441_v19  ;;  %v1444_v18 = vmax.f32 %v1436_v35, 0.0  ;;  %v1434_v34 = vadd.f32 %v1418_v23, %v1270_v36 }
 0x2f7   : > { %1452 = vst [vmem:[%s2433_s15 + $0x38] sm:$0xff] %v1444_v18  ;;  %v1442_v38 = vmax.f32 %v1434_v34, 0.0 }
 0x2f9   : > { %1450 = vst [vmem:[%s2433_s15 + $0x28] sm:$0xff] %v1442_v38 }
 0x2fa PF: > { %s22_s21 = sadd.s32 1, %s1895_s21  }
 0x2fb   : > { %p19_p4 = scmp.ge.s32.totalorder %s22_s21, 4  }
 0x2fd   :  { %21 = sbr.rel (!%p19_p4) target bundleno = 1 (0x1), region = 172 }

// kernel: _lambda_.7
= control target key start
LH: loop header
LB: loop body
LE: loop exit
PB: predicated region body
PF: predicated region fallthrough
CT: control target
= control target key end

     0   :  { %s1425_s13 = smov 0   ;;  %s1933_s0 = inlined_call_operand.vmem [shape: bf16[2,8,8,128], index: 0, kind: input, shape index: {}]   ;;  %s1934_s1 = inlined_call_operand.vmem [shape: f32[9,128], index: 1, kind: input, shape index: {}]   ;;  %s1935_s2 = inlined_call_operand.vmem [shape: f32[1,128], index: 2, kind: input, shape index: {}]   ;;  %s1936_s3 = inlined_call_operand.vmem [shape: f32[128,128], index: 3, kind: input, shape index: {}]   ;;  %s1937_s4 = inlined_call_operand.vmem [shape: f32[1,128], index: 4, kind: input, shape index: {}]   ;;  %s1938_s5 = inlined_call_operand.vmem [shape: f32[128,128], index: 5, kind: input, shape index: {}]   ;;  %s1939_s6 = inlined_call_operand.vmem [shape: f32[1,128], index: 6, kind: input, shape index: {}]   ;;  %s1940_s7 = inlined_call_operand.vmem [shape: bf16[128,128], index: 7, kind: input, shape index: {}]   ;;  %s1941_s8 = inlined_call_operand.vmem [shape: f32[1,128], index: 8, kind: input, shape index: {}]   ;;  %s1942_s9 = inlined_call_operand.vmem [shape: f32[2,8,8,128], index: 9, kind: input, shape index: {}]   ;;  %s1943_s10 = inlined_call_operand.vmem [shape: f32[2,8,8,128], index: 10, kind: output, shape index: {}]  }
   0x1 LB: > { %s1151_s14 = sadd.s32 4294967295, %s1366_s13   ;;  %p1155_p0 = scmp.ge.s32.totalorder %s1366_s13, 1  ;;  %s1366_s13 = sphi %s1425_s13, %s20_s13  }
   0x2   : > { %p322_p1 = scmp.lt.s32.totalorder %s1366_s13, 3 }
   0x4   : > { %p323_p2 = pnand %p1155_p0, %p322_p1 }
   0x5   : > { %p1438_p3 = scmp.lt.s32.totalorder (!%p323_p2), %s1151_s14, 1 }
   0x6   : > { %326 = sbr.rel (%p323_p2) target bundleno = 736 (0x2e0), region = 60 }
   0xb   : > { %v734_v0 = vld [vmem:[%s1936_s3 + $0x78] sm:$0xff]  ;;  %v436_v1 = vlaneseq  ;;  %v1368_v2 = vmov 0.0   ;;  %v733_v3 = vld [vmem:[%s1936_s3 + $0x70] sm:$0xff]  ;;  %vm1369_vm0 = vmmov 0   ;;  %s1949_s14 = smov (!%p1438_p3, %s1151_s14), 1  ;;  %v732_v5 = vld [vmem:[%s1936_s3 + $0x68] sm:$0xff] }
   0xc   : > { %1244 = vmatprep.subr.mxu1 %v1368_v2  ;;  %381 = vst [vmem:[#allocation2] sm:$0xff] %v1368_v2  ;;  %382 = vst [vmem:[#allocation2 + $0x8] sm:$0x3] %v1368_v2  ;;  %1276 = vmatprep.mubr.msk.f32.mxu1 %vm1369_vm0, %v1368_v2  ;;  %s1176_s22 = sshll.u32 %s1949_s14, 5  ;;  %v731_v8 = vld [vmem:[%s1936_s3 + $0x60] sm:$0xff]  ;;  %v730_v17 = vld [vmem:[%s1936_s3 + $0x58] sm:$0xff] }
   0xd   : > { %383 = vst [vmem:[#allocation2 + $0x10] sm:$0xff] %v1368_v2  ;;  %384 = vst [vmem:[#allocation2 + $0x18] sm:$0x3] %v1368_v2  ;;  %1245 = vmatpush3.msra.mxu1 %v734_v0  ;;  %v1474_v4 = vshrl.u32 %v436_v1, 7  ;;  %s369_s27 = scalar_lea.vmem %s1933_s0, %s1176_s22  ;;  %v1493_v9 = vld [vmem:[%s1934_s1] sm:$0xff]  ;;  %v729_v28 = vld [vmem:[%s1936_s3 + $0x50] sm:$0xff] }
   0xe   : > { %385 = vst [vmem:[#allocation2 + $0x20] sm:$0xff] %v1368_v2  ;;  %386 = vst [vmem:[#allocation2 + $0x28] sm:$0x3] %v1368_v2  ;;  %1246 = vmatprep.subr.mxu1 %v1368_v2  ;;  %v1180_v10 = vld [vmem:[%s369_s27] sm:$0xff]   ;;  %v1195_v11 = vld [vmem:[%s369_s27 + $0x8] sm:$0xff]   ;;  %s1177_s20 = sshll.u32 %s1949_s14, 6 }
   0xf   : > { %387 = vst [vmem:[#allocation2 + $0x30] sm:$0xff] %v1368_v2  ;;  %388 = vst [vmem:[#allocation2 + $0x38] sm:$0x3] %v1368_v2  ;;  %1247 = vmatpush3.msra.mxu1 %v733_v3  ;;  %v1944_v6 = vsub.s32 0, %v1474_v4  ;;  %v466_v7 = vsub.s32 1, %v1474_v4  ;;  %v1196_v12 = vld [vmem:[%s369_s27 + $0x10] sm:$0xff]   ;;  %v1181_v18 = vunpack.c.l.bf16 %v1180_v10  ;;  %v1507_v19 = vunpack.c.h.bf16 %v1180_v10  ;;  %s1904_s23 = scalar_lea.vmem %s1942_s9, %s1177_s20 }
  0x10   : > { %389 = vst [vmem:[#allocation2 + $0x40] sm:$0xff] %v1368_v2  ;;  %390 = vst [vmem:[#allocation2 + $0x48] sm:$0x3] %v1368_v2  ;;  %1248 = vmatprep.subr.mxu1 %v1368_v2  ;;  %v494_v15 = vsub.s32 2, %v1474_v4  ;;  %v550_v16 = vsub.s32 4, %v1474_v4  ;;  %v1509_v20 = vunpack.c.l.bf16 %v1195_v11  ;;  %v1511_v21 = vunpack.c.h.bf16 %v1195_v11  ;;  %v1197_v22 = vld [vmem:[%s369_s27 + $0x18] sm:$0xff]   ;;  %s1914_s27 = scalar_lea.vmem %s1943_s10, %s1177_s20 }
  0x11   : > { %391 = vst [vmem:[#allocation2 + $0x50] sm:$0xff] %v1368_v2  ;;  %392 = vst [vmem:[#allocation2 + $0x58] sm:$0x3] %v1368_v2  ;;  %1249 = vmatpush3.msra.mxu1 %v732_v5  ;;  %v1498_v13 = vrot.slane %v1493_v9, %v1944_v6  ;;  %v467_v14 = vrot.slane %v1493_v9, %v466_v7  ;;  %v1513_v23 = vunpack.c.l.bf16 %v1196_v12  ;;  %v1515_v24 = vunpack.c.h.bf16 %v1196_v12  ;;  %v728_v34 = vld [vmem:[%s1936_s3 + $0x48] sm:$0xff]  ;;  %v727_v43 = vld [vmem:[%s1936_s3 + $0x40] sm:$0xff] }
  0x12   : > { %393 = vst [vmem:[#allocation2 + $0x60] sm:$0xff] %v1368_v2  ;;  %394 = vst [vmem:[#allocation2 + $0x68] sm:$0x3] %v1368_v2  ;;  %1250 = vmatprep.subr.mxu1 %v1368_v2  ;;  %v1517_v25 = vunpack.c.l.bf16 %v1197_v22  ;;  %v1519_v26 = vunpack.c.h.bf16 %v1197_v22  ;;  %v522_v31 = vsub.s32 3, %v1474_v4  ;;  %v578_v33 = vsub.s32 5, %v1474_v4  ;;  %v726_v44 = vld [vmem:[%s1936_s3 + $0x38] sm:$0xff] }
  0x13   : > { %395 = vst [vmem:[#allocation2 + $0x70] sm:$0xff] %v1368_v2  ;;  %396 = vst [vmem:[#allocation2 + $0x78] sm:$0x3] %v1368_v2  ;;  %1251 = vmatpush3.msra.mxu1 %v731_v8  ;;  %v456_v27 = vld [vmem:[#allocation2 + $0x1] sm:$0xff]  ;;  %v440_v29 = vmul.f32 0.0, %v1498_v13  ;;  %v469_v35 = vmul.f32 %v1181_v18, %v467_v14  ;;  %v470_v36 = vmul.f32 %v1507_v19, %v467_v14  ;;  %v607_v47 = vsub.s32 6, %v1474_v4 }
  0x14   : > { %397 = vst [vmem:[#allocation2 + $0x80] sm:$0xff] %v1368_v2  ;;  %398 = vst [vmem:[#allocation2 + $0x88] sm:$0x3] %v1368_v2  ;;  %1252 = vmatprep.subr.mxu1 %v1368_v2  ;;  %v468_v30 = vmul.f32 %v467_v14, %v456_v27  ;;  %v484_v32 = vld [vmem:[#allocation2 + $0x2] sm:$0xff]  ;;  %v1541_v38 = vrot.slane %v1493_v9, %v494_v15  ;;  %v471_v39 = vmul.f32 %v1509_v20, %v467_v14  ;;  %v725_v53 = vld [vmem:[%s1936_s3 + $0x30] sm:$0xff] }
  0x15   : > { %399 = vst [vmem:[#allocation2 + $0x90] sm:$0xff] %v1368_v2  ;;  %400 = vst [vmem:[#allocation2 + $0x98] sm:$0x3] %v1368_v2  ;;  %1253 = vmatpush3.msra.mxu1 %v730_v17  ;;  %v472_v40 = vmul.f32 %v1511_v21, %v467_v14  ;;  %v473_v41 = vmul.f32 %v1513_v23, %v467_v14  ;;  %v551_v42 = vrot.slane %v1493_v9, %v550_v16  ;;  %v724_v1 = vld [vmem:[%s1936_s3 + $0x28] sm:$0xff] }
  0x16   : > { %418 = vst [vmem:[#allocation2 + $0x11] sm:$0xff] %v1181_v18  ;;  %419 = vst [vmem:[#allocation2 + $0x21] sm:$0xff] %v1507_v19  ;;  %1254 = vmatprep.subr.mxu1 %v1368_v2  ;;  %v476_v37 = vadd.f32 %v468_v30, %v440_v29  ;;  %v496_v45 = vmul.f32 %v1541_v38, %v484_v32  ;;  %v1556_v46 = vrot.slane %v1493_v9, %v522_v31 }
  0x17   : > { %420 = vst [vmem:[#allocation2 + $0x31] sm:$0xff] %v1509_v20  ;;  %421 = vst [vmem:[#allocation2 + $0x41] sm:$0xff] %v1511_v21  ;;  %1255 = vmatpush3.msra.mxu1 %v729_v28  ;;  %v474_v49 = vmul.f32 %v1515_v24, %v467_v14  ;;  %v475_v50 = vmul.f32 %v1517_v25, %v467_v14  ;;  %v1562_v51 = vmul.f32 %v1181_v18, %v551_v42 }
  0x18   : > { %422 = vst [vmem:[#allocation2 + $0x51] sm:$0xff] %v1513_v23  ;;  %423 = vst [vmem:[#allocation2 + $0x61] sm:$0xff] %v1515_v24  ;;  %1256 = vmatprep.subr.mxu1 %v1368_v2  ;;  %v1565_v52 = vrot.slane %v1493_v9, %v578_v33  ;;  %v1571_v54 = vadd.f32 %v496_v45, %v476_v37  ;;  %v1574_v55 = vmul.f32 %v1507_v19, %v551_v42  ;;  %v723_v37 = vld [vmem:[%s1936_s3 + $0x20] sm:$0xff] }
  0x19   : > { %424 = vst [vmem:[#allocation2 + $0x71] sm:$0xff] %v1517_v25  ;;  %425 = vst [vmem:[#allocation2 + $0x81] sm:$0xff] %v1519_v26  ;;  %1257 = vmatpush3.msra.mxu1 %v728_v34  ;;  %v1577_v56 = vmul.f32 %v1509_v20, %v551_v42  ;;  %v1580_v57 = vmul.f32 %v1511_v21, %v551_v42  ;;  %v1587_v61 = vmul.f32 %v1513_v23, %v551_v42 }
  0x1a   : > { %1258 = vmatprep.subr.mxu1 %v1368_v2  ;;  %v1590_v62 = vmul.f32 %v1515_v24, %v551_v42  ;;  %v1593_v63 = vmul.f32 %v1517_v25, %v551_v42  ;;  %v1596_v0 = vmul.f32 %v1519_v26, %v551_v42 }
  0x1b   : > { %1259 = vmatpush3.msra.mxu1 %v727_v43 }
  0x1c   : > { %1260 = vmatprep.subr.mxu1 %v1368_v2 }
  0x1d   : > { %v429_v58 = vld [vmem:[#allocation2 + $0x10] sm:$0xff]  ;;  %v1582_v59 = vld [vmem:[#allocation2 + $0x20] sm:$0xff]  ;;  %1261 = vmatpush3.msra.mxu1 %v726_v44 }
  0x1e   : > { %v1584_v60 = vld [vmem:[#allocation2 + $0x30] sm:$0xff]  ;;  %v1602_v3 = vld [vmem:[#allocation2 + $0x40] sm:$0xff]  ;;  %v441_v8 = vmul.f32 %v1498_v13, %v429_v58  ;;  %v442_v10 = vmul.f32 %v1498_v13, %v1582_v59  ;;  %v524_v12 = vmul.f32 %v1556_v46, %v429_v58  ;;  %v525_v27 = vmul.f32 %v1556_v46, %v1582_v59  ;;  %1262 = vmatprep.subr.mxu1 %v1368_v2 }
  0x1f   : > { %v1604_v5 = vld [vmem:[#allocation2 + $0x50] sm:$0xff]  ;;  %v1606_v7 = vld [vmem:[#allocation2 + $0x60] sm:$0xff]  ;;  %v443_v11 = vmul.f32 %v1498_v13, %v1584_v60  ;;  %v444_v15 = vmul.f32 %v1498_v13, %v1602_v3  ;;  %1263 = vmatpush3.msra.mxu1 %v725_v53  ;;  %v527_v48 = vmul.f32 %v1556_v46, %v1602_v3 }
  0x20   : > { %v1614_v14 = vld [vmem:[#allocation2 + $0x70] sm:$0xff]  ;;  %v445_v16 = vmul.f32 %v1498_v13, %v1604_v5  ;;  %v446_v17 = vmul.f32 %v1498_v13, %v1606_v7  ;;  %v1624_v22 = vld [vmem:[#allocation2 + $0x22] sm:$0xff]  ;;  %v477_v29 = vadd.f32 %v469_v35, %v441_v8  ;;  %v478_v30 = vadd.f32 %v470_v36, %v442_v10  ;;  %1264 = vmatprep.subr.mxu1 %v1368_v2  ;;  %v722_v36 = vld [vmem:[%s1936_s3 + $0x18] sm:$0xff] }
  0x21   : > { %v1622_v18 = vld [vmem:[#allocation2 + $0x12] sm:$0xff]  ;;  %v447_v28 = vmul.f32 %v1498_v13, %v1614_v14  ;;  %v479_v31 = vadd.f32 %v471_v39, %v443_v11  ;;  %v1633_v33 = vld [vmem:[#allocation2 + $0x42] sm:$0xff]  ;;  %v480_v42 = vadd.f32 %v472_v40, %v444_v15  ;;  %v498_v53 = vmul.f32 %v1541_v38, %v1624_v22  ;;  %1265 = vmatpush3.msra.mxu1 %v724_v1 }
  0x22   : > { %v1631_v32 = vld [vmem:[#allocation2 + $0x32] sm:$0xff]  ;;  %v481_v43 = vadd.f32 %v473_v41, %v445_v16  ;;  %v482_v44 = vadd.f32 %v474_v49, %v446_v17  ;;  %v1640_v45 = vld [vmem:[#allocation2 + $0x62] sm:$0xff]  ;;  %v497_v35 = vmul.f32 %v1541_v38, %v1622_v18  ;;  %v500_v41 = vmul.f32 %v1541_v38, %v1633_v33  ;;  %1266 = vmatprep.subr.mxu1 %v1368_v2 }
  0x23   : > { %v1635_v34 = vld [vmem:[#allocation2 + $0x52] sm:$0xff]  ;;  %v483_v39 = vadd.f32 %v475_v50, %v447_v28  ;;  %v499_v40 = vmul.f32 %v1541_v38, %v1631_v32  ;;  %v1656_v49 = vld [vmem:[#allocation2 + $0x80] sm:$0xff]  ;;  %v502_v8 = vmul.f32 %v1541_v38, %v1640_v45  ;;  %v506_v11 = vadd.f32 %v498_v53, %v478_v30  ;;  %1267 = vmatpush3.msra.mxu1 %v723_v37 }
  0x24   : > { %v1642_v13 = vld [vmem:[#allocation2 + $0x72] sm:$0xff]  ;;  %v501_v58 = vmul.f32 %v1541_v38, %v1635_v34  ;;  %v505_v10 = vadd.f32 %v497_v35, %v477_v29  ;;  %v508_v16 = vadd.f32 %v500_v41, %v480_v42  ;;  %v526_v17 = vmul.f32 %v1556_v46, %v1584_v60  ;;  %1268 = vmatprep.subr.mxu1 %v1368_v2 }
  0x25   : > { %v503_v50 = vmul.f32 %v1541_v38, %v1642_v13  ;;  %v507_v15 = vadd.f32 %v499_v40, %v479_v31  ;;  %v510_v28 = vadd.f32 %v502_v8, %v482_v44  ;;  %v721_v38 = vld [vmem:[%s1936_s3 + $0x10] sm:$0xff]  ;;  %v528_v29 = vmul.f32 %v1556_v46, %v1604_v5  ;;  %1269 = vmatpush3.msra.mxu1 %v722_v36 }
  0x26   : > { %v509_v1 = vadd.f32 %v501_v58, %v481_v43  ;;  %v529_v30 = vmul.f32 %v1556_v46, %v1606_v7  ;;  %v530_v31 = vmul.f32 %v1556_v46, %v1614_v14  ;;  %v531_v37 = vmul.f32 %v1556_v46, %v1656_v49  ;;  %1270 = vmatprep.subr.mxu1 %v1368_v2 }
  0x27   : > { %v511_v6 = vadd.f32 %v503_v50, %v483_v39  ;;  %v532_v42 = vadd.f32 %v524_v12, %v1571_v54  ;;  %v533_v43 = vadd.f32 %v525_v27, %v505_v10  ;;  %v534_v44 = vadd.f32 %v526_v17, %v506_v11  ;;  %v720_v39 = vld [vmem:[%s1936_s3 + $0x8] sm:$0xff]  ;;  %1271 = vmatpush3.msra.mxu1 %v721_v38  ;;  %v719_v27 = vld [vmem:[%s1936_s3] sm:$0xff] }
  0x28   : > { %v535_v35 = vadd.f32 %v527_v48, %v507_v15  ;;  %v536_v53 = vadd.f32 %v528_v29, %v508_v16  ;;  %v537_v40 = vadd.f32 %v529_v30, %v509_v1  ;;  %v538_v41 = vadd.f32 %v530_v31, %v510_v28  ;;  %1272 = vmatprep.subr.mxu1 %v1368_v2 }
  0x29   : > { %v608_v58 = vrot.slane %v1493_v9, %v607_v47  ;;  %v560_v46 = vadd.f32 %v1562_v51, %v532_v42  ;;  %v561_v54 = vadd.f32 %v1574_v55, %v533_v43  ;;  %v562_v48 = vadd.f32 %v1577_v56, %v534_v44  ;;  %1273 = vmatpush3.msra.mxu1 %v720_v39  ;;  %v575_v55 = vld [vmem:[#allocation2 + $0x82] sm:$0xff] }
  0x2a   : > { %v563_v12 = vadd.f32 %v1580_v57, %v535_v35  ;;  %v539_v36 = vadd.f32 %v531_v37, %v511_v6  ;;  %v564_v8 = vadd.f32 %v1587_v61, %v536_v53  ;;  %v565_v47 = vadd.f32 %v1590_v62, %v537_v40  ;;  %1274 = vmatprep.subr.mxu1 %v1368_v2 }
  0x2b   : > { %v1946_v50 = vsub.s32 7, %v1474_v4  ;;  %v580_v56 = vmul.f32 %v1565_v52, %v1622_v18  ;;  %v581_v57 = vmul.f32 %v1565_v52, %v1624_v22  ;;  %v582_v10 = vmul.f32 %v1565_v52, %v1631_v32  ;;  %1275 = vmatpush3.msra.mxu1 %v719_v27 }
  0x2c   : > { %v583_v6 = vmul.f32 %v1565_v52, %v1633_v33  ;;  %v566_v61 = vadd.f32 %v1593_v63, %v538_v41  ;;  %v585_v62 = vmul.f32 %v1565_v52, %v1640_v45  ;;  %v586_v18 = vmul.f32 %v1565_v52, %v1642_v13  ;;  %1279 = vmatprep.subr.mxu1 %v1368_v2 }
  0x2d   : > { %v636_v51 = vrot.slane %v1493_v9, %v1946_v50  ;;  %v584_v9 = vmul.f32 %v1565_v52, %v1635_v34  ;;  %v588_v11 = vadd.f32 %v580_v56, %v560_v46  ;;  %v589_v15 = vadd.f32 %v581_v57, %v561_v54 }
  0x2e   : > { %v590_v16 = vadd.f32 %v582_v10, %v562_v48  ;;  %v591_v17 = vadd.f32 %v583_v6, %v563_v12  ;;  %v567_v1 = vadd.f32 %v1596_v0, %v539_v36  ;;  %v587_v28 = vmul.f32 %v1565_v52, %v575_v55 }
  0x2f   : > { %v592_v38 = vadd.f32 %v584_v9, %v564_v8  ;;  %v593_v63 = vadd.f32 %v585_v62, %v565_v47  ;;  %v609_v29 = vmul.f32 %v608_v58, %v1582_v59  ;;  %v610_v30 = vmul.f32 %v608_v58, %v1584_v60  ;;  %v632_v60 = vld [vmem:[#allocation2 + $0x91] sm:$0xff] }
  0x30   : > { %v611_v31 = vmul.f32 %v608_v58, %v1602_v3  ;;  %v612_v37 = vmul.f32 %v608_v58, %v1604_v5  ;;  %v594_v42 = vadd.f32 %v586_v18, %v566_v61  ;;  %v613_v43 = vmul.f32 %v608_v58, %v1606_v7 }
  0x31   : > { %v614_v44 = vmul.f32 %v608_v58, %v1614_v14  ;;  %v615_v0 = vmul.f32 %v608_v58, %v1656_v49  ;;  %v617_v52 = vadd.f32 %v609_v29, %v588_v11  ;;  %v618_v35 = vadd.f32 %v610_v30, %v589_v15  ;;  %v1162_v14 = vld [vmem:[%s1934_s1 + $0x8] ss:$0 sm:$0xff] }
  0x32   : > { %v619_v39 = vadd.f32 %v611_v31, %v590_v16  ;;  %v620_v53 = vadd.f32 %v612_v37, %v591_v17  ;;  %v595_v40 = vadd.f32 %v587_v28, %v567_v1  ;;  %v616_v41 = vmul.f32 0.0, %v608_v58 }
  0x33   : > { %v621_v59 = vadd.f32 %v613_v43, %v592_v38  ;;  %v622_v46 = vadd.f32 %v614_v44, %v593_v63  ;;  %v637_v3 = vmul.f32 %v1507_v19, %v636_v51  ;;  %v638_v5 = vmul.f32 %v1509_v20, %v636_v51 }
  0x34   : > { %v639_v54 = vmul.f32 %v1511_v21, %v636_v51  ;;  %v640_v7 = vmul.f32 %v1513_v23, %v636_v51  ;;  %v623_v49 = vadd.f32 %v615_v0, %v594_v42  ;;  %v641_v48 = vmul.f32 %v1515_v24, %v636_v51  ;;  %v660_v23 = vld [vmem:[#allocation2 + $0x92] sm:$0xff] }
  0x35   : > { %v642_v58 = vmul.f32 %v1517_v25, %v636_v51  ;;  %v643_v12 = vmul.f32 %v1519_v26, %v636_v51  ;;  %v645_v27 = vadd.f32 %v637_v3, %v617_v52  ;;  %v646_v36 = vadd.f32 %v638_v5, %v618_v35 }
  0x36   : > { %v647_v19 = vadd.f32 %v639_v54, %v619_v39  ;;  %v648_v8 = vadd.f32 %v640_v7, %v620_v53  ;;  %v624_v20 = vadd.f32 %v616_v41, %v595_v40  ;;  %v644_v47 = vmul.f32 %v636_v51, %v632_v60  ;;  %v1163_v51 = vld [vmem:[%s1935_s2] ss:$0 sm:$0xff] }
  0x37   : > { %v649_v21 = vadd.f32 %v641_v48, %v621_v59  ;;  %v650_v50 = vadd.f32 %v642_v58, %v622_v46  ;;  %v665_v56 = vmul.f32 %v1162_v14, %v1624_v22  ;;  %v666_v57 = vmul.f32 %v1162_v14, %v1631_v32  ;;  %v821_v48 = vld [vmem:[%s1938_s5 + $0x70] sm:$0xff]  ;;  %v820_v58 = vld [vmem:[%s1938_s5 + $0x68] sm:$0xff] }
  0x38   : > { %v667_v10 = vmul.f32 %v1162_v14, %v1633_v33  ;;  %v668_v24 = vmul.f32 %v1162_v14, %v1635_v34  ;;  %v651_v25 = vadd.f32 %v643_v12, %v623_v49  ;;  %v669_v26 = vmul.f32 %v1162_v14, %v1640_v45  ;;  %v822_v49 = vld [vmem:[%s1938_s5 + $0x78] sm:$0xff]  ;;  %v819_v12 = vld [vmem:[%s1938_s5 + $0x60] sm:$0xff] }
  0x39   : > { %v670_v6 = vmul.f32 %v1162_v14, %v1642_v13  ;;  %v671_v61 = vmul.f32 %v1162_v14, %v575_v55  ;;  %v673_v9 = vadd.f32 %v665_v56, %v645_v27  ;;  %v674_v62 = vadd.f32 %v666_v57, %v646_v36  ;;  %v818_v27 = vld [vmem:[%s1938_s5 + $0x58] sm:$0xff]  ;;  %v817_v36 = vld [vmem:[%s1938_s5 + $0x50] sm:$0xff]  ;;  %v808_v57 = vld [vmem:[%s1938_s5 + $0x8] sm:$0xff] }
  0x3a   : > { %v675_v18 = vadd.f32 %v667_v10, %v647_v19  ;;  %v676_v22 = vadd.f32 %v668_v24, %v648_v8  ;;  %v652_v11 = vadd.f32 %v644_v47, %v624_v20  ;;  %v672_v32 = vmul.f32 %v1162_v14, %v660_v23  ;;  %v816_v19 = vld [vmem:[%s1938_s5 + $0x48] sm:$0xff]  ;;  %v815_v8 = vld [vmem:[%s1938_s5 + $0x40] sm:$0xff]  ;;  %v814_v20 = vld [vmem:[%s1938_s5 + $0x38] sm:$0xff] }
  0x3b   : > { %v677_v15 = vadd.f32 %v669_v26, %v649_v21  ;;  %v678_v33 = vadd.f32 %v670_v6, %v650_v50  ;;  %v1747_v16 = vadd.f32 %v1163_v51, %v673_v9  ;;  %v1749_v34 = vadd.f32 %v1163_v51, %v674_v62  ;;  %v813_v47 = vld [vmem:[%s1938_s5 + $0x30] sm:$0xff]  ;;  %v812_v21 = vld [vmem:[%s1938_s5 + $0x28] sm:$0xff]  ;;  %v811_v50 = vld [vmem:[%s1938_s5 + $0x20] sm:$0xff] }
  0x3c   : > { %v1751_v45 = vadd.f32 %v1163_v51, %v675_v18  ;;  %v1753_v13 = vadd.f32 %v1163_v51, %v676_v22  ;;  %v679_v55 = vadd.f32 %v671_v61, %v651_v25  ;;  %v680_v63 = vadd.f32 %v672_v32, %v652_v11  ;;  %v810_v23 = vld [vmem:[%s1938_s5 + $0x18] sm:$0xff]  ;;  %v809_v56 = vld [vmem:[%s1938_s5 + $0x10] sm:$0xff]  ;;  %v807_v10 = vld [vmem:[%s1938_s5] sm:$0xff] }
  0x3d   : > { %v1755_v17 = vadd.f32 %v1163_v51, %v677_v15  ;;  %v696_v1 = vmax.f32 %v1747_v16, 0.0  ;;  %v697_v28 = vmax.f32 %v1749_v34, 0.0  ;;  %v1760_v29 = vadd.f32 %v1163_v51, %v678_v33  ;;  %v735_v24 = vld [vmem:[%s1937_s4] sm:$0x1]  ;;  %v1350_v9 = vld [vmem:[%s1940_s7 + $0x28] sm:$0xff]   ;;  %v1352_v18 = vld [vmem:[%s1940_s7 + $0x18] sm:$0xff]  }
  0x3e   : > { %v698_v38 = vmax.f32 %v1751_v45, 0.0  ;;  %v699_v30 = vmax.f32 %v1753_v13, 0.0  ;;  %v1767_v37 = vadd.f32 %v1163_v51, %v679_v55  ;;  %v1772_v44 = vadd.f32 %v1163_v51, %v680_v63  ;;  %v1348_v51 = vld [vmem:[%s1940_s7 + $0x38] sm:$0xff]   ;;  %v1351_v62 = vld [vmem:[%s1940_s7 + $0x20] sm:$0xff]   ;;  %v1353_v22 = vld [vmem:[%s1940_s7 + $0x10] sm:$0xff]  }
  0x3f   : > { %v704_v31 = vadd.f32 %v697_v28, %v696_v1  ;;  %v700_v42 = vmax.f32 %v1755_v17, 0.0  ;;  %v701_v0 = vmax.f32 %v1760_v29, 0.0  ;;  %1314 = vmatprep.subr.bf16.mxu0 %v1348_v51  ;;  %v1354_v11 = vld [vmem:[%s1940_s7 + $0x8] sm:$0xff]   ;;  %v1355_v32 = vld [vmem:[%s1940_s7] sm:$0xff]  }
  0x40   : > { %v702_v35 = vmax.f32 %v1767_v37, 0.0  ;;  %v703_v53 = vmax.f32 %v1772_v44, 0.0  ;;  %1315 = vmatpush3.bf16.msra.mxu0 %v1348_v51  ;;  %v823_v15 = vld [vmem:[%s1939_s6] sm:$0x1]  ;;  %v1057_v51 = vld [vmem:[%s1904_s23 + $0x28] sm:$0xff] }
  0x41   : > { %v705_v43 = vadd.f32 %v704_v31, %v698_v38  ;;  %v1165_v17 = vld [vmem:[%s1941_s8] ss:$0 sm:$0xff] }
  0x43   : > { %v706_v52 = vadd.f32 %v705_v43, %v699_v30 }
  0x45   : > { %v707_v39 = vadd.f32 %v706_v52, %v700_v42 }
  0x47   : > { %v708_v40 = vadd.f32 %v707_v39, %v701_v0 }
  0x49   : > { %v709_v41 = vadd.f32 %v708_v40, %v702_v35  ;;  %v1947_v40 = vsub.s32 0, %v1474_v4 }
  0x4b   : > { %v710_v59 = vadd.f32 %v709_v41, %v703_v53 }
  0x4d   : > { %v711_v46 = vrot.slane %v710_v59, 4 }
  0x4f   : > { %v712_v60 = vadd.f32 %v711_v46, %v710_v59 }
  0x51   : > { %v713_v3 = vrot.slane %v712_v60, 2 }
  0x53   : > { %v714_v5 = vadd.f32 %v713_v3, %v712_v60 }
  0x55   : > { %v715_v54 = vrot.slane %v714_v5, 1 }
  0x57   : > { %v716_v7 = vadd.f32 %v715_v54, %v714_v5 }
  0x59   : > { %v718_v14 = vmul.f32 0.015625, %v716_v7 }
  0x5b   : > { %1277 = vmatmul.mubr.f32.vlgmr.msra.gmra.mxu1 %v718_v14 }
  0x5c   : > { %1280 = vmatpush3.msra.mxu1 %v822_v49  ;;  %1311 = vmatprep.mubr.msk.f32.mxu1 %vm1369_vm0, %v1368_v2 }
  0x5d   : > { %1281 = vmatprep.subr.mxu1 %v1368_v2 }
  0x5e   : > { %1282 = vmatpush3.msra.mxu1 %v821_v48  ;;  %v1053_v48 = vld [vmem:[%s1904_s23 + $0x8] sm:$0xff] }
  0x5f   : > { %1283 = vmatprep.subr.mxu1 %v1368_v2 }
  0x60   : > { %1284 = vmatpush3.msra.mxu1 %v820_v58 }
  0x61   : > { %1285 = vmatprep.subr.mxu1 %v1368_v2 }
  0x62   : > { %1286 = vmatpush3.msra.mxu1 %v819_v12 }
  0x63   : > { %1287 = vmatprep.subr.mxu1 %v1368_v2 }
  0x64   : > { %1288 = vmatpush3.msra.mxu1 %v818_v27 }
  0x65   : > { %1289 = vmatprep.subr.mxu1 %v1368_v2 }
  0x66   : > { %1290 = vmatpush3.msra.mxu1 %v817_v36 }
  0x67   : > { %1291 = vmatprep.subr.mxu1 %v1368_v2 }
  0x68   : > { %1292 = vmatpush3.msra.mxu1 %v816_v19  ;;  %v1058_v19 = vld [vmem:[%s1904_s23 + $0x30] sm:$0xff] }
  0x69   : > { %1293 = vmatprep.subr.mxu1 %v1368_v2 }
  0x6a   : > { %1294 = vmatpush3.msra.mxu1 %v815_v8 }
  0x6b   : > { %1295 = vmatprep.subr.mxu1 %v1368_v2 }
  0x6c   : > { %1296 = vmatpush3.msra.mxu1 %v814_v20 }
  0x6d   : > { %1297 = vmatprep.subr.mxu1 %v1368_v2 }
  0x6e   : > { %1298 = vmatpush3.msra.mxu1 %v813_v47 }
  0x6f   : > { %1299 = vmatprep.subr.mxu1 %v1368_v2 }
  0x70   : > { %1300 = vmatpush3.msra.mxu1 %v812_v21 }
  0x71   : > { %1301 = vmatprep.subr.mxu1 %v1368_v2 }
  0x72   : > { %1302 = vmatpush3.msra.mxu1 %v811_v50  ;;  %v1056_v50 = vld [vmem:[%s1904_s23 + $0x20] sm:$0xff] }
  0x73   : > { %1303 = vmatprep.subr.mxu1 %v1368_v2 }
  0x74   : > { %1304 = vmatpush3.msra.mxu1 %v810_v23 }
  0x75   : > { %1305 = vmatprep.subr.mxu1 %v1368_v2 }
  0x76   : > { %1306 = vmatpush3.msra.mxu1 %v809_v56 }
  0x77   : > { %1307 = vmatprep.subr.mxu1 %v1368_v2 }
  0x78   : > { %1308 = vmatpush3.msra.mxu1 %v808_v57 }
  0x79   : > { %1309 = vmatprep.subr.mxu1 %v1368_v2  ;;  %v1349_v2 = vld [vmem:[%s1940_s7 + $0x30] sm:$0xff]  }
  0x7a   : > { %1310 = vmatpush3.msra.mxu1 %v807_v10  ;;  %1316 = vmatprep.subr.bf16.mxu0 %v1349_v2 }
  0x7b   : > { %1317 = vmatpush3.bf16.msra.mxu0 %v1349_v2 }
  0x7c   : > { %1318 = vmatprep.subr.bf16.mxu0 %v1350_v9 }
  0x7f   : > { %1319 = vmatpush3.bf16.msra.mxu0 %v1350_v9 }
  0x80   : > { %1320 = vmatprep.subr.bf16.mxu0 %v1351_v62 }
  0x83   : > { %1321 = vmatpush3.bf16.msra.mxu0 %v1351_v62 }
  0x84   : > { %1322 = vmatprep.subr.bf16.mxu0 %v1352_v18 }
  0x87   : > { %1323 = vmatpush3.bf16.msra.mxu0 %v1352_v18 }
  0x88   : > { %1324 = vmatprep.subr.bf16.mxu0 %v1353_v22 }
  0x8b   : > { %1325 = vmatpush3.bf16.msra.mxu0 %v1353_v22 }
  0x8c   : > { %1326 = vmatprep.subr.bf16.mxu0 %v1354_v11 }
  0x8f   : > { %1327 = vmatpush3.bf16.msra.mxu0 %v1354_v11 }
  0x90   : > { %1328 = vmatprep.subr.bf16.mxu0 %v1355_v32 }
  0x93   : > { %1329 = vmatpush3.bf16.msra.mxu0 %v1355_v32 }
 0x11b   : > { %v802_v25 = vpop.f32.mrf.mxu1 }
 0x11c   : > { %v803_v26 = vadd.f32 %v802_v25, %v735_v24  ;;  %v1059_v24 = vld [vmem:[%s1904_s23 + $0x38] sm:$0xff] }
 0x11d   : > { %v1278_v6 = vpop.f32.mrf.mxu1 }
 0x11e   : > { %v806_v61 = vmax.f32 %v803_v26, 0.0 }
 0x120   : > { %1312 = vmatmul.mubr.f32.vlgmr.msra.gmra.mxu1 %v806_v61 }
 0x1e0   : > { %v890_v33 = vpop.f32.mrf.mxu1 }
 0x1e1   : > { %v891_v55 = vadd.f32 %v890_v33, %v823_v15 }
 0x1e2   : > { %v1313_v63 = vpop.f32.mrf.mxu1 }
 0x1e3   : > { %v1164_v31 = vmul.f32 -1.442695, %v891_v55 }
 0x1e5   : > { %1356 = vpow2.f32 %v1164_v31 }
 0x1f2   : > { %v1357_v43 = vpop.eup %1356 }
 0x1f3   : > { %v897_v52 = vadd.f32 1.0, %v1357_v43 }
 0x1f5   : > { %1358 = vrcp.f32 %v897_v52 }
 0x202   : > { %v1359_v39 = vpop.eup %1358 }
 0x203   : > { %v903_v41 = vrot.slane %v1359_v39, %v1947_v40 }
 0x205   : > { %v904_v59 = vmul.f32 %v903_v41, %v696_v1  ;;  %v905_v46 = vmul.f32 %v903_v41, %v697_v28  ;;  %v906_v60 = vmul.f32 %v903_v41, %v698_v38  ;;  %v907_v3 = vmul.f32 %v903_v41, %v699_v30  ;;  %v1054_v28 = vld [vmem:[%s1904_s23 + $0x10] sm:$0xff]  ;;  %v1052_v30 = vld [vmem:[%s1904_s23] sm:$0xff] }
 0x206   : > { %v908_v5 = vmul.f32 %v903_v41, %v700_v42  ;;  %v909_v4 = vmul.f32 %v903_v41, %v701_v0  ;;  %v910_v34 = vmul.f32 %v903_v41, %v702_v35  ;;  %v911_v45 = vmul.f32 %v903_v41, %v703_v53  ;;  %v1055_v0 = vld [vmem:[%s1904_s23 + $0x18] sm:$0xff] }
 0x207   : > { %v912_v54 = vpack.c.bf16 %v905_v46, %v904_v59  ;;  %v913_v7 = vpack.c.bf16 %v907_v3, %v906_v60 }
 0x208   : > { %v914_v16 = vpack.c.bf16 %v909_v4, %v908_v5  ;;  %v915_v13 = vpack.c.bf16 %v911_v45, %v910_v34 }
 0x209   : > { %1330 = vmatprep.mubr.bf16.mxu0 %v912_v54 }
 0x20a   : > { %1331 = vmatmul.mubr.bf16.vlgmr.msra.gmra.mxu0 %v913_v7 }
 0x20b   : > { %1334 = vmatprep.mubr.bf16.mxu0 %v914_v16 }
 0x212   : > { %1335 = vmatmul.mubr.bf16.gmra.mxu0 %v915_v13 }
 0x2ca   : > { %v1332_v1 = vpop.f32.mrf.mxu0 }
 0x2cb   : > { %v1030_v38 = vadd.f32 %v1332_v1, %v1165_v17 }
 0x2cc   : > { %v1021_v29 = vpop.f32.mrf.mxu0 }
 0x2cd   : > { %v1062_v37 = vadd.f32 %v1054_v28, %v1030_v38  ;;  %v1022_v42 = vadd.f32 %v1165_v17, %v1021_v29 }
 0x2ce   : > { %v1333_v44 = vpop.f32.mrf.mxu0 }
 0x2cf   : > { %v1070_v35 = vmax.f32 %v1062_v37, 0.0  ;;  %v1060_v53 = vadd.f32 %v1052_v30, %v1022_v42  ;;  %v1033_v14 = vadd.f32 %v1333_v44, %v1165_v17 }
 0x2d0   : > { %v1024_v49 = vpop.f32.mrf.mxu0 }
 0x2d1   : > { %1078 = vst [vmem:[%s1914_s27 + $0x10] sm:$0xff] %v1070_v35  ;;  %v1068_v58 = vmax.f32 %v1060_v53, 0.0  ;;  %v1063_v12 = vadd.f32 %v1055_v0, %v1033_v14  ;;  %v1025_v27 = vadd.f32 %v1165_v17, %v1024_v49 }
 0x2d2   : > { %v1336_v36 = vpop.f32.mrf.mxu0 }
 0x2d3   : > { %1076 = vst [vmem:[%s1914_s27] sm:$0xff] %v1068_v58  ;;  %v1071_v8 = vmax.f32 %v1063_v12, 0.0  ;;  %v1061_v20 = vadd.f32 %v1053_v48, %v1025_v27  ;;  %v1046_v47 = vadd.f32 %v1336_v36, %v1165_v17 }
 0x2d4   : > { %v1037_v21 = vpop.f32.mrf.mxu0 }
 0x2d5   : > { %1079 = vst [vmem:[%s1914_s27 + $0x18] sm:$0xff] %v1071_v8  ;;  %v1069_v23 = vmax.f32 %v1061_v20, 0.0  ;;  %v1066_v56 = vadd.f32 %v1058_v19, %v1046_v47  ;;  %v1038_v57 = vadd.f32 %v1165_v17, %v1037_v21 }
 0x2d6   : > { %v1337_v10 = vpop.f32.mrf.mxu0 }
 0x2d7   : > { %1077 = vst [vmem:[%s1914_s27 + $0x8] sm:$0xff] %v1069_v23  ;;  %v1074_v25 = vmax.f32 %v1066_v56, 0.0  ;;  %v1064_v26 = vadd.f32 %v1056_v50, %v1038_v57  ;;  %v1049_v6 = vadd.f32 %v1337_v10, %v1165_v17 }
 0x2d8   : > { %v1040_v61 = vpop.f32.mrf.mxu0 }
 0x2d9   : > { %1082 = vst [vmem:[%s1914_s27 + $0x30] sm:$0xff] %v1074_v25  ;;  %v1072_v2 = vmax.f32 %v1064_v26, 0.0  ;;  %v1067_v9 = vadd.f32 %v1059_v24, %v1049_v6  ;;  %v1041_v62 = vadd.f32 %v1165_v17, %v1040_v61 }
 0x2db   : > { %1080 = vst [vmem:[%s1914_s27 + $0x20] sm:$0xff] %v1072_v2  ;;  %v1075_v18 = vmax.f32 %v1067_v9, 0.0  ;;  %v1065_v22 = vadd.f32 %v1057_v51, %v1041_v62 }
 0x2dd   : > { %1083 = vst [vmem:[%s1914_s27 + $0x38] sm:$0xff] %v1075_v18  ;;  %v1073_v11 = vmax.f32 %v1065_v22, 0.0 }
 0x2df   : > { %1081 = vst [vmem:[%s1914_s27 + $0x28] sm:$0xff] %v1073_v11 }
 0x2e0 PF: > { %s20_s13 = sadd.s32 1, %s1366_s13  }
 0x2e1   : > { %p17_p4 = scmp.ge.s32.totalorder %s20_s13, 4  }
 0x2e3   :  { %19 = sbr.rel (!%p17_p4) target bundleno = 1 (0x1), region = 95 }

</bundles_post_ra>
